<compile_context>
chip_gen: v7x
topology: tpu7x:2x2x1
jax: 0.10.0
libtpu: 0.0.40
codegen_flags: <defaults>
</compile_context>

<pallas_src>
import functools
import math

import jax
import jax.numpy as jnp
from jax.experimental import pallas as pl
from jax.experimental.pallas import tpu as pltpu


# ----------------------------------------------------------------------------
# Helpers
# ----------------------------------------------------------------------------
def _replicated_spec(shape):
    """BlockSpec covering the full array, replicated across the 1-D batch grid."""
    zero = (0,) * len(shape)
    return pl.BlockSpec(shape, lambda b, _z=zero: _z)


def _layernorm(x, w, b, eps=1e-5):
    mu = jnp.mean(x, axis=-1, keepdims=True)
    var = jnp.mean(jnp.square(x - mu), axis=-1, keepdims=True)
    return (x - mu) * jax.lax.rsqrt(var + eps) * w + b


def _mm(a, b):
    """bf16 MXU matmul with f32 accumulation."""
    return jnp.dot(a.astype(jnp.bfloat16), b.astype(jnp.bfloat16),
                   preferred_element_type=jnp.float32)


def _pick_batch_block(B, S, target_rows=256):
    """Smallest divisor of B giving >= target token rows (128 is enough on v5e)."""
    for bt in range(1, B + 1):
        if B % bt == 0 and bt * S >= target_rows:
            return bt
    return B


# ----------------------------------------------------------------------------
# Fused kernel: patch-embed + pos-add + transformer stack + final LN + mean
# pool + projection head.  One grid step processes a block of Bt sequences.
# ----------------------------------------------------------------------------
def _fused_kernel(p_ref, convw_ref, convb_ref, pos_ref,
                  wqkv_ref, bqkv_ref, wo_ref, bo_ref,
                  ln1w_ref, ln1b_ref, ln2w_ref, ln2b_ref,
                  wff1_ref, bff1_ref, wff2_ref, bff2_ref,
                  lnfw_ref, lnfb_ref,
                  wp1_ref, bp1_ref, wp2_ref, bp2_ref,
                  o_ref, *, num_layers, num_heads, seq_len, batch_block):
    Bt, S, H = batch_block, seq_len, num_heads
    CP = p_ref.shape[-1]
    D = convw_ref.shape[-1]
    hd = D // H
    N = Bt * S
    bf16 = jnp.bfloat16

    # ---- patch embedding (Conv1d with stride == kernel as one matmul) ----
    patches = p_ref[...].reshape(N, CP)
    x = _mm(patches, convw_ref[...]) + convb_ref[...]            # (N, D) f32
    # positional encoding (linear interpolate is identity at matching length)
    x = (x.reshape(Bt, S, D) + pos_ref[...][None, :, :]).reshape(N, D)

    for l in range(num_layers):                                   # static unroll
        # ---- multi-head self-attention; 1/sqrt(hd) folded into Wq/bq ----
        qkv = _mm(x, wqkv_ref[l]) + bqkv_ref[l]                   # (N, 3D) f32
        wo_l = wo_ref[l]                                          # (D, D) bf16
        attn = None
        for h in range(H):                                        # static unroll
            qh = qkv[:, h * hd:(h + 1) * hd].astype(bf16).reshape(Bt, S, hd)
            kh = qkv[:, D + h * hd:D + (h + 1) * hd].astype(bf16).reshape(Bt, S, hd)
            vh = qkv[:, 2 * D + h * hd:2 * D + (h + 1) * hd].astype(bf16).reshape(Bt, S, hd)
            s = jnp.einsum('bqd,bkd->bqk', qh, kh,
                           preferred_element_type=jnp.float32)    # (Bt, S, S)
            s = s - jnp.max(s, axis=-1, keepdims=True)
            p = jnp.exp(s)
            p = p * pl.reciprocal(jnp.sum(p, axis=-1, keepdims=True), approx=True)
            ctx = jnp.einsum('bqk,bkd->bqd', p.astype(bf16), vh,
                             preferred_element_type=jnp.float32)  # (Bt, S, hd)
            # accumulate per-head context through its slice of W_out (no concat)
            contrib = _mm(ctx.reshape(N, hd), wo_l[h * hd:(h + 1) * hd, :])
            attn = contrib if attn is None else attn + contrib
        attn = attn + bo_ref[l]
        x = _layernorm(x + attn, ln1w_ref[l], ln1b_ref[l])

        # ---- feed forward (ReLU, post-norm) ----
        h1 = jnp.maximum(_mm(x, wff1_ref[l]) + bff1_ref[l], 0.0)
        h2 = _mm(h1, wff2_ref[l]) + bff2_ref[l]
        x = _layernorm(x + h2, ln2w_ref[l], ln2b_ref[l])

    # ---- final LayerNorm + mean pool over the sequence axis ----
    x = _layernorm(x, lnfw_ref[...], lnfb_ref[...])
    feat = jnp.mean(x.reshape(Bt, S, D), axis=1)                  # (Bt, D)

    # ---- projection head: Linear -> GELU(exact erf) -> Linear ----
    z = _mm(feat, wp1_ref[...]) + bp1_ref[...]
    z = 0.5 * z * (1.0 + jax.lax.erf(z * (2.0 ** -0.5)))
    o_ref[...] = (_mm(z, wp2_ref[...]) + bp2_ref[...]).astype(o_ref.dtype)


# ----------------------------------------------------------------------------
# Wrapper
# ----------------------------------------------------------------------------
def dinov2_eeg_encoder_forward(x, params, cfg):
    B, C, T = x.shape
    P = cfg["patch_size"]
    S = T // P
    D = cfg["embed_dim"]
    M = cfg["mlp_dim"]
    Pd = cfg["proj_dim"]
    L = cfg["num_layers"]
    H = cfg["num_heads"]
    CP = C * P
    hd = D // H
    assert S <= params["pos_embed"].shape[1], "Increase max_len for positional encoding."

    bf16 = jnp.bfloat16
    scale = 1.0 / math.sqrt(hd)

    # ---- glue: Conv1d(stride==kernel) becomes a patch matmul operand ----
    patches = x[:, :, :S * P].reshape(B, C, S, P).transpose(0, 2, 1, 3).reshape(B, S, CP)

    # Weight prep (trace-time): bf16 cast for MXU + halved DMA footprint,
    # 1/sqrt(hd) folded into the q part of W_qkv / b_qkv.
    conv_w = params["conv_w"].reshape(D, CP).T.astype(bf16)        # (CP, D)
    conv_b = params["conv_b"].reshape(1, D)
    pos = params["pos_embed"][0, :S, :]                            # (S, D)
    w_qkv = params["w_qkv"].at[:, :, :D].multiply(scale).astype(bf16)
    b_qkv = params["b_qkv"].at[:, :, :D].multiply(scale)
    w_out = params["w_out"].astype(bf16)
    w_ff1 = params["w_ff1"].astype(bf16)
    w_ff2 = params["w_ff2"].astype(bf16)
    w_p1 = params["w_p1"].astype(bf16)
    w_p2 = params["w_p2"].astype(bf16)

    # Pack enough sequences per grid step to fill the MXU rows
    # (target ~256 token rows; 128 is already enough on v5e).
    Bt = _pick_batch_block(B, S, target_rows=256)
    grid = (B // Bt,)

    kernel = functools.partial(_fused_kernel, num_layers=L, num_heads=H,
                               seq_len=S, batch_block=Bt)

    out = pl.pallas_call(
        kernel,
        out_shape=jax.ShapeDtypeStruct((B, Pd), jnp.float32),
        grid=grid,
        in_specs=[
            pl.BlockSpec((Bt, S, CP), lambda b: (b, 0, 0)),
            _replicated_spec((CP, D)), _replicated_spec((1, D)), _replicated_spec((S, D)),
            _replicated_spec((L, D, 3 * D)), _replicated_spec((L, 1, 3 * D)),
            _replicated_spec((L, D, D)), _replicated_spec((L, 1, D)),
            _replicated_spec((L, 1, D)), _replicated_spec((L, 1, D)),
            _replicated_spec((L, 1, D)), _replicated_spec((L, 1, D)),
            _replicated_spec((L, D, M)), _replicated_spec((L, 1, M)),
            _replicated_spec((L, M, D)), _replicated_spec((L, 1, D)),
            _replicated_spec((1, D)), _replicated_spec((1, D)),
            _replicated_spec((D, Pd)), _replicated_spec((1, Pd)),
            _replicated_spec((Pd, Pd)), _replicated_spec((1, Pd)),
        ],
        out_specs=pl.BlockSpec((Bt, Pd), lambda b: (b, 0)),
        compiler_params=pltpu.CompilerParams(
            dimension_semantics=("parallel",),
            vmem_limit_bytes=32 * 1024 * 1024),
    )(patches, conv_w, conv_b, pos,
      w_qkv, b_qkv, w_out, params["b_out"],
      params["ln1_w"], params["ln1_b"], params["ln2_w"], params["ln2_b"],
      w_ff1, params["b_ff1"], w_ff2, params["b_ff2"],
      params["lnf_w"], params["lnf_b"],
      w_p1, params["b_p1"], w_p2, params["b_p2"])
    return out


# ----------------------------------------------------------------------------
# Pure-JAX reference (mirrors the PyTorch eval-mode forward, f32)
# ----------------------------------------------------------------------------
def reference_forward(x, params, cfg):
    B, C, T = x.shape
    P = cfg["patch_size"]
    S = T // P
    D = cfg["embed_dim"]
    H = cfg["num_heads"]
    hd = D // H
    L = cfg["num_layers"]

    patches = x[:, :, :S * P].reshape(B, C, S, P).transpose(0, 2, 1, 3).reshape(B, S, C * P)
    h = patches @ params["conv_w"].reshape(D, C * P).T + params["conv_b"][None, None, :]
    h = h + params["pos_embed"][:, :S, :]

    for l in range(L):
        qkv = h @ params["w_qkv"][l] + params["b_qkv"][l]
        q, k, v = qkv[..., :D], qkv[..., D:2 * D], qkv[..., 2 * D:]
        outs = []
        for i in range(H):
            qh = q[..., i * hd:(i + 1) * hd]
            kh = k[..., i * hd:(i + 1) * hd]
            vh = v[..., i * hd:(i + 1) * hd]
            s = jnp.einsum("bqd,bkd->bqk", qh, kh) / math.sqrt(hd)
            p = jax.nn.softmax(s, axis=-1)
            outs.append(jnp.einsum("bqk,bkd->bqd", p, vh))
        attn = jnp.concatenate(outs, axis=-1) @ params["w_out"][l] + params["b_out"][l]
        h = _layernorm(h + attn, params["ln1_w"][l], params["ln1_b"][l])
        ff = jnp.maximum(h @ params["w_ff1"][l] + params["b_ff1"][l], 0.0)
        ff = ff @ params["w_ff2"][l] + params["b_ff2"][l]
        h = _layernorm(h + ff, params["ln2_w"][l], params["ln2_b"][l])

    h = _layernorm(h, params["lnf_w"], params["lnf_b"])
    feat = h.mean(axis=1)
    z = feat @ params["w_p1"] + params["b_p1"]
    z = 0.5 * z * (1.0 + jax.lax.erf(z * (2.0 ** -0.5)))
    return z @ params["w_p2"] + params["b_p2"]


# ----------------------------------------------------------------------------
# Deterministic synthetic parameters
# ----------------------------------------------------------------------------
def make_params(key, cfg):
    C, D, P = cfg["in_channels"], cfg["embed_dim"], cfg["patch_size"]
    M, Pd, L = cfg["mlp_dim"], cfg["proj_dim"], cfg["num_layers"]
    ML = cfg["max_len"]

    def nrm(k, shape, scale=0.05):
        return scale * jax.random.normal(k, shape, dtype=jnp.float32)

    ks = jax.random.split(key, 16)
    params = {
        "conv_w": nrm(ks[0], (D, C, P)),
        "conv_b": nrm(ks[1], (D,)),
        "pos_embed": nrm(ks[2], (1, ML, D)),
        "w_qkv": nrm(ks[3], (L, D, 3 * D)),
        "b_qkv": nrm(ks[4], (L, 1, 3 * D)),
        "w_out": nrm(ks[5], (L, D, D)),
        "b_out": nrm(ks[6], (L, 1, D)),
        "ln1_w": jnp.ones((L, 1, D), jnp.float32),
        "ln1_b": jnp.zeros((L, 1, D), jnp.float32),
        "ln2_w": jnp.ones((L, 1, D), jnp.float32),
        "ln2_b": jnp.zeros((L, 1, D), jnp.float32),
        "w_ff1": nrm(ks[7], (L, D, M)),
        "b_ff1": nrm(ks[8], (L, 1, M)),
        "w_ff2": nrm(ks[9], (L, M, D)),
        "b_ff2": nrm(ks[10], (L, 1, D)),
        "lnf_w": jnp.ones((1, D), jnp.float32),
        "lnf_b": jnp.zeros((1, D), jnp.float32),
        "w_p1": nrm(ks[11], (D, Pd)),
        "b_p1": nrm(ks[12], (1, Pd)),
        "w_p2": nrm(ks[13], (Pd, Pd)),
        "b_p2": nrm(ks[14], (1, Pd)),
    }
    return params


# ----------------------------------------------------------------------------
if __name__ == "__main__":
    cfg = dict(
        in_channels=4,     # small stand-in for 63
        embed_dim=32,      # small stand-in for 192
        patch_size=4,      # small stand-in for 10
        num_layers=2,      # small stand-in for 4
        num_heads=4,
        max_len=16,        # small stand-in for 250
        mlp_dim=64,        # small stand-in for 512
        proj_dim=48,       # small stand-in for 786
    )
    B, C, T = 2, cfg["in_channels"], 32   # sequence length divisible by patch_size

    key = jax.random.PRNGKey(0)
    kx, kp = jax.random.split(key)
    x = jax.random.normal(kx, (B, C, T), dtype=jnp.float32)
    params = make_params(kp, cfg)

    out = dinov2_eeg_encoder_forward(x, params, cfg)
    out = jax.block_until_ready(out)

    ref = jax.block_until_ready(reference_forward(x, params, cfg))
    max_diff = float(jnp.max(jnp.abs(out - ref)))
    assert out.shape == (B, cfg["proj_dim"]), out.shape
    assert max_diff < 2e-2, f"mismatch vs reference: {max_diff}"

    print("KERNEL_OK")
</pallas_src>

<mosaic_0001>
module attributes {stable_mosaic.version = 11 : i64} {
  func.func @_fused_kernel(%arg0: i32, %arg1: memref<2x8x16xf32, #tpu.memory_space<vmem>>, %arg2: memref<16x32xbf16, #tpu.memory_space<vmem>>, %arg3: memref<1x32xf32, #tpu.memory_space<vmem>>, %arg4: memref<8x32xf32, #tpu.memory_space<vmem>>, %arg5: memref<2x32x96xbf16, #tpu.memory_space<vmem>>, %arg6: memref<2x1x96xf32, #tpu.memory_space<vmem>>, %arg7: memref<2x32x32xbf16, #tpu.memory_space<vmem>>, %arg8: memref<2x1x32xf32, #tpu.memory_space<vmem>>, %arg9: memref<2x1x32xf32, #tpu.memory_space<vmem>>, %arg10: memref<2x1x32xf32, #tpu.memory_space<vmem>>, %arg11: memref<2x1x32xf32, #tpu.memory_space<vmem>>, %arg12: memref<2x1x32xf32, #tpu.memory_space<vmem>>, %arg13: memref<2x32x64xbf16, #tpu.memory_space<vmem>>, %arg14: memref<2x1x64xf32, #tpu.memory_space<vmem>>, %arg15: memref<2x64x32xbf16, #tpu.memory_space<vmem>>, %arg16: memref<2x1x32xf32, #tpu.memory_space<vmem>>, %arg17: memref<1x32xf32, #tpu.memory_space<vmem>>, %arg18: memref<1x32xf32, #tpu.memory_space<vmem>>, %arg19: memref<32x48xbf16, #tpu.memory_space<vmem>>, %arg20: memref<1x48xf32, #tpu.memory_space<vmem>>, %arg21: memref<48x48xbf16, #tpu.memory_space<vmem>>, %arg22: memref<1x48xf32, #tpu.memory_space<vmem>>, %arg23: memref<2x48xf32, #tpu.memory_space<vmem>>) attributes {dimension_semantics = [#tpu.dimension_semantics<parallel>], iteration_bounds = array<i64: 1>, scalar_prefetch = 0 : i64, scratch_operands = 0 : i64, tpu.core_type = #tpu.core_type<tc>, window_params = [{transform_indices = @transform_0, window_bounds = array<i64: 2, 8, 16>}, {pipeline_mode = #tpu.pipeline_mode<synchronous>, transform_indices = @transform_1, window_bounds = array<i64: 16, 32>}, {pipeline_mode = #tpu.pipeline_mode<synchronous>, transform_indices = @transform_2, window_bounds = array<i64: 1, 32>}, {pipeline_mode = #tpu.pipeline_mode<synchronous>, transform_indices = @transform_3, window_bounds = array<i64: 8, 32>}, {pipeline_mode = #tpu.pipeline_mode<synchronous>, transform_indices = @transform_4, window_bounds = array<i64: 2, 32, 96>}, {pipeline_mode = #tpu.pipeline_mode<synchronous>, transform_indices = @transform_5, window_bounds = array<i64: 2, 1, 96>}, {pipeline_mode = #tpu.pipeline_mode<synchronous>, transform_indices = @transform_6, window_bounds = array<i64: 2, 32, 32>}, {pipeline_mode = #tpu.pipeline_mode<synchronous>, transform_indices = @transform_7, window_bounds = array<i64: 2, 1, 32>}, {pipeline_mode = #tpu.pipeline_mode<synchronous>, transform_indices = @transform_8, window_bounds = array<i64: 2, 1, 32>}, {pipeline_mode = #tpu.pipeline_mode<synchronous>, transform_indices = @transform_9, window_bounds = array<i64: 2, 1, 32>}, {pipeline_mode = #tpu.pipeline_mode<synchronous>, transform_indices = @transform_10, window_bounds = array<i64: 2, 1, 32>}, {pipeline_mode = #tpu.pipeline_mode<synchronous>, transform_indices = @transform_11, window_bounds = array<i64: 2, 1, 32>}, {pipeline_mode = #tpu.pipeline_mode<synchronous>, transform_indices = @transform_12, window_bounds = array<i64: 2, 32, 64>}, {pipeline_mode = #tpu.pipeline_mode<synchronous>, transform_indices = @transform_13, window_bounds = array<i64: 2, 1, 64>}, {pipeline_mode = #tpu.pipeline_mode<synchronous>, transform_indices = @transform_14, window_bounds = array<i64: 2, 64, 32>}, {pipeline_mode = #tpu.pipeline_mode<synchronous>, transform_indices = @transform_15, window_bounds = array<i64: 2, 1, 32>}, {pipeline_mode = #tpu.pipeline_mode<synchronous>, transform_indices = @transform_16, window_bounds = array<i64: 1, 32>}, {pipeline_mode = #tpu.pipeline_mode<synchronous>, transform_indices = @transform_17, window_bounds = array<i64: 1, 32>}, {pipeline_mode = #tpu.pipeline_mode<synchronous>, transform_indices = @transform_18, window_bounds = array<i64: 32, 48>}, {pipeline_mode = #tpu.pipeline_mode<synchronous>, transform_indices = @transform_19, window_bounds = array<i64: 1, 48>}, {pipeline_mode = #tpu.pipeline_mode<synchronous>, transform_indices = @transform_20, window_bounds = array<i64: 48, 48>}, {pipeline_mode = #tpu.pipeline_mode<synchronous>, transform_indices = @transform_21, window_bounds = array<i64: 1, 48>}, {transform_indices = @transform_22, window_bounds = array<i64: 2, 48>}]} {
    %c0 = arith.constant 0 : index
    %c0_0 = arith.constant 0 : index
    %c0_1 = arith.constant 0 : index
    %0 = vector.load %arg1[%c0, %c0_0, %c0_1] : memref<2x8x16xf32, #tpu.memory_space<vmem>>, vector<2x8x16xf32>
    %1 = vector.shape_cast %0 : vector<2x8x16xf32> to vector<16x16xf32>
    %c0_2 = arith.constant 0 : index
    %c0_3 = arith.constant 0 : index
    %2 = vector.load %arg2[%c0_2, %c0_3] : memref<16x32xbf16, #tpu.memory_space<vmem>>, vector<16x32xbf16>
    %3 = arith.truncf %1 : vector<16x16xf32> to vector<16x16xbf16>
    %cst = arith.constant dense<0.000000e+00> : vector<16x32xf32>
    %4 = tpu.matmul %3, %2, %cst {dimension_numbers = #tpu.dot_dimension_numbers<[1], [0], [0], [1], [0, 0, 1, 1], [], []>} : vector<16x16xbf16>, vector<16x32xbf16>, vector<16x32xf32> -> vector<16x32xf32>
    %c0_4 = arith.constant 0 : index
    %c0_5 = arith.constant 0 : index
    %5 = vector.load %arg3[%c0_4, %c0_5] : memref<1x32xf32, #tpu.memory_space<vmem>>, vector<1x32xf32>
    %6 = vector.broadcast %5 : vector<1x32xf32> to vector<16x32xf32>
    %7 = arith.addf %4, %6 : vector<16x32xf32>
    %8 = vector.shape_cast %7 : vector<16x32xf32> to vector<2x8x32xf32>
    %c0_6 = arith.constant 0 : index
    %c0_7 = arith.constant 0 : index
    %9 = vector.load %arg4[%c0_6, %c0_7] : memref<8x32xf32, #tpu.memory_space<vmem>>, vector<8x32xf32>
    %10 = vector.shape_cast %9 : vector<8x32xf32> to vector<1x8x32xf32>
    %11 = vector.broadcast %10 : vector<1x8x32xf32> to vector<2x8x32xf32>
    %12 = arith.addf %8, %11 : vector<2x8x32xf32>
    %13 = vector.shape_cast %12 : vector<2x8x32xf32> to vector<16x32xf32>
    %c0_8 = arith.constant 0 : index
    %c0_9 = arith.constant 0 : index
    %c0_10 = arith.constant 0 : index
    %14 = vector.load %arg5[%c0_8, %c0_9, %c0_10] : memref<2x32x96xbf16, #tpu.memory_space<vmem>>, vector<1x32x96xbf16>
    %15 = vector.shape_cast %14 : vector<1x32x96xbf16> to vector<32x96xbf16>
    %16 = arith.truncf %13 : vector<16x32xf32> to vector<16x32xbf16>
    %cst_11 = arith.constant dense<0.000000e+00> : vector<16x96xf32>
    %17 = tpu.matmul %16, %15, %cst_11 {dimension_numbers = #tpu.dot_dimension_numbers<[1], [0], [0], [1], [0, 0, 1, 1], [], []>} : vector<16x32xbf16>, vector<32x96xbf16>, vector<16x96xf32> -> vector<16x96xf32>
    %c0_12 = arith.constant 0 : index
    %c0_13 = arith.constant 0 : index
    %c0_14 = arith.constant 0 : index
    %18 = vector.load %arg6[%c0_12, %c0_13, %c0_14] : memref<2x1x96xf32, #tpu.memory_space<vmem>>, vector<1x1x96xf32>
    %19 = vector.shape_cast %18 : vector<1x1x96xf32> to vector<1x96xf32>
    %20 = vector.broadcast %19 : vector<1x96xf32> to vector<16x96xf32>
    %21 = arith.addf %17, %20 : vector<16x96xf32>
    %c0_15 = arith.constant 0 : index
    %c0_16 = arith.constant 0 : index
    %c0_17 = arith.constant 0 : index
    %22 = vector.load %arg7[%c0_15, %c0_16, %c0_17] : memref<2x32x32xbf16, #tpu.memory_space<vmem>>, vector<1x32x32xbf16>
    %23 = vector.shape_cast %22 : vector<1x32x32xbf16> to vector<32x32xbf16>
    %24 = vector.extract_strided_slice %21 {offsets = [0, 0], sizes = [16, 8], strides = [1, 1]} : vector<16x96xf32> to vector<16x8xf32>
    %25 = arith.truncf %24 : vector<16x8xf32> to vector<16x8xbf16>
    %26 = vector.shape_cast %25 : vector<16x8xbf16> to vector<2x8x8xbf16>
    %27 = vector.extract_strided_slice %21 {offsets = [0, 32], sizes = [16, 8], strides = [1, 1]} : vector<16x96xf32> to vector<16x8xf32>
    %28 = arith.truncf %27 : vector<16x8xf32> to vector<16x8xbf16>
    %29 = vector.shape_cast %28 : vector<16x8xbf16> to vector<2x8x8xbf16>
    %30 = vector.extract_strided_slice %21 {offsets = [0, 64], sizes = [16, 8], strides = [1, 1]} : vector<16x96xf32> to vector<16x8xf32>
    %31 = arith.truncf %30 : vector<16x8xf32> to vector<16x8xbf16>
    %32 = vector.shape_cast %31 : vector<16x8xbf16> to vector<2x8x8xbf16>
    "tpu.trace_start"() <{level = 10 : i32, message = "bqd,bkd->bqk"}> : () -> ()
    %cst_18 = arith.constant dense<0.000000e+00> : vector<2x8x8xf32>
    %33 = tpu.matmul %26, %29, %cst_18 {dimension_numbers = #tpu.dot_dimension_numbers<[2], [2], [1], [1], [0, 0, 0, 1, 1, 1], [0], [0]>} : vector<2x8x8xbf16>, vector<2x8x8xbf16>, vector<2x8x8xf32> -> vector<2x8x8xf32>
    "tpu.trace_stop"() : () -> ()
    %cst_19 = arith.constant dense<0xFF800000> : vector<2x8xf32>
    %34 = vector.multi_reduction <maximumf>, %33, %cst_19 [2] : vector<2x8x8xf32> to vector<2x8xf32>
    %35 = vector.shape_cast %34 : vector<2x8xf32> to vector<2x8x1xf32>
    %36 = vector.broadcast %35 : vector<2x8x1xf32> to vector<2x8x8xf32>
    %37 = arith.subf %33, %36 : vector<2x8x8xf32>
    %38 = math.exp %37 : vector<2x8x8xf32>
    %cst_20 = arith.constant dense<0.000000e+00> : vector<2x8xf32>
    %39 = vector.multi_reduction <add>, %38, %cst_20 [2] : vector<2x8x8xf32> to vector<2x8xf32>
    %40 = vector.shape_cast %39 : vector<2x8xf32> to vector<2x8x1xf32>
    %41 = tpu.reciprocal %40 {approx = true} : vector<2x8x1xf32> -> vector<2x8x1xf32>
    %42 = vector.broadcast %41 : vector<2x8x1xf32> to vector<2x8x8xf32>
    %43 = arith.mulf %38, %42 : vector<2x8x8xf32>
    %44 = arith.truncf %43 : vector<2x8x8xf32> to vector<2x8x8xbf16>
    "tpu.trace_start"() <{level = 10 : i32, message = "bqk,bkd->bqd"}> : () -> ()
    %cst_21 = arith.constant dense<0.000000e+00> : vector<2x8x8xf32>
    %45 = tpu.matmul %44, %32, %cst_21 {dimension_numbers = #tpu.dot_dimension_numbers<[2], [1], [1], [2], [0, 0, 0, 1, 1, 2], [0], [0]>} : vector<2x8x8xbf16>, vector<2x8x8xbf16>, vector<2x8x8xf32> -> vector<2x8x8xf32>
    "tpu.trace_stop"() : () -> ()
    %46 = vector.shape_cast %45 : vector<2x8x8xf32> to vector<16x8xf32>
    %47 = vector.extract_strided_slice %23 {offsets = [0, 0], sizes = [8, 32], strides = [1, 1]} : vector<32x32xbf16> to vector<8x32xbf16>
    %48 = arith.truncf %46 : vector<16x8xf32> to vector<16x8xbf16>
    %cst_22 = arith.constant dense<0.000000e+00> : vector<16x32xf32>
    %49 = tpu.matmul %48, %47, %cst_22 {dimension_numbers = #tpu.dot_dimension_numbers<[1], [0], [0], [1], [0, 0, 1, 1], [], []>} : vector<16x8xbf16>, vector<8x32xbf16>, vector<16x32xf32> -> vector<16x32xf32>
    %50 = vector.extract_strided_slice %21 {offsets = [0, 8], sizes = [16, 8], strides = [1, 1]} : vector<16x96xf32> to vector<16x8xf32>
    %51 = arith.truncf %50 : vector<16x8xf32> to vector<16x8xbf16>
    %52 = vector.shape_cast %51 : vector<16x8xbf16> to vector<2x8x8xbf16>
    %53 = vector.extract_strided_slice %21 {offsets = [0, 40], sizes = [16, 8], strides = [1, 1]} : vector<16x96xf32> to vector<16x8xf32>
    %54 = arith.truncf %53 : vector<16x8xf32> to vector<16x8xbf16>
    %55 = vector.shape_cast %54 : vector<16x8xbf16> to vector<2x8x8xbf16>
    %56 = vector.extract_strided_slice %21 {offsets = [0, 72], sizes = [16, 8], strides = [1, 1]} : vector<16x96xf32> to vector<16x8xf32>
    %57 = arith.truncf %56 : vector<16x8xf32> to vector<16x8xbf16>
    %58 = vector.shape_cast %57 : vector<16x8xbf16> to vector<2x8x8xbf16>
    "tpu.trace_start"() <{level = 10 : i32, message = "bqd,bkd->bqk"}> : () -> ()
    %cst_23 = arith.constant dense<0.000000e+00> : vector<2x8x8xf32>
    %59 = tpu.matmul %52, %55, %cst_23 {dimension_numbers = #tpu.dot_dimension_numbers<[2], [2], [1], [1], [0, 0, 0, 1, 1, 1], [0], [0]>} : vector<2x8x8xbf16>, vector<2x8x8xbf16>, vector<2x8x8xf32> -> vector<2x8x8xf32>
    "tpu.trace_stop"() : () -> ()
    %cst_24 = arith.constant dense<0xFF800000> : vector<2x8xf32>
    %60 = vector.multi_reduction <maximumf>, %59, %cst_24 [2] : vector<2x8x8xf32> to vector<2x8xf32>
    %61 = vector.shape_cast %60 : vector<2x8xf32> to vector<2x8x1xf32>
    %62 = vector.broadcast %61 : vector<2x8x1xf32> to vector<2x8x8xf32>
    %63 = arith.subf %59, %62 : vector<2x8x8xf32>
    %64 = math.exp %63 : vector<2x8x8xf32>
    %cst_25 = arith.constant dense<0.000000e+00> : vector<2x8xf32>
    %65 = vector.multi_reduction <add>, %64, %cst_25 [2] : vector<2x8x8xf32> to vector<2x8xf32>
    %66 = vector.shape_cast %65 : vector<2x8xf32> to vector<2x8x1xf32>
    %67 = tpu.reciprocal %66 {approx = true} : vector<2x8x1xf32> -> vector<2x8x1xf32>
    %68 = vector.broadcast %67 : vector<2x8x1xf32> to vector<2x8x8xf32>
    %69 = arith.mulf %64, %68 : vector<2x8x8xf32>
    %70 = arith.truncf %69 : vector<2x8x8xf32> to vector<2x8x8xbf16>
    "tpu.trace_start"() <{level = 10 : i32, message = "bqk,bkd->bqd"}> : () -> ()
    %cst_26 = arith.constant dense<0.000000e+00> : vector<2x8x8xf32>
    %71 = tpu.matmul %70, %58, %cst_26 {dimension_numbers = #tpu.dot_dimension_numbers<[2], [1], [1], [2], [0, 0, 0, 1, 1, 2], [0], [0]>} : vector<2x8x8xbf16>, vector<2x8x8xbf16>, vector<2x8x8xf32> -> vector<2x8x8xf32>
    "tpu.trace_stop"() : () -> ()
    %72 = vector.shape_cast %71 : vector<2x8x8xf32> to vector<16x8xf32>
    %73 = vector.extract_strided_slice %23 {offsets = [8, 0], sizes = [8, 32], strides = [1, 1]} : vector<32x32xbf16> to vector<8x32xbf16>
    %74 = arith.truncf %72 : vector<16x8xf32> to vector<16x8xbf16>
    %cst_27 = arith.constant dense<0.000000e+00> : vector<16x32xf32>
    %75 = tpu.matmul %74, %73, %cst_27 {dimension_numbers = #tpu.dot_dimension_numbers<[1], [0], [0], [1], [0, 0, 1, 1], [], []>} : vector<16x8xbf16>, vector<8x32xbf16>, vector<16x32xf32> -> vector<16x32xf32>
    %76 = arith.addf %49, %75 : vector<16x32xf32>
    %77 = vector.extract_strided_slice %21 {offsets = [0, 16], sizes = [16, 8], strides = [1, 1]} : vector<16x96xf32> to vector<16x8xf32>
    %78 = arith.truncf %77 : vector<16x8xf32> to vector<16x8xbf16>
    %79 = vector.shape_cast %78 : vector<16x8xbf16> to vector<2x8x8xbf16>
    %80 = vector.extract_strided_slice %21 {offsets = [0, 48], sizes = [16, 8], strides = [1, 1]} : vector<16x96xf32> to vector<16x8xf32>
    %81 = arith.truncf %80 : vector<16x8xf32> to vector<16x8xbf16>
    %82 = vector.shape_cast %81 : vector<16x8xbf16> to vector<2x8x8xbf16>
    %83 = vector.extract_strided_slice %21 {offsets = [0, 80], sizes = [16, 8], strides = [1, 1]} : vector<16x96xf32> to vector<16x8xf32>
    %84 = arith.truncf %83 : vector<16x8xf32> to vector<16x8xbf16>
    %85 = vector.shape_cast %84 : vector<16x8xbf16> to vector<2x8x8xbf16>
    "tpu.trace_start"() <{level = 10 : i32, message = "bqd,bkd->bqk"}> : () -> ()
    %cst_28 = arith.constant dense<0.000000e+00> : vector<2x8x8xf32>
    %86 = tpu.matmul %79, %82, %cst_28 {dimension_numbers = #tpu.dot_dimension_numbers<[2], [2], [1], [1], [0, 0, 0, 1, 1, 1], [0], [0]>} : vector<2x8x8xbf16>, vector<2x8x8xbf16>, vector<2x8x8xf32> -> vector<2x8x8xf32>
    "tpu.trace_stop"() : () -> ()
    %cst_29 = arith.constant dense<0xFF800000> : vector<2x8xf32>
    %87 = vector.multi_reduction <maximumf>, %86, %cst_29 [2] : vector<2x8x8xf32> to vector<2x8xf32>
    %88 = vector.shape_cast %87 : vector<2x8xf32> to vector<2x8x1xf32>
    %89 = vector.broadcast %88 : vector<2x8x1xf32> to vector<2x8x8xf32>
    %90 = arith.subf %86, %89 : vector<2x8x8xf32>
    %91 = math.exp %90 : vector<2x8x8xf32>
    %cst_30 = arith.constant dense<0.000000e+00> : vector<2x8xf32>
    %92 = vector.multi_reduction <add>, %91, %cst_30 [2] : vector<2x8x8xf32> to vector<2x8xf32>
    %93 = vector.shape_cast %92 : vector<2x8xf32> to vector<2x8x1xf32>
    %94 = tpu.reciprocal %93 {approx = true} : vector<2x8x1xf32> -> vector<2x8x1xf32>
    %95 = vector.broadcast %94 : vector<2x8x1xf32> to vector<2x8x8xf32>
    %96 = arith.mulf %91, %95 : vector<2x8x8xf32>
    %97 = arith.truncf %96 : vector<2x8x8xf32> to vector<2x8x8xbf16>
    "tpu.trace_start"() <{level = 10 : i32, message = "bqk,bkd->bqd"}> : () -> ()
    %cst_31 = arith.constant dense<0.000000e+00> : vector<2x8x8xf32>
    %98 = tpu.matmul %97, %85, %cst_31 {dimension_numbers = #tpu.dot_dimension_numbers<[2], [1], [1], [2], [0, 0, 0, 1, 1, 2], [0], [0]>} : vector<2x8x8xbf16>, vector<2x8x8xbf16>, vector<2x8x8xf32> -> vector<2x8x8xf32>
    "tpu.trace_stop"() : () -> ()
    %99 = vector.shape_cast %98 : vector<2x8x8xf32> to vector<16x8xf32>
    %100 = vector.extract_strided_slice %23 {offsets = [16, 0], sizes = [8, 32], strides = [1, 1]} : vector<32x32xbf16> to vector<8x32xbf16>
    %101 = arith.truncf %99 : vector<16x8xf32> to vector<16x8xbf16>
    %cst_32 = arith.constant dense<0.000000e+00> : vector<16x32xf32>
    %102 = tpu.matmul %101, %100, %cst_32 {dimension_numbers = #tpu.dot_dimension_numbers<[1], [0], [0], [1], [0, 0, 1, 1], [], []>} : vector<16x8xbf16>, vector<8x32xbf16>, vector<16x32xf32> -> vector<16x32xf32>
    %103 = arith.addf %76, %102 : vector<16x32xf32>
    %104 = vector.extract_strided_slice %21 {offsets = [0, 24], sizes = [16, 8], strides = [1, 1]} : vector<16x96xf32> to vector<16x8xf32>
    %105 = arith.truncf %104 : vector<16x8xf32> to vector<16x8xbf16>
    %106 = vector.shape_cast %105 : vector<16x8xbf16> to vector<2x8x8xbf16>
    %107 = vector.extract_strided_slice %21 {offsets = [0, 56], sizes = [16, 8], strides = [1, 1]} : vector<16x96xf32> to vector<16x8xf32>
    %108 = arith.truncf %107 : vector<16x8xf32> to vector<16x8xbf16>
    %109 = vector.shape_cast %108 : vector<16x8xbf16> to vector<2x8x8xbf16>
    %110 = vector.extract_strided_slice %21 {offsets = [0, 88], sizes = [16, 8], strides = [1, 1]} : vector<16x96xf32> to vector<16x8xf32>
    %111 = arith.truncf %110 : vector<16x8xf32> to vector<16x8xbf16>
    %112 = vector.shape_cast %111 : vector<16x8xbf16> to vector<2x8x8xbf16>
    "tpu.trace_start"() <{level = 10 : i32, message = "bqd,bkd->bqk"}> : () -> ()
    %cst_33 = arith.constant dense<0.000000e+00> : vector<2x8x8xf32>
    %113 = tpu.matmul %106, %109, %cst_33 {dimension_numbers = #tpu.dot_dimension_numbers<[2], [2], [1], [1], [0, 0, 0, 1, 1, 1], [0], [0]>} : vector<2x8x8xbf16>, vector<2x8x8xbf16>, vector<2x8x8xf32> -> vector<2x8x8xf32>
    "tpu.trace_stop"() : () -> ()
    %cst_34 = arith.constant dense<0xFF800000> : vector<2x8xf32>
    %114 = vector.multi_reduction <maximumf>, %113, %cst_34 [2] : vector<2x8x8xf32> to vector<2x8xf32>
    %115 = vector.shape_cast %114 : vector<2x8xf32> to vector<2x8x1xf32>
    %116 = vector.broadcast %115 : vector<2x8x1xf32> to vector<2x8x8xf32>
    %117 = arith.subf %113, %116 : vector<2x8x8xf32>
    %118 = math.exp %117 : vector<2x8x8xf32>
    %cst_35 = arith.constant dense<0.000000e+00> : vector<2x8xf32>
    %119 = vector.multi_reduction <add>, %118, %cst_35 [2] : vector<2x8x8xf32> to vector<2x8xf32>
    %120 = vector.shape_cast %119 : vector<2x8xf32> to vector<2x8x1xf32>
    %121 = tpu.reciprocal %120 {approx = true} : vector<2x8x1xf32> -> vector<2x8x1xf32>
    %122 = vector.broadcast %121 : vector<2x8x1xf32> to vector<2x8x8xf32>
    %123 = arith.mulf %118, %122 : vector<2x8x8xf32>
    %124 = arith.truncf %123 : vector<2x8x8xf32> to vector<2x8x8xbf16>
    "tpu.trace_start"() <{level = 10 : i32, message = "bqk,bkd->bqd"}> : () -> ()
    %cst_36 = arith.constant dense<0.000000e+00> : vector<2x8x8xf32>
    %125 = tpu.matmul %124, %112, %cst_36 {dimension_numbers = #tpu.dot_dimension_numbers<[2], [1], [1], [2], [0, 0, 0, 1, 1, 2], [0], [0]>} : vector<2x8x8xbf16>, vector<2x8x8xbf16>, vector<2x8x8xf32> -> vector<2x8x8xf32>
    "tpu.trace_stop"() : () -> ()
    %126 = vector.shape_cast %125 : vector<2x8x8xf32> to vector<16x8xf32>
    %127 = vector.extract_strided_slice %23 {offsets = [24, 0], sizes = [8, 32], strides = [1, 1]} : vector<32x32xbf16> to vector<8x32xbf16>
    %128 = arith.truncf %126 : vector<16x8xf32> to vector<16x8xbf16>
    %cst_37 = arith.constant dense<0.000000e+00> : vector<16x32xf32>
    %129 = tpu.matmul %128, %127, %cst_37 {dimension_numbers = #tpu.dot_dimension_numbers<[1], [0], [0], [1], [0, 0, 1, 1], [], []>} : vector<16x8xbf16>, vector<8x32xbf16>, vector<16x32xf32> -> vector<16x32xf32>
    %130 = arith.addf %103, %129 : vector<16x32xf32>
    %c0_38 = arith.constant 0 : index
    %c0_39 = arith.constant 0 : index
    %c0_40 = arith.constant 0 : index
    %131 = vector.load %arg8[%c0_38, %c0_39, %c0_40] : memref<2x1x32xf32, #tpu.memory_space<vmem>>, vector<1x1x32xf32>
    %132 = vector.shape_cast %131 : vector<1x1x32xf32> to vector<1x32xf32>
    %133 = vector.broadcast %132 : vector<1x32xf32> to vector<16x32xf32>
    %134 = arith.addf %130, %133 : vector<16x32xf32>
    %135 = arith.addf %13, %134 : vector<16x32xf32>
    %c0_41 = arith.constant 0 : index
    %c0_42 = arith.constant 0 : index
    %c0_43 = arith.constant 0 : index
    %136 = vector.load %arg9[%c0_41, %c0_42, %c0_43] : memref<2x1x32xf32, #tpu.memory_space<vmem>>, vector<1x1x32xf32>
    %137 = vector.shape_cast %136 : vector<1x1x32xf32> to vector<1x32xf32>
    %c0_44 = arith.constant 0 : index
    %c0_45 = arith.constant 0 : index
    %c0_46 = arith.constant 0 : index
    %138 = vector.load %arg10[%c0_44, %c0_45, %c0_46] : memref<2x1x32xf32, #tpu.memory_space<vmem>>, vector<1x1x32xf32>
    %139 = vector.shape_cast %138 : vector<1x1x32xf32> to vector<1x32xf32>
    %cst_47 = arith.constant dense<0.000000e+00> : vector<16xf32>
    %140 = vector.multi_reduction <add>, %135, %cst_47 [1] : vector<16x32xf32> to vector<16xf32>
    %141 = vector.shape_cast %140 : vector<16xf32> to vector<16x1xf32>
    %cst_48 = arith.constant 3.200000e+01 : f32
    %142 = vector.broadcast %cst_48 : f32 to vector<16x1xf32>
    %143 = arith.divf %141, %142 : vector<16x1xf32>
    %144 = vector.broadcast %143 : vector<16x1xf32> to vector<16x32xf32>
    %145 = arith.subf %135, %144 : vector<16x32xf32>
    %146 = arith.mulf %145, %145 : vector<16x32xf32>
    %cst_49 = arith.constant dense<0.000000e+00> : vector<16xf32>
    %147 = vector.multi_reduction <add>, %146, %cst_49 [1] : vector<16x32xf32> to vector<16xf32>
    %148 = vector.shape_cast %147 : vector<16xf32> to vector<16x1xf32>
    %cst_50 = arith.constant 3.200000e+01 : f32
    %149 = vector.broadcast %cst_50 : f32 to vector<16x1xf32>
    %150 = arith.divf %148, %149 : vector<16x1xf32>
    %151 = vector.broadcast %143 : vector<16x1xf32> to vector<16x32xf32>
    %152 = arith.subf %135, %151 : vector<16x32xf32>
    %cst_51 = arith.constant 9.99999974E-6 : f32
    %153 = vector.broadcast %cst_51 : f32 to vector<16x1xf32>
    %154 = arith.addf %150, %153 : vector<16x1xf32>
    %155 = math.rsqrt %154 : vector<16x1xf32>
    %156 = vector.broadcast %155 : vector<16x1xf32> to vector<16x32xf32>
    %157 = arith.mulf %152, %156 : vector<16x32xf32>
    %158 = vector.broadcast %137 : vector<1x32xf32> to vector<16x32xf32>
    %159 = arith.mulf %157, %158 : vector<16x32xf32>
    %160 = vector.broadcast %139 : vector<1x32xf32> to vector<16x32xf32>
    %161 = arith.addf %159, %160 : vector<16x32xf32>
    %c0_52 = arith.constant 0 : index
    %c0_53 = arith.constant 0 : index
    %c0_54 = arith.constant 0 : index
    %162 = vector.load %arg13[%c0_52, %c0_53, %c0_54] : memref<2x32x64xbf16, #tpu.memory_space<vmem>>, vector<1x32x64xbf16>
    %163 = vector.shape_cast %162 : vector<1x32x64xbf16> to vector<32x64xbf16>
    %164 = arith.truncf %161 : vector<16x32xf32> to vector<16x32xbf16>
    %cst_55 = arith.constant dense<0.000000e+00> : vector<16x64xf32>
    %165 = tpu.matmul %164, %163, %cst_55 {dimension_numbers = #tpu.dot_dimension_numbers<[1], [0], [0], [1], [0, 0, 1, 1], [], []>} : vector<16x32xbf16>, vector<32x64xbf16>, vector<16x64xf32> -> vector<16x64xf32>
    %c0_56 = arith.constant 0 : index
    %c0_57 = arith.constant 0 : index
    %c0_58 = arith.constant 0 : index
    %166 = vector.load %arg14[%c0_56, %c0_57, %c0_58] : memref<2x1x64xf32, #tpu.memory_space<vmem>>, vector<1x1x64xf32>
    %167 = vector.shape_cast %166 : vector<1x1x64xf32> to vector<1x64xf32>
    %168 = vector.broadcast %167 : vector<1x64xf32> to vector<16x64xf32>
    %169 = arith.addf %165, %168 : vector<16x64xf32>
    %cst_59 = arith.constant 0.000000e+00 : f32
    %170 = vector.broadcast %cst_59 : f32 to vector<16x64xf32>
    %171 = arith.maximumf %169, %170 : vector<16x64xf32>
    %c0_60 = arith.constant 0 : index
    %c0_61 = arith.constant 0 : index
    %c0_62 = arith.constant 0 : index
    %172 = vector.load %arg15[%c0_60, %c0_61, %c0_62] : memref<2x64x32xbf16, #tpu.memory_space<vmem>>, vector<1x64x32xbf16>
    %173 = vector.shape_cast %172 : vector<1x64x32xbf16> to vector<64x32xbf16>
    %174 = arith.truncf %171 : vector<16x64xf32> to vector<16x64xbf16>
    %cst_63 = arith.constant dense<0.000000e+00> : vector<16x32xf32>
    %175 = tpu.matmul %174, %173, %cst_63 {dimension_numbers = #tpu.dot_dimension_numbers<[1], [0], [0], [1], [0, 0, 1, 1], [], []>} : vector<16x64xbf16>, vector<64x32xbf16>, vector<16x32xf32> -> vector<16x32xf32>
    %c0_64 = arith.constant 0 : index
    %c0_65 = arith.constant 0 : index
    %c0_66 = arith.constant 0 : index
    %176 = vector.load %arg16[%c0_64, %c0_65, %c0_66] : memref<2x1x32xf32, #tpu.memory_space<vmem>>, vector<1x1x32xf32>
    %177 = vector.shape_cast %176 : vector<1x1x32xf32> to vector<1x32xf32>
    %178 = vector.broadcast %177 : vector<1x32xf32> to vector<16x32xf32>
    %179 = arith.addf %175, %178 : vector<16x32xf32>
    %180 = arith.addf %161, %179 : vector<16x32xf32>
    %c0_67 = arith.constant 0 : index
    %c0_68 = arith.constant 0 : index
    %c0_69 = arith.constant 0 : index
    %181 = vector.load %arg11[%c0_67, %c0_68, %c0_69] : memref<2x1x32xf32, #tpu.memory_space<vmem>>, vector<1x1x32xf32>
    %182 = vector.shape_cast %181 : vector<1x1x32xf32> to vector<1x32xf32>
    %c0_70 = arith.constant 0 : index
    %c0_71 = arith.constant 0 : index
    %c0_72 = arith.constant 0 : index
    %183 = vector.load %arg12[%c0_70, %c0_71, %c0_72] : memref<2x1x32xf32, #tpu.memory_space<vmem>>, vector<1x1x32xf32>
    %184 = vector.shape_cast %183 : vector<1x1x32xf32> to vector<1x32xf32>
    %cst_73 = arith.constant dense<0.000000e+00> : vector<16xf32>
    %185 = vector.multi_reduction <add>, %180, %cst_73 [1] : vector<16x32xf32> to vector<16xf32>
    %186 = vector.shape_cast %185 : vector<16xf32> to vector<16x1xf32>
    %cst_74 = arith.constant 3.200000e+01 : f32
    %187 = vector.broadcast %cst_74 : f32 to vector<16x1xf32>
    %188 = arith.divf %186, %187 : vector<16x1xf32>
    %189 = vector.broadcast %188 : vector<16x1xf32> to vector<16x32xf32>
    %190 = arith.subf %180, %189 : vector<16x32xf32>
    %191 = arith.mulf %190, %190 : vector<16x32xf32>
    %cst_75 = arith.constant dense<0.000000e+00> : vector<16xf32>
    %192 = vector.multi_reduction <add>, %191, %cst_75 [1] : vector<16x32xf32> to vector<16xf32>
    %193 = vector.shape_cast %192 : vector<16xf32> to vector<16x1xf32>
    %cst_76 = arith.constant 3.200000e+01 : f32
    %194 = vector.broadcast %cst_76 : f32 to vector<16x1xf32>
    %195 = arith.divf %193, %194 : vector<16x1xf32>
    %196 = vector.broadcast %188 : vector<16x1xf32> to vector<16x32xf32>
    %197 = arith.subf %180, %196 : vector<16x32xf32>
    %cst_77 = arith.constant 9.99999974E-6 : f32
    %198 = vector.broadcast %cst_77 : f32 to vector<16x1xf32>
    %199 = arith.addf %195, %198 : vector<16x1xf32>
    %200 = math.rsqrt %199 : vector<16x1xf32>
    %201 = vector.broadcast %200 : vector<16x1xf32> to vector<16x32xf32>
    %202 = arith.mulf %197, %201 : vector<16x32xf32>
    %203 = vector.broadcast %182 : vector<1x32xf32> to vector<16x32xf32>
    %204 = arith.mulf %202, %203 : vector<16x32xf32>
    %205 = vector.broadcast %184 : vector<1x32xf32> to vector<16x32xf32>
    %206 = arith.addf %204, %205 : vector<16x32xf32>
    %c1 = arith.constant 1 : index
    %c0_78 = arith.constant 0 : index
    %c0_79 = arith.constant 0 : index
    %207 = vector.load %arg5[%c1, %c0_78, %c0_79] : memref<2x32x96xbf16, #tpu.memory_space<vmem>>, vector<1x32x96xbf16>
    %208 = vector.shape_cast %207 : vector<1x32x96xbf16> to vector<32x96xbf16>
    %209 = arith.truncf %206 : vector<16x32xf32> to vector<16x32xbf16>
    %cst_80 = arith.constant dense<0.000000e+00> : vector<16x96xf32>
    %210 = tpu.matmul %209, %208, %cst_80 {dimension_numbers = #tpu.dot_dimension_numbers<[1], [0], [0], [1], [0, 0, 1, 1], [], []>} : vector<16x32xbf16>, vector<32x96xbf16>, vector<16x96xf32> -> vector<16x96xf32>
    %c1_81 = arith.constant 1 : index
    %c0_82 = arith.constant 0 : index
    %c0_83 = arith.constant 0 : index
    %211 = vector.load %arg6[%c1_81, %c0_82, %c0_83] : memref<2x1x96xf32, #tpu.memory_space<vmem>>, vector<1x1x96xf32>
    %212 = vector.shape_cast %211 : vector<1x1x96xf32> to vector<1x96xf32>
    %213 = vector.broadcast %212 : vector<1x96xf32> to vector<16x96xf32>
    %214 = arith.addf %210, %213 : vector<16x96xf32>
    %c1_84 = arith.constant 1 : index
    %c0_85 = arith.constant 0 : index
    %c0_86 = arith.constant 0 : index
    %215 = vector.load %arg7[%c1_84, %c0_85, %c0_86] : memref<2x32x32xbf16, #tpu.memory_space<vmem>>, vector<1x32x32xbf16>
    %216 = vector.shape_cast %215 : vector<1x32x32xbf16> to vector<32x32xbf16>
    %217 = vector.extract_strided_slice %214 {offsets = [0, 0], sizes = [16, 8], strides = [1, 1]} : vector<16x96xf32> to vector<16x8xf32>
    %218 = arith.truncf %217 : vector<16x8xf32> to vector<16x8xbf16>
    %219 = vector.shape_cast %218 : vector<16x8xbf16> to vector<2x8x8xbf16>
    %220 = vector.extract_strided_slice %214 {offsets = [0, 32], sizes = [16, 8], strides = [1, 1]} : vector<16x96xf32> to vector<16x8xf32>
    %221 = arith.truncf %220 : vector<16x8xf32> to vector<16x8xbf16>
    %222 = vector.shape_cast %221 : vector<16x8xbf16> to vector<2x8x8xbf16>
    %223 = vector.extract_strided_slice %214 {offsets = [0, 64], sizes = [16, 8], strides = [1, 1]} : vector<16x96xf32> to vector<16x8xf32>
    %224 = arith.truncf %223 : vector<16x8xf32> to vector<16x8xbf16>
    %225 = vector.shape_cast %224 : vector<16x8xbf16> to vector<2x8x8xbf16>
    "tpu.trace_start"() <{level = 10 : i32, message = "bqd,bkd->bqk"}> : () -> ()
    %cst_87 = arith.constant dense<0.000000e+00> : vector<2x8x8xf32>
    %226 = tpu.matmul %219, %222, %cst_87 {dimension_numbers = #tpu.dot_dimension_numbers<[2], [2], [1], [1], [0, 0, 0, 1, 1, 1], [0], [0]>} : vector<2x8x8xbf16>, vector<2x8x8xbf16>, vector<2x8x8xf32> -> vector<2x8x8xf32>
    "tpu.trace_stop"() : () -> ()
    %cst_88 = arith.constant dense<0xFF800000> : vector<2x8xf32>
    %227 = vector.multi_reduction <maximumf>, %226, %cst_88 [2] : vector<2x8x8xf32> to vector<2x8xf32>
    %228 = vector.shape_cast %227 : vector<2x8xf32> to vector<2x8x1xf32>
    %229 = vector.broadcast %228 : vector<2x8x1xf32> to vector<2x8x8xf32>
    %230 = arith.subf %226, %229 : vector<2x8x8xf32>
    %231 = math.exp %230 : vector<2x8x8xf32>
    %cst_89 = arith.constant dense<0.000000e+00> : vector<2x8xf32>
    %232 = vector.multi_reduction <add>, %231, %cst_89 [2] : vector<2x8x8xf32> to vector<2x8xf32>
    %233 = vector.shape_cast %232 : vector<2x8xf32> to vector<2x8x1xf32>
    %234 = tpu.reciprocal %233 {approx = true} : vector<2x8x1xf32> -> vector<2x8x1xf32>
    %235 = vector.broadcast %234 : vector<2x8x1xf32> to vector<2x8x8xf32>
    %236 = arith.mulf %231, %235 : vector<2x8x8xf32>
    %237 = arith.truncf %236 : vector<2x8x8xf32> to vector<2x8x8xbf16>
    "tpu.trace_start"() <{level = 10 : i32, message = "bqk,bkd->bqd"}> : () -> ()
    %cst_90 = arith.constant dense<0.000000e+00> : vector<2x8x8xf32>
    %238 = tpu.matmul %237, %225, %cst_90 {dimension_numbers = #tpu.dot_dimension_numbers<[2], [1], [1], [2], [0, 0, 0, 1, 1, 2], [0], [0]>} : vector<2x8x8xbf16>, vector<2x8x8xbf16>, vector<2x8x8xf32> -> vector<2x8x8xf32>
    "tpu.trace_stop"() : () -> ()
    %239 = vector.shape_cast %238 : vector<2x8x8xf32> to vector<16x8xf32>
    %240 = vector.extract_strided_slice %216 {offsets = [0, 0], sizes = [8, 32], strides = [1, 1]} : vector<32x32xbf16> to vector<8x32xbf16>
    %241 = arith.truncf %239 : vector<16x8xf32> to vector<16x8xbf16>
    %cst_91 = arith.constant dense<0.000000e+00> : vector<16x32xf32>
    %242 = tpu.matmul %241, %240, %cst_91 {dimension_numbers = #tpu.dot_dimension_numbers<[1], [0], [0], [1], [0, 0, 1, 1], [], []>} : vector<16x8xbf16>, vector<8x32xbf16>, vector<16x32xf32> -> vector<16x32xf32>
    %243 = vector.extract_strided_slice %214 {offsets = [0, 8], sizes = [16, 8], strides = [1, 1]} : vector<16x96xf32> to vector<16x8xf32>
    %244 = arith.truncf %243 : vector<16x8xf32> to vector<16x8xbf16>
    %245 = vector.shape_cast %244 : vector<16x8xbf16> to vector<2x8x8xbf16>
    %246 = vector.extract_strided_slice %214 {offsets = [0, 40], sizes = [16, 8], strides = [1, 1]} : vector<16x96xf32> to vector<16x8xf32>
    %247 = arith.truncf %246 : vector<16x8xf32> to vector<16x8xbf16>
    %248 = vector.shape_cast %247 : vector<16x8xbf16> to vector<2x8x8xbf16>
    %249 = vector.extract_strided_slice %214 {offsets = [0, 72], sizes = [16, 8], strides = [1, 1]} : vector<16x96xf32> to vector<16x8xf32>
    %250 = arith.truncf %249 : vector<16x8xf32> to vector<16x8xbf16>
    %251 = vector.shape_cast %250 : vector<16x8xbf16> to vector<2x8x8xbf16>
    "tpu.trace_start"() <{level = 10 : i32, message = "bqd,bkd->bqk"}> : () -> ()
    %cst_92 = arith.constant dense<0.000000e+00> : vector<2x8x8xf32>
    %252 = tpu.matmul %245, %248, %cst_92 {dimension_numbers = #tpu.dot_dimension_numbers<[2], [2], [1], [1], [0, 0, 0, 1, 1, 1], [0], [0]>} : vector<2x8x8xbf16>, vector<2x8x8xbf16>, vector<2x8x8xf32> -> vector<2x8x8xf32>
    "tpu.trace_stop"() : () -> ()
    %cst_93 = arith.constant dense<0xFF800000> : vector<2x8xf32>
    %253 = vector.multi_reduction <maximumf>, %252, %cst_93 [2] : vector<2x8x8xf32> to vector<2x8xf32>
    %254 = vector.shape_cast %253 : vector<2x8xf32> to vector<2x8x1xf32>
    %255 = vector.broadcast %254 : vector<2x8x1xf32> to vector<2x8x8xf32>
    %256 = arith.subf %252, %255 : vector<2x8x8xf32>
    %257 = math.exp %256 : vector<2x8x8xf32>
    %cst_94 = arith.constant dense<0.000000e+00> : vector<2x8xf32>
    %258 = vector.multi_reduction <add>, %257, %cst_94 [2] : vector<2x8x8xf32> to vector<2x8xf32>
    %259 = vector.shape_cast %258 : vector<2x8xf32> to vector<2x8x1xf32>
    %260 = tpu.reciprocal %259 {approx = true} : vector<2x8x1xf32> -> vector<2x8x1xf32>
    %261 = vector.broadcast %260 : vector<2x8x1xf32> to vector<2x8x8xf32>
    %262 = arith.mulf %257, %261 : vector<2x8x8xf32>
    %263 = arith.truncf %262 : vector<2x8x8xf32> to vector<2x8x8xbf16>
    "tpu.trace_start"() <{level = 10 : i32, message = "bqk,bkd->bqd"}> : () -> ()
    %cst_95 = arith.constant dense<0.000000e+00> : vector<2x8x8xf32>
    %264 = tpu.matmul %263, %251, %cst_95 {dimension_numbers = #tpu.dot_dimension_numbers<[2], [1], [1], [2], [0, 0, 0, 1, 1, 2], [0], [0]>} : vector<2x8x8xbf16>, vector<2x8x8xbf16>, vector<2x8x8xf32> -> vector<2x8x8xf32>
    "tpu.trace_stop"() : () -> ()
    %265 = vector.shape_cast %264 : vector<2x8x8xf32> to vector<16x8xf32>
    %266 = vector.extract_strided_slice %216 {offsets = [8, 0], sizes = [8, 32], strides = [1, 1]} : vector<32x32xbf16> to vector<8x32xbf16>
    %267 = arith.truncf %265 : vector<16x8xf32> to vector<16x8xbf16>
    %cst_96 = arith.constant dense<0.000000e+00> : vector<16x32xf32>
    %268 = tpu.matmul %267, %266, %cst_96 {dimension_numbers = #tpu.dot_dimension_numbers<[1], [0], [0], [1], [0, 0, 1, 1], [], []>} : vector<16x8xbf16>, vector<8x32xbf16>, vector<16x32xf32> -> vector<16x32xf32>
    %269 = arith.addf %242, %268 : vector<16x32xf32>
    %270 = vector.extract_strided_slice %214 {offsets = [0, 16], sizes = [16, 8], strides = [1, 1]} : vector<16x96xf32> to vector<16x8xf32>
    %271 = arith.truncf %270 : vector<16x8xf32> to vector<16x8xbf16>
    %272 = vector.shape_cast %271 : vector<16x8xbf16> to vector<2x8x8xbf16>
    %273 = vector.extract_strided_slice %214 {offsets = [0, 48], sizes = [16, 8], strides = [1, 1]} : vector<16x96xf32> to vector<16x8xf32>
    %274 = arith.truncf %273 : vector<16x8xf32> to vector<16x8xbf16>
    %275 = vector.shape_cast %274 : vector<16x8xbf16> to vector<2x8x8xbf16>
    %276 = vector.extract_strided_slice %214 {offsets = [0, 80], sizes = [16, 8], strides = [1, 1]} : vector<16x96xf32> to vector<16x8xf32>
    %277 = arith.truncf %276 : vector<16x8xf32> to vector<16x8xbf16>
    %278 = vector.shape_cast %277 : vector<16x8xbf16> to vector<2x8x8xbf16>
    "tpu.trace_start"() <{level = 10 : i32, message = "bqd,bkd->bqk"}> : () -> ()
    %cst_97 = arith.constant dense<0.000000e+00> : vector<2x8x8xf32>
    %279 = tpu.matmul %272, %275, %cst_97 {dimension_numbers = #tpu.dot_dimension_numbers<[2], [2], [1], [1], [0, 0, 0, 1, 1, 1], [0], [0]>} : vector<2x8x8xbf16>, vector<2x8x8xbf16>, vector<2x8x8xf32> -> vector<2x8x8xf32>
    "tpu.trace_stop"() : () -> ()
    %cst_98 = arith.constant dense<0xFF800000> : vector<2x8xf32>
    %280 = vector.multi_reduction <maximumf>, %279, %cst_98 [2] : vector<2x8x8xf32> to vector<2x8xf32>
    %281 = vector.shape_cast %280 : vector<2x8xf32> to vector<2x8x1xf32>
    %282 = vector.broadcast %281 : vector<2x8x1xf32> to vector<2x8x8xf32>
    %283 = arith.subf %279, %282 : vector<2x8x8xf32>
    %284 = math.exp %283 : vector<2x8x8xf32>
    %cst_99 = arith.constant dense<0.000000e+00> : vector<2x8xf32>
    %285 = vector.multi_reduction <add>, %284, %cst_99 [2] : vector<2x8x8xf32> to vector<2x8xf32>
    %286 = vector.shape_cast %285 : vector<2x8xf32> to vector<2x8x1xf32>
    %287 = tpu.reciprocal %286 {approx = true} : vector<2x8x1xf32> -> vector<2x8x1xf32>
    %288 = vector.broadcast %287 : vector<2x8x1xf32> to vector<2x8x8xf32>
    %289 = arith.mulf %284, %288 : vector<2x8x8xf32>
    %290 = arith.truncf %289 : vector<2x8x8xf32> to vector<2x8x8xbf16>
    "tpu.trace_start"() <{level = 10 : i32, message = "bqk,bkd->bqd"}> : () -> ()
    %cst_100 = arith.constant dense<0.000000e+00> : vector<2x8x8xf32>
    %291 = tpu.matmul %290, %278, %cst_100 {dimension_numbers = #tpu.dot_dimension_numbers<[2], [1], [1], [2], [0, 0, 0, 1, 1, 2], [0], [0]>} : vector<2x8x8xbf16>, vector<2x8x8xbf16>, vector<2x8x8xf32> -> vector<2x8x8xf32>
    "tpu.trace_stop"() : () -> ()
    %292 = vector.shape_cast %291 : vector<2x8x8xf32> to vector<16x8xf32>
    %293 = vector.extract_strided_slice %216 {offsets = [16, 0], sizes = [8, 32], strides = [1, 1]} : vector<32x32xbf16> to vector<8x32xbf16>
    %294 = arith.truncf %292 : vector<16x8xf32> to vector<16x8xbf16>
    %cst_101 = arith.constant dense<0.000000e+00> : vector<16x32xf32>
    %295 = tpu.matmul %294, %293, %cst_101 {dimension_numbers = #tpu.dot_dimension_numbers<[1], [0], [0], [1], [0, 0, 1, 1], [], []>} : vector<16x8xbf16>, vector<8x32xbf16>, vector<16x32xf32> -> vector<16x32xf32>
    %296 = arith.addf %269, %295 : vector<16x32xf32>
    %297 = vector.extract_strided_slice %214 {offsets = [0, 24], sizes = [16, 8], strides = [1, 1]} : vector<16x96xf32> to vector<16x8xf32>
    %298 = arith.truncf %297 : vector<16x8xf32> to vector<16x8xbf16>
    %299 = vector.shape_cast %298 : vector<16x8xbf16> to vector<2x8x8xbf16>
    %300 = vector.extract_strided_slice %214 {offsets = [0, 56], sizes = [16, 8], strides = [1, 1]} : vector<16x96xf32> to vector<16x8xf32>
    %301 = arith.truncf %300 : vector<16x8xf32> to vector<16x8xbf16>
    %302 = vector.shape_cast %301 : vector<16x8xbf16> to vector<2x8x8xbf16>
    %303 = vector.extract_strided_slice %214 {offsets = [0, 88], sizes = [16, 8], strides = [1, 1]} : vector<16x96xf32> to vector<16x8xf32>
    %304 = arith.truncf %303 : vector<16x8xf32> to vector<16x8xbf16>
    %305 = vector.shape_cast %304 : vector<16x8xbf16> to vector<2x8x8xbf16>
    "tpu.trace_start"() <{level = 10 : i32, message = "bqd,bkd->bqk"}> : () -> ()
    %cst_102 = arith.constant dense<0.000000e+00> : vector<2x8x8xf32>
    %306 = tpu.matmul %299, %302, %cst_102 {dimension_numbers = #tpu.dot_dimension_numbers<[2], [2], [1], [1], [0, 0, 0, 1, 1, 1], [0], [0]>} : vector<2x8x8xbf16>, vector<2x8x8xbf16>, vector<2x8x8xf32> -> vector<2x8x8xf32>
    "tpu.trace_stop"() : () -> ()
    %cst_103 = arith.constant dense<0xFF800000> : vector<2x8xf32>
    %307 = vector.multi_reduction <maximumf>, %306, %cst_103 [2] : vector<2x8x8xf32> to vector<2x8xf32>
    %308 = vector.shape_cast %307 : vector<2x8xf32> to vector<2x8x1xf32>
    %309 = vector.broadcast %308 : vector<2x8x1xf32> to vector<2x8x8xf32>
    %310 = arith.subf %306, %309 : vector<2x8x8xf32>
    %311 = math.exp %310 : vector<2x8x8xf32>
    %cst_104 = arith.constant dense<0.000000e+00> : vector<2x8xf32>
    %312 = vector.multi_reduction <add>, %311, %cst_104 [2] : vector<2x8x8xf32> to vector<2x8xf32>
    %313 = vector.shape_cast %312 : vector<2x8xf32> to vector<2x8x1xf32>
    %314 = tpu.reciprocal %313 {approx = true} : vector<2x8x1xf32> -> vector<2x8x1xf32>
    %315 = vector.broadcast %314 : vector<2x8x1xf32> to vector<2x8x8xf32>
    %316 = arith.mulf %311, %315 : vector<2x8x8xf32>
    %317 = arith.truncf %316 : vector<2x8x8xf32> to vector<2x8x8xbf16>
    "tpu.trace_start"() <{level = 10 : i32, message = "bqk,bkd->bqd"}> : () -> ()
    %cst_105 = arith.constant dense<0.000000e+00> : vector<2x8x8xf32>
    %318 = tpu.matmul %317, %305, %cst_105 {dimension_numbers = #tpu.dot_dimension_numbers<[2], [1], [1], [2], [0, 0, 0, 1, 1, 2], [0], [0]>} : vector<2x8x8xbf16>, vector<2x8x8xbf16>, vector<2x8x8xf32> -> vector<2x8x8xf32>
    "tpu.trace_stop"() : () -> ()
    %319 = vector.shape_cast %318 : vector<2x8x8xf32> to vector<16x8xf32>
    %320 = vector.extract_strided_slice %216 {offsets = [24, 0], sizes = [8, 32], strides = [1, 1]} : vector<32x32xbf16> to vector<8x32xbf16>
    %321 = arith.truncf %319 : vector<16x8xf32> to vector<16x8xbf16>
    %cst_106 = arith.constant dense<0.000000e+00> : vector<16x32xf32>
    %322 = tpu.matmul %321, %320, %cst_106 {dimension_numbers = #tpu.dot_dimension_numbers<[1], [0], [0], [1], [0, 0, 1, 1], [], []>} : vector<16x8xbf16>, vector<8x32xbf16>, vector<16x32xf32> -> vector<16x32xf32>
    %323 = arith.addf %296, %322 : vector<16x32xf32>
    %c1_107 = arith.constant 1 : index
    %c0_108 = arith.constant 0 : index
    %c0_109 = arith.constant 0 : index
    %324 = vector.load %arg8[%c1_107, %c0_108, %c0_109] : memref<2x1x32xf32, #tpu.memory_space<vmem>>, vector<1x1x32xf32>
    %325 = vector.shape_cast %324 : vector<1x1x32xf32> to vector<1x32xf32>
    %326 = vector.broadcast %325 : vector<1x32xf32> to vector<16x32xf32>
    %327 = arith.addf %323, %326 : vector<16x32xf32>
    %328 = arith.addf %206, %327 : vector<16x32xf32>
    %c1_110 = arith.constant 1 : index
    %c0_111 = arith.constant 0 : index
    %c0_112 = arith.constant 0 : index
    %329 = vector.load %arg9[%c1_110, %c0_111, %c0_112] : memref<2x1x32xf32, #tpu.memory_space<vmem>>, vector<1x1x32xf32>
    %330 = vector.shape_cast %329 : vector<1x1x32xf32> to vector<1x32xf32>
    %c1_113 = arith.constant 1 : index
    %c0_114 = arith.constant 0 : index
    %c0_115 = arith.constant 0 : index
    %331 = vector.load %arg10[%c1_113, %c0_114, %c0_115] : memref<2x1x32xf32, #tpu.memory_space<vmem>>, vector<1x1x32xf32>
    %332 = vector.shape_cast %331 : vector<1x1x32xf32> to vector<1x32xf32>
    %cst_116 = arith.constant dense<0.000000e+00> : vector<16xf32>
    %333 = vector.multi_reduction <add>, %328, %cst_116 [1] : vector<16x32xf32> to vector<16xf32>
    %334 = vector.shape_cast %333 : vector<16xf32> to vector<16x1xf32>
    %cst_117 = arith.constant 3.200000e+01 : f32
    %335 = vector.broadcast %cst_117 : f32 to vector<16x1xf32>
    %336 = arith.divf %334, %335 : vector<16x1xf32>
    %337 = vector.broadcast %336 : vector<16x1xf32> to vector<16x32xf32>
    %338 = arith.subf %328, %337 : vector<16x32xf32>
    %339 = arith.mulf %338, %338 : vector<16x32xf32>
    %cst_118 = arith.constant dense<0.000000e+00> : vector<16xf32>
    %340 = vector.multi_reduction <add>, %339, %cst_118 [1] : vector<16x32xf32> to vector<16xf32>
    %341 = vector.shape_cast %340 : vector<16xf32> to vector<16x1xf32>
    %cst_119 = arith.constant 3.200000e+01 : f32
    %342 = vector.broadcast %cst_119 : f32 to vector<16x1xf32>
    %343 = arith.divf %341, %342 : vector<16x1xf32>
    %344 = vector.broadcast %336 : vector<16x1xf32> to vector<16x32xf32>
    %345 = arith.subf %328, %344 : vector<16x32xf32>
    %cst_120 = arith.constant 9.99999974E-6 : f32
    %346 = vector.broadcast %cst_120 : f32 to vector<16x1xf32>
    %347 = arith.addf %343, %346 : vector<16x1xf32>
    %348 = math.rsqrt %347 : vector<16x1xf32>
    %349 = vector.broadcast %348 : vector<16x1xf32> to vector<16x32xf32>
    %350 = arith.mulf %345, %349 : vector<16x32xf32>
    %351 = vector.broadcast %330 : vector<1x32xf32> to vector<16x32xf32>
    %352 = arith.mulf %350, %351 : vector<16x32xf32>
    %353 = vector.broadcast %332 : vector<1x32xf32> to vector<16x32xf32>
    %354 = arith.addf %352, %353 : vector<16x32xf32>
    %c1_121 = arith.constant 1 : index
    %c0_122 = arith.constant 0 : index
    %c0_123 = arith.constant 0 : index
    %355 = vector.load %arg13[%c1_121, %c0_122, %c0_123] : memref<2x32x64xbf16, #tpu.memory_space<vmem>>, vector<1x32x64xbf16>
    %356 = vector.shape_cast %355 : vector<1x32x64xbf16> to vector<32x64xbf16>
    %357 = arith.truncf %354 : vector<16x32xf32> to vector<16x32xbf16>
    %cst_124 = arith.constant dense<0.000000e+00> : vector<16x64xf32>
    %358 = tpu.matmul %357, %356, %cst_124 {dimension_numbers = #tpu.dot_dimension_numbers<[1], [0], [0], [1], [0, 0, 1, 1], [], []>} : vector<16x32xbf16>, vector<32x64xbf16>, vector<16x64xf32> -> vector<16x64xf32>
    %c1_125 = arith.constant 1 : index
    %c0_126 = arith.constant 0 : index
    %c0_127 = arith.constant 0 : index
    %359 = vector.load %arg14[%c1_125, %c0_126, %c0_127] : memref<2x1x64xf32, #tpu.memory_space<vmem>>, vector<1x1x64xf32>
    %360 = vector.shape_cast %359 : vector<1x1x64xf32> to vector<1x64xf32>
    %361 = vector.broadcast %360 : vector<1x64xf32> to vector<16x64xf32>
    %362 = arith.addf %358, %361 : vector<16x64xf32>
    %cst_128 = arith.constant 0.000000e+00 : f32
    %363 = vector.broadcast %cst_128 : f32 to vector<16x64xf32>
    %364 = arith.maximumf %362, %363 : vector<16x64xf32>
    %c1_129 = arith.constant 1 : index
    %c0_130 = arith.constant 0 : index
    %c0_131 = arith.constant 0 : index
    %365 = vector.load %arg15[%c1_129, %c0_130, %c0_131] : memref<2x64x32xbf16, #tpu.memory_space<vmem>>, vector<1x64x32xbf16>
    %366 = vector.shape_cast %365 : vector<1x64x32xbf16> to vector<64x32xbf16>
    %367 = arith.truncf %364 : vector<16x64xf32> to vector<16x64xbf16>
    %cst_132 = arith.constant dense<0.000000e+00> : vector<16x32xf32>
    %368 = tpu.matmul %367, %366, %cst_132 {dimension_numbers = #tpu.dot_dimension_numbers<[1], [0], [0], [1], [0, 0, 1, 1], [], []>} : vector<16x64xbf16>, vector<64x32xbf16>, vector<16x32xf32> -> vector<16x32xf32>
    %c1_133 = arith.constant 1 : index
    %c0_134 = arith.constant 0 : index
    %c0_135 = arith.constant 0 : index
    %369 = vector.load %arg16[%c1_133, %c0_134, %c0_135] : memref<2x1x32xf32, #tpu.memory_space<vmem>>, vector<1x1x32xf32>
    %370 = vector.shape_cast %369 : vector<1x1x32xf32> to vector<1x32xf32>
    %371 = vector.broadcast %370 : vector<1x32xf32> to vector<16x32xf32>
    %372 = arith.addf %368, %371 : vector<16x32xf32>
    %373 = arith.addf %354, %372 : vector<16x32xf32>
    %c1_136 = arith.constant 1 : index
    %c0_137 = arith.constant 0 : index
    %c0_138 = arith.constant 0 : index
    %374 = vector.load %arg11[%c1_136, %c0_137, %c0_138] : memref<2x1x32xf32, #tpu.memory_space<vmem>>, vector<1x1x32xf32>
    %375 = vector.shape_cast %374 : vector<1x1x32xf32> to vector<1x32xf32>
    %c1_139 = arith.constant 1 : index
    %c0_140 = arith.constant 0 : index
    %c0_141 = arith.constant 0 : index
    %376 = vector.load %arg12[%c1_139, %c0_140, %c0_141] : memref<2x1x32xf32, #tpu.memory_space<vmem>>, vector<1x1x32xf32>
    %377 = vector.shape_cast %376 : vector<1x1x32xf32> to vector<1x32xf32>
    %cst_142 = arith.constant dense<0.000000e+00> : vector<16xf32>
    %378 = vector.multi_reduction <add>, %373, %cst_142 [1] : vector<16x32xf32> to vector<16xf32>
    %379 = vector.shape_cast %378 : vector<16xf32> to vector<16x1xf32>
    %cst_143 = arith.constant 3.200000e+01 : f32
    %380 = vector.broadcast %cst_143 : f32 to vector<16x1xf32>
    %381 = arith.divf %379, %380 : vector<16x1xf32>
    %382 = vector.broadcast %381 : vector<16x1xf32> to vector<16x32xf32>
    %383 = arith.subf %373, %382 : vector<16x32xf32>
    %384 = arith.mulf %383, %383 : vector<16x32xf32>
    %cst_144 = arith.constant dense<0.000000e+00> : vector<16xf32>
    %385 = vector.multi_reduction <add>, %384, %cst_144 [1] : vector<16x32xf32> to vector<16xf32>
    %386 = vector.shape_cast %385 : vector<16xf32> to vector<16x1xf32>
    %cst_145 = arith.constant 3.200000e+01 : f32
    %387 = vector.broadcast %cst_145 : f32 to vector<16x1xf32>
    %388 = arith.divf %386, %387 : vector<16x1xf32>
    %389 = vector.broadcast %381 : vector<16x1xf32> to vector<16x32xf32>
    %390 = arith.subf %373, %389 : vector<16x32xf32>
    %cst_146 = arith.constant 9.99999974E-6 : f32
    %391 = vector.broadcast %cst_146 : f32 to vector<16x1xf32>
    %392 = arith.addf %388, %391 : vector<16x1xf32>
    %393 = math.rsqrt %392 : vector<16x1xf32>
    %394 = vector.broadcast %393 : vector<16x1xf32> to vector<16x32xf32>
    %395 = arith.mulf %390, %394 : vector<16x32xf32>
    %396 = vector.broadcast %375 : vector<1x32xf32> to vector<16x32xf32>
    %397 = arith.mulf %395, %396 : vector<16x32xf32>
    %398 = vector.broadcast %377 : vector<1x32xf32> to vector<16x32xf32>
    %399 = arith.addf %397, %398 : vector<16x32xf32>
    %c0_147 = arith.constant 0 : index
    %c0_148 = arith.constant 0 : index
    %400 = vector.load %arg17[%c0_147, %c0_148] : memref<1x32xf32, #tpu.memory_space<vmem>>, vector<1x32xf32>
    %c0_149 = arith.constant 0 : index
    %c0_150 = arith.constant 0 : index
    %401 = vector.load %arg18[%c0_149, %c0_150] : memref<1x32xf32, #tpu.memory_space<vmem>>, vector<1x32xf32>
    %cst_151 = arith.constant dense<0.000000e+00> : vector<16xf32>
    %402 = vector.multi_reduction <add>, %399, %cst_151 [1] : vector<16x32xf32> to vector<16xf32>
    %403 = vector.shape_cast %402 : vector<16xf32> to vector<16x1xf32>
    %cst_152 = arith.constant 3.200000e+01 : f32
    %404 = vector.broadcast %cst_152 : f32 to vector<16x1xf32>
    %405 = arith.divf %403, %404 : vector<16x1xf32>
    %406 = vector.broadcast %405 : vector<16x1xf32> to vector<16x32xf32>
    %407 = arith.subf %399, %406 : vector<16x32xf32>
    %408 = arith.mulf %407, %407 : vector<16x32xf32>
    %cst_153 = arith.constant dense<0.000000e+00> : vector<16xf32>
    %409 = vector.multi_reduction <add>, %408, %cst_153 [1] : vector<16x32xf32> to vector<16xf32>
    %410 = vector.shape_cast %409 : vector<16xf32> to vector<16x1xf32>
    %cst_154 = arith.constant 3.200000e+01 : f32
    %411 = vector.broadcast %cst_154 : f32 to vector<16x1xf32>
    %412 = arith.divf %410, %411 : vector<16x1xf32>
    %413 = vector.broadcast %405 : vector<16x1xf32> to vector<16x32xf32>
    %414 = arith.subf %399, %413 : vector<16x32xf32>
    %cst_155 = arith.constant 9.99999974E-6 : f32
    %415 = vector.broadcast %cst_155 : f32 to vector<16x1xf32>
    %416 = arith.addf %412, %415 : vector<16x1xf32>
    %417 = math.rsqrt %416 : vector<16x1xf32>
    %418 = vector.broadcast %417 : vector<16x1xf32> to vector<16x32xf32>
    %419 = arith.mulf %414, %418 : vector<16x32xf32>
    %420 = vector.broadcast %400 : vector<1x32xf32> to vector<16x32xf32>
    %421 = arith.mulf %419, %420 : vector<16x32xf32>
    %422 = vector.broadcast %401 : vector<1x32xf32> to vector<16x32xf32>
    %423 = arith.addf %421, %422 : vector<16x32xf32>
    %424 = vector.shape_cast %423 : vector<16x32xf32> to vector<2x8x32xf32>
    %cst_156 = arith.constant dense<0.000000e+00> : vector<2x32xf32>
    %425 = vector.multi_reduction <add>, %424, %cst_156 [1] : vector<2x8x32xf32> to vector<2x32xf32>
    %cst_157 = arith.constant 8.000000e+00 : f32
    %426 = vector.broadcast %cst_157 : f32 to vector<2x32xf32>
    %427 = arith.divf %425, %426 : vector<2x32xf32>
    %c0_158 = arith.constant 0 : index
    %c0_159 = arith.constant 0 : index
    %428 = vector.load %arg19[%c0_158, %c0_159] : memref<32x48xbf16, #tpu.memory_space<vmem>>, vector<32x48xbf16>
    %429 = arith.truncf %427 : vector<2x32xf32> to vector<2x32xbf16>
    %cst_160 = arith.constant dense<0.000000e+00> : vector<2x48xf32>
    %430 = tpu.matmul %429, %428, %cst_160 {dimension_numbers = #tpu.dot_dimension_numbers<[1], [0], [0], [1], [0, 0, 1, 1], [], []>} : vector<2x32xbf16>, vector<32x48xbf16>, vector<2x48xf32> -> vector<2x48xf32>
    %c0_161 = arith.constant 0 : index
    %c0_162 = arith.constant 0 : index
    %431 = vector.load %arg20[%c0_161, %c0_162] : memref<1x48xf32, #tpu.memory_space<vmem>>, vector<1x48xf32>
    %432 = vector.broadcast %431 : vector<1x48xf32> to vector<2x48xf32>
    %433 = arith.addf %430, %432 : vector<2x48xf32>
    %cst_163 = arith.constant 5.000000e-01 : f32
    %434 = vector.broadcast %cst_163 : f32 to vector<2x48xf32>
    %435 = arith.mulf %434, %433 : vector<2x48xf32>
    %cst_164 = arith.constant 0.707106769 : f32
    %436 = vector.broadcast %cst_164 : f32 to vector<2x48xf32>
    %437 = arith.mulf %433, %436 : vector<2x48xf32>
    %438 = math.erf %437 : vector<2x48xf32>
    %cst_165 = arith.constant 1.000000e+00 : f32
    %439 = vector.broadcast %cst_165 : f32 to vector<2x48xf32>
    %440 = arith.addf %439, %438 : vector<2x48xf32>
    %441 = arith.mulf %435, %440 : vector<2x48xf32>
    %c0_166 = arith.constant 0 : index
    %c0_167 = arith.constant 0 : index
    %442 = vector.load %arg21[%c0_166, %c0_167] : memref<48x48xbf16, #tpu.memory_space<vmem>>, vector<48x48xbf16>
    %443 = arith.truncf %441 : vector<2x48xf32> to vector<2x48xbf16>
    %cst_168 = arith.constant dense<0.000000e+00> : vector<2x48xf32>
    %444 = tpu.matmul %443, %442, %cst_168 {dimension_numbers = #tpu.dot_dimension_numbers<[1], [0], [0], [1], [0, 0, 1, 1], [], []>} : vector<2x48xbf16>, vector<48x48xbf16>, vector<2x48xf32> -> vector<2x48xf32>
    %c0_169 = arith.constant 0 : index
    %c0_170 = arith.constant 0 : index
    %445 = vector.load %arg22[%c0_169, %c0_170] : memref<1x48xf32, #tpu.memory_space<vmem>>, vector<1x48xf32>
    %446 = vector.broadcast %445 : vector<1x48xf32> to vector<2x48xf32>
    %447 = arith.addf %444, %446 : vector<2x48xf32>
    %c0_171 = arith.constant 0 : index
    %c0_172 = arith.constant 0 : index
    %448 = vector.load %arg23[%c0_171, %c0_172] : memref<2x48xf32, #tpu.memory_space<vmem>>, vector<2x48xf32>
    tpu.vector_store %arg23[%c0_171, %c0_172], %447 {strides = array<i32>} : memref<2x48xf32, #tpu.memory_space<vmem>>, vector<2x48xf32>,
    return
  }
  func.func @transform_0(%arg0: i32) -> (i32, i32, i32) {
    %c0_i32 = arith.constant 0 : i32
    %c0_i32_0 = arith.constant 0 : i32
    %c0_i32_1 = arith.constant 0 : i32
    return %arg0, %c0_i32, %c0_i32_0 : i32, i32, i32
  }
  func.func @transform_1(%arg0: i32) -> (i32, i32) {
    %c0_i32 = arith.constant 0 : i32
    %c0_i32_0 = arith.constant 0 : i32
    %c0_i32_1 = arith.constant 0 : i32
    return %c0_i32, %c0_i32_0 : i32, i32
  }
  func.func @transform_2(%arg0: i32) -> (i32, i32) {
    %c0_i32 = arith.constant 0 : i32
    %c0_i32_0 = arith.constant 0 : i32
    %c0_i32_1 = arith.constant 0 : i32
    return %c0_i32, %c0_i32_0 : i32, i32
  }
  func.func @transform_3(%arg0: i32) -> (i32, i32) {
    %c0_i32 = arith.constant 0 : i32
    %c0_i32_0 = arith.constant 0 : i32
    %c0_i32_1 = arith.constant 0 : i32
    return %c0_i32, %c0_i32_0 : i32, i32
  }
  func.func @transform_4(%arg0: i32) -> (i32, i32, i32) {
    %c0_i32 = arith.constant 0 : i32
    %c0_i32_0 = arith.constant 0 : i32
    %c0_i32_1 = arith.constant 0 : i32
    %c0_i32_2 = arith.constant 0 : i32
    return %c0_i32, %c0_i32_0, %c0_i32_1 : i32, i32, i32
  }
  func.func @transform_5(%arg0: i32) -> (i32, i32, i32) {
    %c0_i32 = arith.constant 0 : i32
    %c0_i32_0 = arith.constant 0 : i32
    %c0_i32_1 = arith.constant 0 : i32
    %c0_i32_2 = arith.constant 0 : i32
    return %c0_i32, %c0_i32_0, %c0_i32_1 : i32, i32, i32
  }
  func.func @transform_6(%arg0: i32) -> (i32, i32, i32) {
    %c0_i32 = arith.constant 0 : i32
    %c0_i32_0 = arith.constant 0 : i32
    %c0_i32_1 = arith.constant 0 : i32
    %c0_i32_2 = arith.constant 0 : i32
    return %c0_i32, %c0_i32_0, %c0_i32_1 : i32, i32, i32
  }
  func.func @transform_7(%arg0: i32) -> (i32, i32, i32) {
    %c0_i32 = arith.constant 0 : i32
    %c0_i32_0 = arith.constant 0 : i32
    %c0_i32_1 = arith.constant 0 : i32
    %c0_i32_2 = arith.constant 0 : i32
    return %c0_i32, %c0_i32_0, %c0_i32_1 : i32, i32, i32
  }
  func.func @transform_8(%arg0: i32) -> (i32, i32, i32) {
    %c0_i32 = arith.constant 0 : i32
    %c0_i32_0 = arith.constant 0 : i32
    %c0_i32_1 = arith.constant 0 : i32
    %c0_i32_2 = arith.constant 0 : i32
    return %c0_i32, %c0_i32_0, %c0_i32_1 : i32, i32, i32
  }
  func.func @transform_9(%arg0: i32) -> (i32, i32, i32) {
    %c0_i32 = arith.constant 0 : i32
    %c0_i32_0 = arith.constant 0 : i32
    %c0_i32_1 = arith.constant 0 : i32
    %c0_i32_2 = arith.constant 0 : i32
    return %c0_i32, %c0_i32_0, %c0_i32_1 : i32, i32, i32
  }
  func.func @transform_10(%arg0: i32) -> (i32, i32, i32) {
    %c0_i32 = arith.constant 0 : i32
    %c0_i32_0 = arith.constant 0 : i32
    %c0_i32_1 = arith.constant 0 : i32
    %c0_i32_2 = arith.constant 0 : i32
    return %c0_i32, %c0_i32_0, %c0_i32_1 : i32, i32, i32
  }
  func.func @transform_11(%arg0: i32) -> (i32, i32, i32) {
    %c0_i32 = arith.constant 0 : i32
    %c0_i32_0 = arith.constant 0 : i32
    %c0_i32_1 = arith.constant 0 : i32
    %c0_i32_2 = arith.constant 0 : i32
    return %c0_i32, %c0_i32_0, %c0_i32_1 : i32, i32, i32
  }
  func.func @transform_12(%arg0: i32) -> (i32, i32, i32) {
    %c0_i32 = arith.constant 0 : i32
    %c0_i32_0 = arith.constant 0 : i32
    %c0_i32_1 = arith.constant 0 : i32
    %c0_i32_2 = arith.constant 0 : i32
    return %c0_i32, %c0_i32_0, %c0_i32_1 : i32, i32, i32
  }
  func.func @transform_13(%arg0: i32) -> (i32, i32, i32) {
    %c0_i32 = arith.constant 0 : i32
    %c0_i32_0 = arith.constant 0 : i32
    %c0_i32_1 = arith.constant 0 : i32
    %c0_i32_2 = arith.constant 0 : i32
    return %c0_i32, %c0_i32_0, %c0_i32_1 : i32, i32, i32
  }
  func.func @transform_14(%arg0: i32) -> (i32, i32, i32) {
    %c0_i32 = arith.constant 0 : i32
    %c0_i32_0 = arith.constant 0 : i32
    %c0_i32_1 = arith.constant 0 : i32
    %c0_i32_2 = arith.constant 0 : i32
    return %c0_i32, %c0_i32_0, %c0_i32_1 : i32, i32, i32
  }
  func.func @transform_15(%arg0: i32) -> (i32, i32, i32) {
    %c0_i32 = arith.constant 0 : i32
    %c0_i32_0 = arith.constant 0 : i32
    %c0_i32_1 = arith.constant 0 : i32
    %c0_i32_2 = arith.constant 0 : i32
    return %c0_i32, %c0_i32_0, %c0_i32_1 : i32, i32, i32
  }
  func.func @transform_16(%arg0: i32) -> (i32, i32) {
    %c0_i32 = arith.constant 0 : i32
    %c0_i32_0 = arith.constant 0 : i32
    %c0_i32_1 = arith.constant 0 : i32
    return %c0_i32, %c0_i32_0 : i32, i32
  }
  func.func @transform_17(%arg0: i32) -> (i32, i32) {
    %c0_i32 = arith.constant 0 : i32
    %c0_i32_0 = arith.constant 0 : i32
    %c0_i32_1 = arith.constant 0 : i32
    return %c0_i32, %c0_i32_0 : i32, i32
  }
  func.func @transform_18(%arg0: i32) -> (i32, i32) {
    %c0_i32 = arith.constant 0 : i32
    %c0_i32_0 = arith.constant 0 : i32
    %c0_i32_1 = arith.constant 0 : i32
    return %c0_i32, %c0_i32_0 : i32, i32
  }
  func.func @transform_19(%arg0: i32) -> (i32, i32) {
    %c0_i32 = arith.constant 0 : i32
    %c0_i32_0 = arith.constant 0 : i32
    %c0_i32_1 = arith.constant 0 : i32
    return %c0_i32, %c0_i32_0 : i32, i32
  }
  func.func @transform_20(%arg0: i32) -> (i32, i32) {
    %c0_i32 = arith.constant 0 : i32
    %c0_i32_0 = arith.constant 0 : i32
    %c0_i32_1 = arith.constant 0 : i32
    return %c0_i32, %c0_i32_0 : i32, i32
  }
  func.func @transform_21(%arg0: i32) -> (i32, i32) {
    %c0_i32 = arith.constant 0 : i32
    %c0_i32_0 = arith.constant 0 : i32
    %c0_i32_1 = arith.constant 0 : i32
    return %c0_i32, %c0_i32_0 : i32, i32
  }
  func.func @transform_22(%arg0: i32) -> (i32, i32) {
    %c0_i32 = arith.constant 0 : i32
    %c0_i32_0 = arith.constant 0 : i32
    return %arg0, %c0_i32 : i32, i32
  }
}

</mosaic_0001>

<bundles_post_ra>
// kernel: tpu_custom_call.1
= control target key start
LH: loop header
LB: loop body
LE: loop exit
PB: predicated region body
PF: predicated region fallthrough
CT: control target
= control target key end

     0   :  { %s5292_s0 = inlined_call_operand.hbm [shape: f32[2,8,16], index: 0, kind: input, shape index: {}]   ;;  %s5293_s1 = inlined_call_operand.hbm [shape: bf16[16,32], index: 1, kind: input, shape index: {}]   ;;  %s5294_s2 = inlined_call_operand.hbm [shape: f32[1,32], index: 2, kind: input, shape index: {}]   ;;  %s5295_s3 = inlined_call_operand.hbm [shape: f32[8,32], index: 3, kind: input, shape index: {}]   ;;  %s5296_s4 = inlined_call_operand.vmem [shape: bf16[2,32,96], index: 4, kind: input, shape index: {}]   ;;  %s5297_s5 = inlined_call_operand.hbm [shape: f32[2,1,96], index: 5, kind: input, shape index: {}]   ;;  %s5298_s6 = inlined_call_operand.vmem [shape: bf16[2,32,32], index: 6, kind: input, shape index: {}]   ;;  %s5299_s7 = inlined_call_operand.hbm [shape: f32[2,1,32], index: 7, kind: input, shape index: {}]   ;;  %s5300_s8 = inlined_call_operand.hbm [shape: f32[2,1,32], index: 8, kind: input, shape index: {}]   ;;  %s5301_s9 = inlined_call_operand.hbm [shape: f32[2,1,32], index: 9, kind: input, shape index: {}]   ;;  %s5302_s10 = inlined_call_operand.hbm [shape: f32[2,1,32], index: 10, kind: input, shape index: {}]   ;;  %s5303_s11 = inlined_call_operand.hbm [shape: f32[2,1,32], index: 11, kind: input, shape index: {}]   ;;  %s5304_s12 = inlined_call_operand.vmem [shape: bf16[2,32,64], index: 12, kind: input, shape index: {}]   ;;  %s5305_s13 = inlined_call_operand.hbm [shape: f32[2,1,64], index: 13, kind: input, shape index: {}]   ;;  %s5306_s14 = inlined_call_operand.vmem [shape: bf16[2,64,32], index: 14, kind: input, shape index: {}]   ;;  %s5307_s15 = inlined_call_operand.hbm [shape: f32[2,1,32], index: 15, kind: input, shape index: {}]   ;;  %s5308_s16 = inlined_call_operand.vmem [shape: f32[1,32], index: 16, kind: input, shape index: {}]   ;;  %s5309_s17 = inlined_call_operand.vmem [shape: f32[1,32], index: 17, kind: input, shape index: {}]   ;;  %s5310_s18 = inlined_call_operand.hbm [shape: bf16[32,48], index: 18, kind: input, shape index: {}]   ;;  %s5311_s19 = inlined_call_operand.vmem [shape: f32[1,48], index: 19, kind: input, shape index: {}]   ;;  %s5312_s20 = inlined_call_operand.vmem [shape: bf16[48,48], index: 20, kind: input, shape index: {}]   ;;  %s5313_s21 = inlined_call_operand.vmem [shape: f32[1,48], index: 21, kind: input, shape index: {}]   ;;  %s5314_s22 = inlined_call_operand.hbm [shape: f32[2,48], index: 22, kind: output, shape index: {}]  }
   0x1   :  { %5325 = sst [smem:[#allocation32_spill]] %s5292_s0 }
   0x2   :  { %5326 = sst [smem:[#allocation33_spill]] %s5293_s1 }
   0x3   :  { %5327 = sst [smem:[#allocation34_spill]] %s5294_s2 }
   0x4   :  { %5328 = sst [smem:[#allocation35_spill]] %s5295_s3 }
   0x5   :  { %5329 = sst [smem:[#allocation36_spill]] %s5296_s4 }
   0x6   :  { %5330 = sst [smem:[#allocation37_spill]] %s5297_s5 }
   0x7   :  { %5331 = sst [smem:[#allocation38_spill]] %s5298_s6 }
   0x8   :  { %5332 = sst [smem:[#allocation39_spill]] %s5313_s21 }
   0x9   :  { %5333 = sst [smem:[#allocation40_spill]] %s5314_s22 }
   0xa   :  { %27 = vsyncpa [#allocation3], 0 }
   0xb   :  { %28 = vsyncpa [#allocation6], 0 }
   0xc   :  { %29 = vsyncpa [#allocation9], 0 }
   0xd   :  { %30 = vsyncpa [#allocation12], 0 }
   0xe   :  { %31 = vsyncpa [#allocation15], 0 }
   0xf   :  { %32 = vsyncpa [#allocation18], 0 }
  0x10   :  { %33 = vsyncpa [#allocation21], 0 }
  0x11   :  { %34 = vsyncpa [#allocation4], 0  ;;  %s4393_s3 = smov [#allocation5]   ;;  %s5334_s4 = sld [smem:[#allocation33_spill]] }
  0x12   :  { %s52_s28 = sshll.u32 %s4393_s3, 4  ;;  %s53_s28 = int_to_ptr.vmem [resolvable:$true] %s52_s28 }
  0x17   :  { %s4069_s0 = scalar_lea.hbm %s5334_s4, 128 }
  0x18   :  { %p4070_p0 = scmp.ne.s32.totalorder %s5334_s4, %s4069_s0  ;;  %p4073_p1 = scmp.lt.u32.totalorder %s4069_s0, %s5334_s4 }
  0x1a   :  { %p4075_p2 = pnand %p4073_p1, %p4070_p0 }
  0x1c   :  { %4078 = shalt.err (!%p4075_p2)
}
  0x1d   :  { %s4079_s6 = scalar_lea.vmem %s53_s28, 128  ;;  %p4084_p4 = scmp.lt.s32.totalorder %s53_s28, %s53_s28 }
  0x1e   :  { %p4080_p3 = scmp.ne.s32.totalorder %s53_s28, %s4079_s6  ;;  %p4085_p5 = scmp.lt.s32.totalorder %s4079_s6, %s4079_s6 }
  0x20   :  { %p4086_p6 = por %p4085_p5, %p4084_p4 }
  0x22   :  { %p4087_p7 = pnand %p4086_p6, %p4080_p3 }
  0x24   :  { %4090 = shalt.err (!%p4087_p7)
}
  0x25   :  { %s5323_s25 = smov 64   ;;  %s4395_s26 = smov 4  }
  0x26   :  { %58 = dma.hbm_to_vmem [thread:$0]  %s5334_s4, 128, %s53_s28, [#allocation6], %s5323_s25, %s5323_s25, %s4395_s26  }
  0x27   :  { %s4396_s3 = smov [#allocation8]   ;;  %s5335_s23 = sld [smem:[#allocation35_spill]] }
  0x28   :  { %s75_s29 = sshll.u32 %s4396_s3, 4  ;;  %s76_s29 = int_to_ptr.vmem [resolvable:$true] %s75_s29 }
  0x2d   :  { %s4091_s1 = scalar_lea.hbm %s5335_s23, 128 }
  0x2e   :  { %p4092_p8 = scmp.ne.s32.totalorder %s5335_s23, %s4091_s1  ;;  %p4095_p9 = scmp.lt.u32.totalorder %s4091_s1, %s5335_s23 }
  0x30   :  { %p4097_p10 = pnand %p4095_p9, %p4092_p8 }
  0x32   :  { %4100 = shalt.err (!%p4097_p10)
}
  0x33   :  { %s4101_s21 = scalar_lea.vmem %s76_s29, 128  ;;  %p4106_p12 = scmp.lt.s32.totalorder %s76_s29, %s76_s29 }
  0x34   :  { %p4102_p11 = scmp.ne.s32.totalorder %s76_s29, %s4101_s21  ;;  %p4107_p13 = scmp.lt.s32.totalorder %s4101_s21, %s4101_s21 }
  0x36   :  { %p4108_p0 = por %p4107_p13, %p4106_p12 }
  0x38   :  { %p4109_p1 = pnand %p4108_p0, %p4102_p11 }
  0x3a   :  { %4112 = shalt.err (!%p4109_p1)
}
  0x3b   :  { %78 = dma.hbm_to_vmem [thread:$0]  %s5335_s23, 128, %s76_s29, [#allocation9]  }
  0x3c   :  { %s4397_s2 = smov [#allocation11]   ;;  %s4398_s3 = smov [#allocation14]  }
  0x3d   :  { %s100_s27 = sshll.u32 %s4397_s2, 4  ;;  %s124_s30 = sshll.u32 %s4398_s3, 4  ;;  %s101_s27 = int_to_ptr.vmem [resolvable:$true] %s100_s27  ;;  %s4567_s30 = int_to_ptr.vmem [resolvable:$true] %s124_s30 }
  0x3e   :  { %s4113_s1 = scalar_lea.hbm %s5299_s7, 32 }
  0x3f   :  { %p4114_p2 = scmp.ne.s32.totalorder %s5299_s7, %s4113_s1  ;;  %p4117_p3 = scmp.lt.u32.totalorder %s4113_s1, %s5299_s7 }
  0x41   :  { %p4119_p4 = pnand %p4117_p3, %p4114_p2 }
  0x43   :  { %4122 = shalt.err (!%p4119_p4)
}
  0x44   :  { %s4123_s29 = scalar_lea.vmem %s101_s27, 32  ;;  %p4128_p6 = scmp.lt.s32.totalorder %s101_s27, %s101_s27 }
  0x45   :  { %p4124_p5 = scmp.ne.s32.totalorder %s101_s27, %s4123_s29  ;;  %p4129_p7 = scmp.lt.s32.totalorder %s4123_s29, %s4123_s29 }
  0x47   :  { %p4130_p8 = por %p4129_p7, %p4128_p6 }
  0x49   :  { %p4131_p9 = pnand %p4130_p8, %p4124_p5 }
  0x4b   :  { %4134 = shalt.err (!%p4131_p9)
}
  0x4c   :  { %s4399_s23 = smov 16   ;;  %s4400_s28 = smov 1  }
  0x4d   :  { %106 = dma.hbm_to_vmem [thread:$0]  %s5299_s7, 32, %s101_s27, [#allocation12], %s4399_s23, %s4399_s23, %s4400_s28  }
  0x4e   :  { %s4135_s0 = scalar_lea.hbm %s5301_s9, 32 }
  0x4f   :  { %p4136_p10 = scmp.ne.s32.totalorder %s5301_s9, %s4135_s0  ;;  %p4139_p11 = scmp.lt.u32.totalorder %s4135_s0, %s5301_s9 }
  0x51   :  { %p4141_p12 = pnand %p4139_p11, %p4136_p10 }
  0x53   :  { %4144 = shalt.err (!%p4141_p12)
}
  0x54   :  { %s4145_s6 = scalar_lea.vmem %s4567_s30, 32  ;;  %p4150_p0 = scmp.lt.s32.totalorder %s4567_s30, %s4567_s30 }
  0x55   :  { %p4146_p13 = scmp.ne.s32.totalorder %s4567_s30, %s4145_s6  ;;  %p4151_p1 = scmp.lt.s32.totalorder %s4145_s6, %s4145_s6 }
  0x57   :  { %p4152_p2 = por %p4151_p1, %p4150_p0 }
  0x59   :  { %p4153_p3 = pnand %p4152_p2, %p4146_p13 }
  0x5b   :  { %4156 = shalt.err (!%p4153_p3)
}
  0x5c   :  { %130 = dma.hbm_to_vmem [thread:$0]  %s5301_s9, 32, %s4567_s30, [#allocation15], %s4399_s23, %s4399_s23, %s4400_s28  }
  0x5d   :  { %s4401_s29 = smov [#allocation17]   ;;  %s4402_s2 = smov [#allocation20]  }
  0x5e   :  { %s148_s4 = sshll.u32 %s4401_s29, 4  ;;  %s176_s3 = sshll.u32 %s4402_s2, 4  ;;  %s149_s4 = int_to_ptr.vmem [resolvable:$true] %s148_s4  ;;  %s4604_s3 = int_to_ptr.vmem [resolvable:$true] %s176_s3 }
  0x5f   :  { %s4157_s1 = scalar_lea.hbm %s5303_s11, 32 }
  0x60   :  { %p4158_p4 = scmp.ne.s32.totalorder %s5303_s11, %s4157_s1  ;;  %p4161_p5 = scmp.lt.u32.totalorder %s4157_s1, %s5303_s11 }
  0x62   :  { %p4163_p6 = pnand %p4161_p5, %p4158_p4 }
  0x64   :  { %4166 = shalt.err (!%p4163_p6)
}
  0x65   :  { %s4167_s9 = scalar_lea.vmem %s149_s4, 32  ;;  %p4172_p8 = scmp.lt.s32.totalorder %s149_s4, %s149_s4 }
  0x66   :  { %p4168_p7 = scmp.ne.s32.totalorder %s149_s4, %s4167_s9  ;;  %p4173_p9 = scmp.lt.s32.totalorder %s4167_s9, %s4167_s9 }
  0x68   :  { %p4174_p10 = por %p4173_p9, %p4172_p8 }
  0x6a   :  { %p4175_p11 = pnand %p4174_p10, %p4168_p7 }
  0x6c   :  { %4178 = shalt.err (!%p4175_p11)
}
  0x6d   :  { %154 = dma.hbm_to_vmem [thread:$0]  %s5303_s11, 32, %s149_s4, [#allocation18], %s4399_s23, %s4399_s23, %s4400_s28  }
  0x6e   :  { %s4179_s2 = scalar_lea.hbm %s5307_s15, 32 }
  0x6f   :  { %p4180_p12 = scmp.ne.s32.totalorder %s5307_s15, %s4179_s2  ;;  %p4183_p13 = scmp.lt.u32.totalorder %s4179_s2, %s5307_s15 }
  0x71   :  { %p4185_p0 = pnand %p4183_p13, %p4180_p12 }
  0x73   :  { %4188 = shalt.err (!%p4185_p0)
}
  0x74   :  { %s4189_s21 = scalar_lea.vmem %s4604_s3, 32  ;;  %p4194_p2 = scmp.lt.s32.totalorder %s4604_s3, %s4604_s3 }
  0x75   :  { %p4190_p1 = scmp.ne.s32.totalorder %s4604_s3, %s4189_s21  ;;  %p4195_p3 = scmp.lt.s32.totalorder %s4189_s21, %s4189_s21 }
  0x77   :  { %p4196_p4 = por %p4195_p3, %p4194_p2 }
  0x79   :  { %p4197_p5 = pnand %p4196_p4, %p4190_p1 }
  0x7b   :  { %4200 = shalt.err (!%p4197_p5)
}
  0x7c   :  { %182 = dma.hbm_to_vmem [thread:$0]  %s5307_s15, 32, %s4604_s3, [#allocation21], %s4399_s23, %s4399_s23, %s4400_s28  }
  0x7d   :  { %s4403_s24 = smov [#allocation2]   ;;  %s5336_s7 = sld [smem:[#allocation32_spill]] }
  0x7e   :  { %s40_s6 = sshll.u32 %s4403_s24, 4  ;;  %s41_s6 = int_to_ptr.vmem [resolvable:$true] %s40_s6 }
  0x83   :  { %s4201_s27 = scalar_lea.hbm %s5336_s7, 256 }
  0x84   :  { %p4202_p6 = scmp.ne.s32.totalorder %s5336_s7, %s4201_s27  ;;  %p4205_p7 = scmp.lt.u32.totalorder %s4201_s27, %s5336_s7 }
  0x86   :  { %p4207_p8 = pnand %p4205_p7, %p4202_p6 }
  0x88   :  { %4210 = shalt.err (!%p4207_p8)
}
  0x89   :  { %s4211_s1 = scalar_lea.vmem %s41_s6, 256  ;;  %p4216_p10 = scmp.lt.s32.totalorder %s41_s6, %s41_s6 }
  0x8a   :  { %p4212_p9 = scmp.ne.s32.totalorder %s41_s6, %s4211_s1  ;;  %p4217_p11 = scmp.lt.s32.totalorder %s4211_s1, %s4211_s1 }
  0x8c   :  { %p4218_p12 = por %p4217_p11, %p4216_p10 }
  0x8e   :  { %p4219_p13 = pnand %p4218_p12, %p4212_p9 }
  0x90   :  { %4222 = shalt.err (!%p4219_p13)
}
  0x91   :  { %s4404_s15 = smov 128   ;;  %s4405_s3 = smov 8  }
  0x92   :  { %46 = dma.hbm_to_vmem [thread:$0]  %s5336_s7, 256, %s41_s6, [#allocation3], %s4404_s15, %s4404_s15, %s4405_s3  }
  0x93   :  { %s4406_s11 = smov [#allocation7]   ;;  %s4407_s24 = smov [#allocation10]  }
  0x94   :  { %s65_s4 = sshll.u32 %s4406_s11, 4  ;;  %s86_s9 = sshll.u32 %s4407_s24, 4  ;;  %s66_s4 = int_to_ptr.vmem [resolvable:$true] %s65_s4  ;;  %s87_s9 = int_to_ptr.vmem [resolvable:$true] %s86_s9 }
  0x95   :  { %s5337_s29 = sld [smem:[#allocation34_spill]] }
  0x9b   :  { %s4223_s2 = scalar_lea.hbm %s5337_s29, 16 }
  0x9c   :  { %p4224_p0 = scmp.ne.s32.totalorder %s5337_s29, %s4223_s2  ;;  %p4227_p1 = scmp.lt.u32.totalorder %s4223_s2, %s5337_s29 }
  0x9e   :  { %p4229_p2 = pnand %p4227_p1, %p4224_p0 }
  0xa0   :  { %4232 = shalt.err (!%p4229_p2)
}
  0xa1   :  { %s4233_s6 = scalar_lea.vmem %s66_s4, 16  ;;  %s4237_s7 = scalar_lea.vmem %s66_s4, 32 }
  0xa2   :  { %p4234_p3 = scmp.ne.s32.totalorder %s66_s4, %s4233_s6  ;;  %p4238_p4 = scmp.lt.s32.totalorder %s66_s4, %s66_s4 }
  0xa3   :  { %p4239_p5 = scmp.lt.s32.totalorder %s4237_s7, %s4233_s6 }
  0xa5   :  { %p4240_p6 = por %p4239_p5, %p4238_p4 }
  0xa7   :  { %p4241_p7 = pnand %p4240_p6, %p4234_p3 }
  0xa9   :  { %4244 = shalt.err (!%p4241_p7)
}
  0xaa   :  { %68 = dma.hbm_to_vmem [thread:$0]  %s5337_s29, 16, %s66_s4, [#allocation6]  }
  0xab   :  { %s5338_s11 = sld [smem:[#allocation37_spill]] }
  0xb1   :  { %s4245_s25 = scalar_lea.hbm %s5338_s11, 32 }
  0xb2   :  { %p4246_p8 = scmp.ne.s32.totalorder %s5338_s11, %s4245_s25  ;;  %p4249_p9 = scmp.lt.u32.totalorder %s4245_s25, %s5338_s11 }
  0xb4   :  { %p4251_p10 = pnand %p4249_p9, %p4246_p8 }
  0xb6   :  { %4254 = shalt.err (!%p4251_p10)
}
  0xb7   :  { %s4255_s22 = scalar_lea.vmem %s87_s9, 32  ;;  %p4260_p12 = scmp.lt.s32.totalorder %s87_s9, %s87_s9 }
  0xb8   :  { %p4256_p11 = scmp.ne.s32.totalorder %s87_s9, %s4255_s22  ;;  %p4261_p13 = scmp.lt.s32.totalorder %s4255_s22, %s4255_s22 }
  0xba   :  { %p4262_p0 = por %p4261_p13, %p4260_p12 }
  0xbc   :  { %p4263_p1 = pnand %p4262_p0, %p4256_p11 }
  0xbe   :  { %4266 = shalt.err (!%p4263_p1)
}
  0xbf   :  { %92 = dma.hbm_to_vmem [thread:$0]  %s5338_s11, 32, %s87_s9, [#allocation9], %s4399_s23, %s4399_s23, %s4400_s28  }
  0xc0   :  { %s4408_s0 = smov [#allocation13]   ;;  %s4409_s6 = smov [#allocation16]  }
  0xc1   :  { %s112_s1 = sshll.u32 %s4408_s0, 4  ;;  %s136_s7 = sshll.u32 %s4409_s6, 4  ;;  %s113_s1 = int_to_ptr.vmem [resolvable:$true] %s112_s1  ;;  %s137_s7 = int_to_ptr.vmem [resolvable:$true] %s136_s7 }
  0xc2   :  { %s4267_s5 = scalar_lea.hbm %s5300_s8, 32 }
  0xc3   :  { %p4268_p2 = scmp.ne.s32.totalorder %s5300_s8, %s4267_s5  ;;  %p4271_p3 = scmp.lt.u32.totalorder %s4267_s5, %s5300_s8 }
  0xc5   :  { %p4273_p4 = pnand %p4271_p3, %p4268_p2 }
  0xc7   :  { %4276 = shalt.err (!%p4273_p4)
}
  0xc8   :  { %s4277_s9 = scalar_lea.vmem %s113_s1, 32  ;;  %p4282_p6 = scmp.lt.s32.totalorder %s113_s1, %s113_s1 }
  0xc9   :  { %p4278_p5 = scmp.ne.s32.totalorder %s113_s1, %s4277_s9  ;;  %p4283_p7 = scmp.lt.s32.totalorder %s4277_s9, %s4277_s9 }
  0xcb   :  { %p4284_p8 = por %p4283_p7, %p4282_p6 }
  0xcd   :  { %p4285_p9 = pnand %p4284_p8, %p4278_p5 }
  0xcf   :  { %4288 = shalt.err (!%p4285_p9)
}
  0xd0   :  { %118 = dma.hbm_to_vmem [thread:$0]  %s5300_s8, 32, %s113_s1, [#allocation12], %s4399_s23, %s4399_s23, %s4400_s28  }
  0xd1   :  { %s4289_s4 = scalar_lea.hbm %s5302_s10, 32 }
  0xd2   :  { %p4290_p10 = scmp.ne.s32.totalorder %s5302_s10, %s4289_s4  ;;  %p4293_p11 = scmp.lt.u32.totalorder %s4289_s4, %s5302_s10 }
  0xd4   :  { %p4295_p12 = pnand %p4293_p11, %p4290_p10 }
  0xd6   :  { %4298 = shalt.err (!%p4295_p12)
}
  0xd7   :  { %s4299_s3 = scalar_lea.vmem %s137_s7, 32  ;;  %p4304_p0 = scmp.lt.s32.totalorder %s137_s7, %s137_s7 }
  0xd8   :  { %p4300_p13 = scmp.ne.s32.totalorder %s137_s7, %s4299_s3  ;;  %p4305_p1 = scmp.lt.s32.totalorder %s4299_s3, %s4299_s3 }
  0xda   :  { %p4306_p2 = por %p4305_p1, %p4304_p0 }
  0xdc   :  { %p4307_p3 = pnand %p4306_p2, %p4300_p13 }
  0xde   :  { %4310 = shalt.err (!%p4307_p3)
}
  0xdf   :  { %142 = dma.hbm_to_vmem [thread:$0]  %s5302_s10, 32, %s137_s7, [#allocation15], %s4399_s23, %s4399_s23, %s4400_s28  }
  0xe0   :  { %s4410_s5 = smov [#allocation19]   ;;  %s4411_s25 = smov [#allocation22]  }
  0xe1   :  { %s162_s21 = sshll.u32 %s4410_s5, 4  ;;  %s192_s24 = sshll.u32 %s4411_s25, 4  ;;  %s163_s21 = int_to_ptr.vmem [resolvable:$true] %s162_s21  ;;  %s193_s24 = int_to_ptr.vmem [resolvable:$true] %s192_s24 }
  0xe2   :  { %s4311_s11 = scalar_lea.hbm %s5305_s13, 32 }
  0xe3   :  { %p4312_p4 = scmp.ne.s32.totalorder %s5305_s13, %s4311_s11  ;;  %p4315_p5 = scmp.lt.u32.totalorder %s4311_s11, %s5305_s13 }
  0xe5   :  { %p4317_p6 = pnand %p4315_p5, %p4312_p4 }
  0xe7   :  { %4320 = shalt.err (!%p4317_p6)
}
  0xe8   :  { %s4321_s10 = scalar_lea.vmem %s163_s21, 32  ;;  %p4326_p8 = scmp.lt.s32.totalorder %s163_s21, %s163_s21 }
  0xe9   :  { %p4322_p7 = scmp.ne.s32.totalorder %s163_s21, %s4321_s10  ;;  %p4327_p9 = scmp.lt.s32.totalorder %s4321_s10, %s4321_s10 }
  0xeb   :  { %p4328_p10 = por %p4327_p9, %p4326_p8 }
  0xed   :  { %p4329_p11 = pnand %p4328_p10, %p4322_p7 }
  0xef   :  { %4332 = shalt.err (!%p4329_p11)
}
  0xf0   :  { %168 = dma.hbm_to_vmem [thread:$0]  %s5305_s13, 32, %s163_s21, [#allocation18], %s4399_s23, %s4399_s23, %s4400_s28  }
  0xf1   :  { %s4333_s15 = scalar_lea.hbm %s5310_s18, 256 }
  0xf2   :  { %p4334_p12 = scmp.ne.s32.totalorder %s5310_s18, %s4333_s15  ;;  %p4337_p13 = scmp.lt.u32.totalorder %s4333_s15, %s5310_s18 }
  0xf4   :  { %p4339_p0 = pnand %p4337_p13, %p4334_p12 }
  0xf6   :  { %4342 = shalt.err (!%p4339_p0)
}
  0xf7   :  { %s4343_s25 = scalar_lea.vmem %s193_s24, 256  ;;  %p4348_p2 = scmp.lt.s32.totalorder %s193_s24, %s193_s24 }
  0xf8   :  { %p4344_p1 = scmp.ne.s32.totalorder %s193_s24, %s4343_s25  ;;  %p4349_p3 = scmp.lt.s32.totalorder %s4343_s25, %s4343_s25 }
  0xfa   :  { %p4350_p4 = por %p4349_p3, %p4348_p2 }
  0xfc   :  { %p4351_p5 = pnand %p4350_p4, %p4344_p1 }
  0xfe   :  { %4354 = shalt.err (!%p4351_p5)
}
  0xff   :  { %s5339_s13 = smov 64  }
 0x100   :  { %198 = dma.hbm_to_vmem [thread:$0]  %s5310_s18, 256, %s193_s24, [#allocation21], %s5339_s13, %s5339_s13, %s4395_s26  }
 0x101   :  { %4377 = dma.done.wait [#allocation3], 256  }
 0x102   :  { %4378 = vsyncadd [#allocation3], 4294967040 }
 0x103   :  { %4379 = dma.done.wait [#allocation6], 144  }
 0x104   :  { %4380 = vsyncadd [#allocation6], 4294967152 }
 0x105   :  { %4381 = dma.done.wait [#allocation9], 160  }
 0x106   :  { %4382 = vsyncadd [#allocation9], 4294967136 }
 0x107   :  { %4383 = dma.done.wait [#allocation12], 64  }
 0x108   :  { %4384 = vsyncadd [#allocation12], 4294967232 }
 0x109   :  { %4385 = dma.done.wait [#allocation15], 64  }
 0x10a   :  { %4386 = vsyncadd [#allocation15], 4294967232 }
 0x10b   :  { %4387 = dma.done.wait [#allocation18], 64  }
 0x10c   :  { %4388 = vsyncadd [#allocation18], 4294967232 }
 0x10d   :  { %4389 = dma.done.wait [#allocation21], 288  }
 0x10e   :  { %4390 = vsyncadd [#allocation21], 4294967008  ;;  %v4412_v0 = vmov 0.0   ;;  %vm4413_vm0 = vmmov 0   ;;  %v3961_v1 = vld [vmem:[#allocation5] sm:$0xff]   ;;  %v245_v2 = vld [vmem:[#allocation2] sm:$0xff] }
 0x10f   :  { %3609 = vmatprep.subr.bf16.mxu1 %v4412_v0  ;;  %3611 = vmatprep.mubr.msk.bf16.mxu1 %vm4413_vm0, %v4412_v0  ;;  %v246_v3 = vld [vmem:[#allocation2 + $0x8] sm:$0xff]  ;;  %vm263_vm1 = vcmask 130048   ;;  %s5340_s21 = sld [smem:[#allocation36_spill]]  ;;  %v3378_v7 = vld [vmem:[#allocation7] ss:$0 sm:$0xff]  ;;  %v308_v11 = vld [vmem:[#allocation8] sm:$0xff] }
 0x110   :  { %3623 = vmatprep.subr.bf16.mxu0 %v4412_v0  ;;  %3625 = vmatprep.mubr.msk.bf16.mxu0 %vm4413_vm0, %v4412_v0  ;;  %v249_v4 = vpack.c.bf16 %v246_v3, %v245_v2  ;;  %vm335_vm2 = vcmask 261120   ;;  %v3381_v18 = vld [vmem:[#allocation10] ss:$0 sm:$0xff]  ;;  %s4414_s9 = smov 96   ;;  %vm392_vm3 = vcmask 64512   ;;  %s4415_s11 = smov 88  }
 0x111   :  { %3610 = vmatpush3.bf16.msra.mxu1 %v3961_v1  ;;  %vm516_vm4 = vcmask 1043456   ;;  %s4416_s27 = smov 120   ;;  %s4417_s2 = smov 56   ;;  %vm1630_vm5 = vcmask 523264   ;;  %vm3216_vm6 = vcmask 1041409   ;;  %vm3311_vm7 = vcmask 392192  }
 0x112   :  { %3615 = vmatprep.subr.bf16.mxu1 %v4412_v0  ;;  %s4418_s22 = smov 112   ;;  %s4419_s4 = smov 80   ;;  %vm3355_vm8 = vcmask 386048  }
 0x113   :  { %s5341_s29 = sld [smem:[#allocation38_spill]]  ;;  %s4420_s15 = smov 48  }
 0x114   :  { %3612 = vmatmul.mubr.msk.bf16.vlgmr.msra.gmra.mrb[0].mxu1 %vm263_vm1, %v249_v4  ;;  %s4421_s3 = smov 72   ;;  %s4422_s8 = smov 104  }
 0x115   :  { %3619 = vmatprep.mubr.msk.bf16.mxu1 %vm4413_vm0, %v4412_v0  ;;  %v3962_v5 = vld [vmem:[%s5340_s21] sm:$0xff]   ;;  %v3963_v6 = vld [vmem:[%s5340_s21 + $0x8] sm:$0xff]   ;;  %s4423_s25 = smov 40  }
 0x116   :  { %3616 = vmatpush3.bf16.msra.mxu1 %v3962_v5 }
 0x117   :  { %3617 = vmatprep.subr.bf16.mxu1 %v4412_v0 }
 0x11a   :  { %3618 = vmatpush3.bf16.msra.mxu1 %v3963_v6 }
 0x11b   :  { %3629 = vmatprep.subr.bf16.mxu1 %v4412_v0 }
 0x1e7   :  { %v301_v8 = vpop.f32.mrb[0].mxu1 }
 0x1e8   :  { %v302_v9 = vadd.f32 %v3378_v7, %v301_v8  ;;  %v3613_v10 = vpop.f32.mrb[1].mxu1 }
 0x1e9   :  { %v304_v12 = vpop.f32.mrb[2].mxu1 }
 0x1ea   :  { %v305_v13 = vadd.f32 %v3378_v7, %v304_v12  ;;  %v3614_v14 = vpop.f32.mrb[3].mxu1  ;;  %v4757_v15 = vadd.f32 %v308_v11, %v302_v9 }
 0x1ec   :  { %v4759_v16 = vadd.f32 %v308_v11, %v305_v13 }
 0x1ee   :  { %v315_v17 = vpack.c.bf16 %v4759_v16, %v4757_v15 }
 0x1f0   :  { %3620 = vmatmul.mubr.msk.bf16.vlgmr.msra.gmra.mrb[4].mxu1 %vm335_vm2, %v315_v17 }
 0x1f1   :  { %3631 = vmatprep.mubr.msk.bf16.mxu1 %vm4413_vm0, %v4412_v0 }
 0x2c3   :  { %v373_v19 = vpop.f32.mrb[4].mxu1 }
 0x2c4   :  { %v374_v20 = vadd.f32 %v3381_v18, %v373_v19  ;;  %v3621_v21 = vpop.f32.mrb[5].mxu1 }
 0x2c5   :  { %v376_v22 = vpop.f32.mrb[6].mxu1 }
 0x2c6   :  { %v4766_v23 = vpack.c.bf16 %v374_v20, %v374_v20  ;;  %v377_v24 = vadd.f32 %v3381_v18, %v376_v22  ;;  %v3622_v25 = vpop.f32.mrb[7].mxu1 }
 0x2c8   :  { %390 = vrot.lane.b32.xlu0 %v4766_v23, %s4414_s9  ;;  %v4770_v26 = vpack.c.bf16 %v377_v24, %v377_v24 }
 0x2cc   :  { %439 = vrot.lane.b32.xlu0 %v4770_v26, %s4414_s9 }
 0x33a   :  { %v391_v27 = vpop.permute.xlu0 %390 }
 0x33b   :  { %v397_v28 = vsel %vm392_vm3, %v391_v27, 0 }
 0x33c   :  { %3624 = vmatpush3.bf16.xpose.msra.mxu0 %v397_v28 }
 0x33d   :  { %3635 = vmatprep.subr.bf16.mxu0 %v4412_v0 }
 0x33e   :  { %v440_v29 = vpop.permute.xlu0 %439 }
 0x33f   :  { %v445_v30 = vsel %vm392_vm3, %v440_v29, 0 }
 0x340   :  { %3630 = vmatpush3.bf16.xpose.msra.mxu1 %v445_v30 }
 0x341   :  { %3641 = vmatprep.subr.bf16.mxu1 %v4412_v0 }
 0x343   :  { %3626 = vmatmul.mubr.msk.bf16.vlgmr.msra.gmra.mrb[0].mxu0 %vm392_vm3, %v4766_v23 }
 0x344   :  { %3637 = vmatprep.mubr.msk.bf16.mxu0 %vm4413_vm0, %v4412_v0 }
 0x347   :  { %3632 = vmatmul.mubr.msk.bf16.vlgmr.msra.gmra.mrb[8].mxu1 %vm392_vm3, %v4770_v26 }
 0x348   :  { %3643 = vmatprep.mubr.msk.bf16.mxu1 %vm4413_vm0, %v4412_v0 }
 0x416   :  { %v433_v31 = vpop.f32.mrb[0].mxu0 }
 0x417   :  { %v3627_v32 = vpop.f32.mrb[1].mxu0  ;;  %v487_v33 = vsel %vm392_vm3, %v433_v31, -inf }
 0x418   :  { %488 = vmax.xlane.f32.xlu1 %v487_v33  ;;  %v436_v34 = vpop.f32.mrb[2].mxu0 }
 0x419   :  { %v3628_v35 = vpop.f32.mrb[3].mxu0 }
 0x41a   :  { %v481_v36 = vpop.f32.mrb[8].mxu1 }
 0x41b   :  { %v3633_v37 = vpop.f32.mrb[9].mxu1  ;;  %v490_v38 = vsel %vm392_vm3, %v481_v36, -inf }
 0x41c   :  { %491 = vmax.xlane.f32.xlu1 %v490_v38  ;;  %v484_v39 = vpop.f32.mrb[10].mxu1 }
 0x41d   :  { %v3634_v40 = vpop.f32.mrb[11].mxu1 }
 0x42d   :  { %511 = vrot.lane.b32.xlu1 %v4766_v23, %s5339_s13 }
 0x431   :  { %560 = vrot.lane.b32.xlu1 %v4770_v26, %s5339_s13 }
 0x435   :  { %611 = vrot.lane.b32.xlu1 %v4766_v23, %s4415_s11 }
 0x4a5   :  { %v489_v41 = vpop.xlane.xlu1 %488 }
 0x4a6   :  { %v493_v42 = vsub.f32 %v433_v31, %v489_v41 }
 0x4a8   :  { %v495_v43 = vmul.f32 1.442695, %v493_v42 }
 0x4a9   :  { %v492_v44 = vpop.xlane.xlu1 %491 }
 0x4aa   :  { %3983 = vpow2.f32 %v495_v43  ;;  %v494_v45 = vsub.f32 %v481_v36, %v492_v44 }
 0x4ac   :  { %v497_v46 = vmul.f32 1.442695, %v494_v45 }
 0x4ad   :  { %v512_v47 = vpop.permute.xlu1 %511 }
 0x4ae   :  { %3985 = vpow2.f32 %v497_v46  ;;  %v518_v48 = vsel %vm516_vm4, %v512_v47, 0  ;;  %v381_v46 = vld [vmem:[%s5341_s29 + $0x4] sm:$0xf] }
 0x4af   :  { %3636 = vmatpush3.bf16.msra.mxu0 %v518_v48 }
 0x4b0   :  { %3647 = vmatprep.subr.bf16.mxu0 %v4412_v0 }
 0x4b1   :  { %v561_v49 = vpop.permute.xlu1 %560 }
 0x4b2   :  { %v566_v50 = vsel %vm516_vm4, %v561_v49, 0  ;;  %v834_v49 = vsel %vm516_vm4, %v381_v46, 0 }
 0x4b3   :  { %3642 = vmatpush3.bf16.msra.mxu1 %v566_v50 }
 0x4b4   :  { %v3984_v51 = vpop.eup %3983  ;;  %3653 = vmatprep.subr.bf16.mxu1 %v4412_v0 }
 0x4b5   :  { %v499_v52 = vsel %vm392_vm3, %v3984_v51, 0.0  ;;  %v612_v55 = vpop.permute.xlu1 %611 }
 0x4b6   :  { %500 = vadd.xlane.f32.xlu0 %v499_v52  ;;  %v617_v62 = vsel %vm392_vm3, %v612_v55, 0 }
 0x4b8   :  { %v3986_v53 = vpop.eup %3985 }
 0x4b9   :  { %v502_v54 = vsel %vm392_vm3, %v3986_v53, 0.0 }
 0x4ba   :  { %503 = vadd.xlane.f32.xlu1 %v502_v54 }
 0x4cb   :  { %661 = vrot.lane.b32.xlu1 %v4770_v26, %s4415_s11 }
 0x4cc   :  { %609 = vrot.lane.b32.xlu0 %v4766_v23, %s4416_s27 }
 0x4cf   :  { %659 = vrot.lane.b32.xlu1 %v4770_v26, %s4416_s27 }
 0x543   :  { %v501_v56 = vpop.xlane.xlu0 %500 }
 0x544   :  { %3987 = vrcp.f32 %v501_v56 }
 0x547   :  { %v504_v57 = vpop.xlane.xlu1 %503  ;;  %v610_v4 = vpop.permute.xlu0 %609 }
 0x548   :  { %3989 = vrcp.f32 %v504_v57 }
 0x54b   :  { %v662_v1 = vpop.permute.xlu1 %661 }
 0x54c   :  { %v667_v3 = vsel %vm392_vm3, %v662_v1, 0 }
 0x54e   :  { %v3988_v58 = vpop.eup %3987 }
 0x54f   :  { %v507_v59 = vmul.f32 %v3988_v58, %v3984_v51  ;;  %v660_v5 = vpop.permute.xlu1 %659  ;;  %v380_v51 = vld [vmem:[%s5341_s29] sm:$0xf] }
 0x550   :  { %v881_v54 = vsel %vm516_vm4, %v380_v51, 0 }
 0x551   :  { %v509_v60 = vpack.c.bf16 %v507_v59, %v507_v59 }
 0x552   :  { %v3990_v61 = vpop.eup %3989 }
 0x553   :  { %v508_v63 = vmul.f32 %v3990_v61, %v3986_v53  ;;  %3638 = vmatmul.mubr.msk.bf16.vlgmr.msra.gmra.mrb[4].mxu0 %vm392_vm3, %v509_v60 }
 0x554   :  { %3648 = vmatpush3.bf16.xpose.msra.mxu0 %v617_v62  ;;  %3649 = vmatprep.mubr.msk.bf16.mxu0 %vm4413_vm0, %v4412_v0 }
 0x555   :  { %v510_v2 = vpack.c.bf16 %v508_v63, %v508_v63  ;;  %3659 = vmatprep.subr.bf16.mxu0 %v4412_v0 }
 0x557   :  { %3644 = vmatmul.mubr.msk.bf16.vlgmr.msra.gmra.mrb[12].mxu1 %vm392_vm3, %v510_v2 }
 0x558   :  { %3654 = vmatpush3.bf16.xpose.msra.mxu1 %v667_v3  ;;  %3655 = vmatprep.mubr.msk.bf16.mxu1 %vm4413_vm0, %v4412_v0 }
 0x559   :  { %3665 = vmatprep.subr.bf16.mxu1 %v4412_v0 }
 0x55b   :  { %3650 = vmatmul.mubr.msk.bf16.vlgmr.msra.gmra.mrb[8].mxu0 %vm392_vm3, %v610_v4 }
 0x55c   :  { %3661 = vmatprep.mubr.msk.bf16.mxu0 %vm4413_vm0, %v4412_v0 }
 0x55f   :  { %3656 = vmatmul.mubr.msk.bf16.vlgmr.msra.gmra.mrb[16].mxu1 %vm392_vm3, %v660_v5 }
 0x560   :  { %3667 = vmatprep.mubr.msk.bf16.mxu1 %vm4413_vm0, %v4412_v0 }
 0x626   :  { %v4822_v6 = vpop.f32.mrb[4].mxu0 }
 0x627   :  { %v3639_v7 = vpop.f32.mrb[5].mxu0 }
 0x628   :  { %v557_v8 = vpop.f32.mrb[6].mxu0 }
 0x629   :  { %v3640_v9 = vpop.f32.mrb[7].mxu0 }
 0x62a   :  { %v4824_v10 = vpop.f32.mrb[12].mxu1 }
 0x62b   :  { %v608_v11 = vpack.c.bf16 %v4824_v10, %v4822_v6  ;;  %v3645_v12 = vpop.f32.mrb[13].mxu1 }
 0x62c   :  { %v605_v13 = vpop.f32.mrb[14].mxu1 }
 0x62d   :  { %v3646_v14 = vpop.f32.mrb[15].mxu1 }
 0x62e   :  { %v653_v17 = vpop.f32.mrb[8].mxu0 }
 0x62f   :  { %v3651_v18 = vpop.f32.mrb[9].mxu0  ;;  %v709_v19 = vsel %vm392_vm3, %v653_v17, -inf }
 0x630   :  { %710 = vmax.xlane.f32.xlu1 %v709_v19  ;;  %v656_v20 = vpop.f32.mrb[10].mxu0 }
 0x631   :  { %v3652_v21 = vpop.f32.mrb[11].mxu0 }
 0x632   :  { %v703_v22 = vpop.f32.mrb[16].mxu1 }
 0x633   :  { %v3657_v24 = vpop.f32.mrb[17].mxu1  ;;  %v712_v25 = vsel %vm392_vm3, %v703_v22, -inf }
 0x634   :  { %713 = vmax.xlane.f32.xlu0 %v712_v25  ;;  %v706_v27 = vpop.f32.mrb[18].mxu1 }
 0x635   :  { %v3658_v28 = vpop.f32.mrb[19].mxu1 }
 0x64a   :  { %781 = vrot.lane.b32.xlu0 %v4770_v26, %s4417_s2 }
 0x64e   :  { %924 = vrot.lane.b32.xlu0 %v4766_v23, %s4418_s22 }
 0x6bd   :  { %v711_v29 = vpop.xlane.xlu1 %710 }
 0x6be   :  { %v715_v30 = vsub.f32 %v653_v17, %v711_v29 }
 0x6c0   :  { %v717_v31 = vmul.f32 1.442695, %v715_v30 }
 0x6c1   :  { %v714_v32 = vpop.xlane.xlu0 %713 }
 0x6c2   :  { %3991 = vpow2.f32 %v717_v31  ;;  %v716_v33 = vsub.f32 %v703_v22, %v714_v32 }
 0x6c4   :  { %v719_v34 = vmul.f32 1.442695, %v716_v33 }
 0x6c5   :  { %v782_v35 = vpop.permute.xlu0 %781 }
 0x6c6   :  { %3993 = vpow2.f32 %v719_v34  ;;  %v787_v36 = vsel %vm516_vm4, %v782_v35, 0 }
 0x6c7   :  { %3666 = vmatpush3.bf16.msra.mxu1 %v787_v36 }
 0x6c8   :  { %3677 = vmatprep.subr.bf16.mxu1 %v4412_v0 }
 0x6c9   :  { %v925_v8 = vpop.permute.xlu0 %924 }
 0x6cc   :  { %v3992_v37 = vpop.eup %3991 }
 0x6cd   :  { %v721_v38 = vsel %vm392_vm3, %v3992_v37, 0.0 }
 0x6ce   :  { %722 = vadd.xlane.f32.xlu1 %v721_v38 }
 0x6d0   :  { %v3994_v39 = vpop.eup %3993 }
 0x6d1   :  { %v724_v40 = vsel %vm392_vm3, %v3994_v39, 0.0 }
 0x6d2   :  { %725 = vadd.xlane.f32.xlu1 %v724_v40 }
 0x6e3   :  { %733 = vrot.lane.b32.xlu1 %v4766_v23, %s4417_s2 }
 0x6e7   :  { %926 = vrot.lane.b32.xlu1 %v4766_v23, %s4419_s4 }
 0x6eb   :  { %976 = vrot.lane.b32.xlu1 %v4770_v26, %s4419_s4 }
 0x6ef   :  { %974 = vrot.lane.b32.xlu1 %v4770_v26, %s4418_s22 }
 0x75b   :  { %v723_v41 = vpop.xlane.xlu1 %722 }
 0x75c   :  { %3995 = vrcp.f32 %v723_v41 }
 0x75f   :  { %v726_v42 = vpop.xlane.xlu1 %725 }
 0x760   :  { %3997 = vrcp.f32 %v726_v42 }
 0x763   :  { %v734_v43 = vpop.permute.xlu1 %733 }
 0x764   :  { %v739_v44 = vsel %vm516_vm4, %v734_v43, 0 }
 0x765   :  { %3660 = vmatpush3.bf16.msra.mxu0 %v739_v44 }
 0x766   :  { %v3996_v45 = vpop.eup %3995  ;;  %3671 = vmatprep.subr.bf16.mxu0 %v4412_v0 }
 0x767   :  { %v729_v47 = vmul.f32 %v3996_v45, %v3992_v37  ;;  %v927_v55 = vpop.permute.xlu1 %926 }
 0x768   :  { %v932_v4 = vsel %vm392_vm3, %v927_v55, 0 }
 0x769   :  { %v731_v48 = vpack.c.bf16 %v729_v47, %v729_v47 }
 0x76a   :  { %v3998_v50 = vpop.eup %3997 }
 0x76b   :  { %v730_v52 = vmul.f32 %v3998_v50, %v3994_v39  ;;  %3662 = vmatmul.mubr.msk.bf16.vlgmr.msra.gmra.mrb[12].mxu0 %vm392_vm3, %v731_v48  ;;  %v977_v56 = vpop.permute.xlu1 %976 }
 0x76c   :  { %3672 = vmatpush3.bf16.msra.mxu0 %v834_v49  ;;  %3673 = vmatprep.mubr.msk.bf16.mxu0 %vm4413_vm0, %v4412_v0  ;;  %v982_v57 = vsel %vm392_vm3, %v977_v56, 0  ;;  %v382_v56 = vld [vmem:[%s5341_s29 + $0x8] sm:$0xf] }
 0x76d   :  { %v732_v53 = vpack.c.bf16 %v730_v52, %v730_v52  ;;  %3683 = vmatprep.subr.bf16.mxu0 %v4412_v0 }
 0x76f   :  { %3668 = vmatmul.mubr.msk.bf16.vlgmr.msra.gmra.mrb[20].mxu1 %vm392_vm3, %v732_v53  ;;  %v975_v58 = vpop.permute.xlu1 %974 }
 0x770   :  { %3678 = vmatpush3.bf16.msra.mxu1 %v881_v54  ;;  %3679 = vmatprep.mubr.msk.bf16.mxu1 %vm4413_vm0, %v4412_v0 }
 0x771   :  { %3689 = vmatprep.subr.bf16.mxu1 %v4412_v0 }
 0x777   :  { %3680 = vmatmul.mubr.msk.bf16.vlgmr.msra.gmra.mrb[24].mxu1 %vm392_vm3, %v608_v11 }
 0x778   :  { %3691 = vmatprep.mubr.msk.bf16.mxu1 %vm4413_vm0, %v4412_v0 }
 0x779   :  { %3690 = vmatpush3.bf16.xpose.msra.mxu1 %v982_v57  ;;  %v1149_v57 = vsel %vm516_vm4, %v382_v56, 0 }
 0x77a   :  { %3701 = vmatprep.subr.bf16.mxu1 %v4412_v0 }
 0x780   :  { %3692 = vmatmul.mubr.msk.bf16.vlgmr.msra.gmra.mrb[28].mxu1 %vm392_vm3, %v975_v58 }
 0x781   :  { %3703 = vmatprep.mubr.msk.bf16.mxu1 %vm4413_vm0, %v4412_v0 }
 0x83e   :  { %v775_v59 = vpop.f32.mrb[12].mxu0 }
 0x83f   :  { %v3663_v60 = vpop.f32.mrb[13].mxu0 }
 0x840   :  { %v778_v61 = vpop.f32.mrb[14].mxu0 }
 0x841   :  { %v3664_v62 = vpop.f32.mrb[15].mxu0 }
 0x842   :  { %v823_v63 = vpop.f32.mrb[20].mxu1 }
 0x843   :  { %v829_v1 = vpack.c.bf16 %v823_v63, %v775_v59  ;;  %v3669_v2 = vpop.f32.mrb[21].mxu1 }
 0x844   :  { %v826_v3 = vpop.f32.mrb[22].mxu1 }
 0x845   :  { %v3670_v5 = vpop.f32.mrb[23].mxu1  ;;  %3674 = vmatmul.mubr.msk.bf16.vlgmr.msra.gmra.mrb[16].mxu0 %vm392_vm3, %v829_v1 }
 0x846   :  { %3684 = vmatpush3.bf16.xpose.msra.mxu0 %v932_v4  ;;  %3685 = vmatprep.mubr.msk.bf16.mxu0 %vm4413_vm0, %v4412_v0 }
 0x847   :  { %3695 = vmatprep.subr.bf16.mxu0 %v4412_v0 }
 0x84a   :  { %v917_v6 = vpop.f32.mrb[24].mxu1 }
 0x84b   :  { %v3681_v7 = vpop.f32.mrb[25].mxu1 }
 0x84c   :  { %v920_v9 = vpop.f32.mrb[26].mxu1 }
 0x84d   :  { %v3682_v10 = vpop.f32.mrb[27].mxu1  ;;  %3686 = vmatmul.mubr.msk.bf16.vlgmr.msra.gmra.mrb[20].mxu0 %vm392_vm3, %v925_v8 }
 0x84e   :  { %3697 = vmatprep.mubr.msk.bf16.mxu0 %vm4413_vm0, %v4412_v0 }
 0x853   :  { %v1018_v11 = vpop.f32.mrb[28].mxu1 }
 0x854   :  { %v3693_v12 = vpop.f32.mrb[29].mxu1  ;;  %v1027_v13 = vsel %vm392_vm3, %v1018_v11, -inf }
 0x855   :  { %1028 = vmax.xlane.f32.xlu1 %v1027_v13  ;;  %v1021_v14 = vpop.f32.mrb[30].mxu1 }
 0x856   :  { %v3694_v17 = vpop.f32.mrb[31].mxu1 }
 0x866   :  { %1048 = vrot.lane.b32.xlu1 %v4766_v23, %s4420_s15 }
 0x86a   :  { %1196 = vrot.lane.b32.xlu1 %v4766_v23, %s4421_s3 }
 0x86e   :  { %1246 = vrot.lane.b32.xlu1 %v4770_v26, %s4421_s3 }
 0x872   :  { %1244 = vrot.lane.b32.xlu1 %v4770_v26, %s4422_s8 }
 0x8e2   :  { %v1029_v18 = vpop.xlane.xlu1 %1028 }
 0x8e3   :  { %v1031_v21 = vsub.f32 %v1018_v11, %v1029_v18 }
 0x8e5   :  { %v1034_v22 = vmul.f32 1.442695, %v1031_v21 }
 0x8e6   :  { %v1049_v19 = vpop.permute.xlu1 %1048 }
 0x8e7   :  { %v1054_v20 = vsel %vm516_vm4, %v1049_v19, 0  ;;  %3999 = vpow2.f32 %v1034_v22 }
 0x8e8   :  { %3696 = vmatpush3.bf16.msra.mxu0 %v1054_v20 }
 0x8e9   :  { %3707 = vmatprep.subr.bf16.mxu0 %v4412_v0 }
 0x8ea   :  { %v1197_v51 = vpop.permute.xlu1 %1196 }
 0x8eb   :  { %v1202_v53 = vsel %vm392_vm3, %v1197_v51, 0 }
 0x8ee   :  { %v1247_v62 = vpop.permute.xlu1 %1246 }
 0x8ef   :  { %v1252_v4 = vsel %vm392_vm3, %v1247_v62, 0 }
 0x8f1   :  { %v4000_v34 = vpop.eup %3999 }
 0x8f2   :  { %v1039_v37 = vsel %vm392_vm3, %v4000_v34, 0.0  ;;  %v1245_v11 = vpop.permute.xlu1 %1244 }
 0x918   :  { %v870_v24 = vpop.f32.mrb[16].mxu0 }
 0x919   :  { %v4894_v25 = vadd.f32 %v917_v6, %v870_v24  ;;  %v3675_v27 = vpop.f32.mrb[17].mxu0 }
 0x91a   :  { %v873_v28 = vpop.f32.mrb[18].mxu0 }
 0x91b   :  { %v4896_v29 = vadd.f32 %v920_v9, %v873_v28  ;;  %v3676_v30 = vpop.f32.mrb[19].mxu0 }
 0x920   :  { %v968_v31 = vpop.f32.mrb[20].mxu0 }
 0x921   :  { %v3687_v32 = vpop.f32.mrb[21].mxu0  ;;  %v1024_v33 = vsel %vm392_vm3, %v968_v31, -inf }
 0x922   :  { %1025 = vmax.xlane.f32.xlu0 %v1024_v33  ;;  %v971_v35 = vpop.f32.mrb[22].mxu0 }
 0x923   :  { %v3688_v36 = vpop.f32.mrb[23].mxu0 }
 0x926   :  { %1040 = vadd.xlane.f32.xlu0 %v1039_v37 }
 0x9af   :  { %v1026_v38 = vpop.xlane.xlu0 %1025 }
 0x9b0   :  { %v1030_v39 = vsub.f32 %v968_v31, %v1026_v38 }
 0x9b2   :  { %v1032_v40 = vmul.f32 1.442695, %v1030_v39 }
 0x9b3   :  { %v1041_v43 = vpop.xlane.xlu0 %1040 }
 0x9b4   :  { %4001 = vpow2.f32 %v1032_v40 }
 0x9b5   :  { %4003 = vrcp.f32 %v1041_v43 }
 0x9be   :  { %v4002_v41 = vpop.eup %4001 }
 0x9bf   :  { %v1036_v42 = vsel %vm392_vm3, %v4002_v41, 0.0  ;;  %v4004_v44 = vpop.eup %4003 }
 0x9c0   :  { %1037 = vadd.xlane.f32.xlu0 %v1036_v42  ;;  %v1045_v46 = vmul.f32 %v4004_v44, %v4000_v34  ;;  %v383_v42 = vld [vmem:[%s5341_s29 + $0xc] sm:$0xf] }
 0x9c1   :  { %v1419_v43 = vsel %vm516_vm4, %v383_v42, 0  ;;  %v3410_v42 = vld [vmem:[#allocation19] ss:$0 sm:$0xff] }
 0x9c2   :  { %v1047_v49 = vpack.c.bf16 %v1045_v46, %v1045_v46 }
 0x9d6   :  { %1096 = vrot.lane.b32.xlu0 %v4770_v26, %s4420_s15 }
 0x9da   :  { %1194 = vrot.lane.b32.xlu0 %v4766_v23, %s4422_s8 }
 0xa4d   :  { %v1038_v45 = vpop.xlane.xlu0 %1037 }
 0xa4e   :  { %4005 = vrcp.f32 %v1038_v45 }
 0xa51   :  { %v1097_v47 = vpop.permute.xlu0 %1096 }
 0xa52   :  { %v1102_v48 = vsel %vm516_vm4, %v1097_v47, 0 }
 0xa53   :  { %3702 = vmatpush3.bf16.msra.mxu1 %v1102_v48 }
 0xa54   :  { %3713 = vmatprep.subr.bf16.mxu1 %v4412_v0 }
 0xa55   :  { %v1195_v55 = vpop.permute.xlu0 %1194 }
 0xa56   :  { %3704 = vmatmul.mubr.msk.bf16.vlgmr.msra.gmra.mrb[32].mxu1 %vm392_vm3, %v1047_v49 }
 0xa57   :  { %3715 = vmatprep.mubr.msk.bf16.mxu1 %vm4413_vm0, %v4412_v0 }
 0xa58   :  { %v4006_v50 = vpop.eup %4005 }
 0xa59   :  { %v1044_v52 = vmul.f32 %v4006_v50, %v4002_v41 }
 0xa5b   :  { %v1046_v54 = vpack.c.bf16 %v1044_v52, %v1044_v52 }
 0xa5c   :  { %3714 = vmatpush3.bf16.xpose.msra.mxu1 %v1202_v53 }
 0xa5d   :  { %3698 = vmatmul.mubr.msk.bf16.vlgmr.msra.gmra.mrb[24].mxu0 %vm392_vm3, %v1046_v54  ;;  %3725 = vmatprep.subr.bf16.mxu1 %v4412_v0 }
 0xa5e   :  { %3709 = vmatprep.mubr.msk.bf16.mxu0 %vm4413_vm0, %v4412_v0  ;;  %3708 = vmatpush3.bf16.msra.mxu0 %v1149_v57 }
 0xa5f   :  { %3719 = vmatprep.subr.bf16.mxu0 %v4412_v0 }
 0xa63   :  { %3716 = vmatmul.mubr.msk.bf16.vlgmr.msra.gmra.mrb[36].mxu1 %vm392_vm3, %v1195_v55 }
 0xa64   :  { %3727 = vmatprep.mubr.msk.bf16.mxu1 %vm4413_vm0, %v4412_v0 }
 0xb29   :  { %v1138_v58 = vpop.f32.mrb[32].mxu1 }
 0xb2a   :  { %v3705_v59 = vpop.f32.mrb[33].mxu1 }
 0xb2b   :  { %v1141_v60 = vpop.f32.mrb[34].mxu1  ;;  %v3407_v59 = vld [vmem:[#allocation11] ss:$0 sm:$0xff] }
 0xb2c   :  { %v3706_v61 = vpop.f32.mrb[35].mxu1 }
 0xb30   :  { %v1090_v63 = vpop.f32.mrb[24].mxu0 }
 0xb31   :  { %v1144_v1 = vpack.c.bf16 %v1138_v58, %v1090_v63  ;;  %v3699_v2 = vpop.f32.mrb[25].mxu0 }
 0xb32   :  { %v1093_v3 = vpop.f32.mrb[26].mxu0 }
 0xb33   :  { %v3700_v5 = vpop.f32.mrb[27].mxu0  ;;  %3710 = vmatmul.mubr.msk.bf16.vlgmr.msra.gmra.mrb[28].mxu0 %vm392_vm3, %v1144_v1 }
 0xb34   :  { %3720 = vmatpush3.bf16.xpose.msra.mxu0 %v1252_v4  ;;  %3721 = vmatprep.mubr.msk.bf16.mxu0 %vm4413_vm0, %v4412_v0 }
 0xb35   :  { %3731 = vmatprep.subr.bf16.mxu0 %v4412_v0 }
 0xb36   :  { %v1238_v6 = vpop.f32.mrb[36].mxu1 }
 0xb37   :  { %v3717_v7 = vpop.f32.mrb[37].mxu1  ;;  %v1294_v8 = vsel %vm392_vm3, %v1238_v6, -inf }
 0xb38   :  { %1295 = vmax.xlane.f32.xlu0 %v1294_v8  ;;  %v1241_v9 = vpop.f32.mrb[38].mxu1 }
 0xb39   :  { %v3718_v10 = vpop.f32.mrb[39].mxu1 }
 0xb3b   :  { %3722 = vmatmul.mubr.msk.bf16.vlgmr.msra.gmra.mrb[32].mxu0 %vm392_vm3, %v1245_v11 }
 0xb3c   :  { %3733 = vmatprep.mubr.msk.bf16.mxu0 %vm4413_vm0, %v4412_v0 }
 0xbc5   :  { %v1296_v12 = vpop.xlane.xlu0 %1295 }
 0xbc6   :  { %v1300_v13 = vsub.f32 %v1238_v6, %v1296_v12 }
 0xbc8   :  { %v1302_v14 = vmul.f32 1.442695, %v1300_v13 }
 0xbca   :  { %4007 = vpow2.f32 %v1302_v14 }
 0xbd4   :  { %v4008_v17 = vpop.eup %4007 }
 0xbd5   :  { %v1306_v18 = vsel %vm392_vm3, %v4008_v17, 0.0 }
 0xbd6   :  { %1307 = vadd.xlane.f32.xlu0 %v1306_v18 }
 0xc06   :  { %v1185_v19 = vpop.f32.mrb[28].mxu0 }
 0xc07   :  { %v1192_v20 = vadd.f32 %v1185_v19, %v4894_v25  ;;  %v3711_v21 = vpop.f32.mrb[29].mxu0  ;;  %v3965_v19 = vld [vmem:[%s5304_s12 + $0x8] sm:$0xff]  }
 0xc08   :  { %v1188_v22 = vpop.f32.mrb[30].mxu0  ;;  %v3967_v21 = vld [vmem:[%s5306_s14 + $0x8] sm:$0xff]  }
 0xc09   :  { %v1193_v24 = vadd.f32 %v1188_v22, %v4896_v29  ;;  %v3712_v27 = vpop.f32.mrb[31].mxu0 }
 0xc0e   :  { %v1288_v28 = vpop.f32.mrb[32].mxu0 }
 0xc0f   :  { %v3723_v30 = vpop.f32.mrb[33].mxu0  ;;  %v1297_v31 = vsel %vm392_vm3, %v1288_v28, -inf }
 0xc10   :  { %1298 = vmax.xlane.f32.xlu1 %v1297_v31  ;;  %v1291_v32 = vpop.f32.mrb[34].mxu0 }
 0xc11   :  { %v3724_v33 = vpop.f32.mrb[35].mxu0 }
 0xc12   :  { %v3408_v33 = vld [vmem:[#allocation13] ss:$0 sm:$0xff] }
 0xc21   :  { %1318 = vrot.lane.b32.xlu1 %v4766_v23, %s4423_s25 }
 0xc63   :  { %v1308_v34 = vpop.xlane.xlu0 %1307 }
 0xc64   :  { %4009 = vrcp.f32 %v1308_v34 }
 0xc6e   :  { %v4010_v35 = vpop.eup %4009 }
 0xc6f   :  { %v1314_v37 = vmul.f32 %v4010_v35, %v4008_v17 }
 0xc71   :  { %v1316_v40 = vpack.c.bf16 %v1314_v37, %v1314_v37  ;;  %v3409_v37 = vld [vmem:[#allocation14] ss:$0 sm:$0xff] }
 0xc9d   :  { %v1299_v25 = vpop.xlane.xlu1 %1298 }
 0xc9e   :  { %v1301_v36 = vsub.f32 %v1288_v28, %v1299_v25 }
 0xca0   :  { %v1304_v38 = vmul.f32 1.442695, %v1301_v36 }
 0xca1   :  { %v1319_v29 = vpop.permute.xlu1 %1318 }
 0xca2   :  { %4011 = vpow2.f32 %v1304_v38  ;;  %v1324_v39 = vsel %vm516_vm4, %v1319_v29, 0 }
 0xca3   :  { %3726 = vmatpush3.bf16.msra.mxu1 %v1324_v39 }
 0xca4   :  { %3737 = vmatprep.subr.bf16.mxu1 %v4412_v0 }
 0xca6   :  { %3728 = vmatmul.mubr.msk.bf16.vlgmr.msra.gmra.mrb[40].mxu1 %vm392_vm3, %v1316_v40 }
 0xca7   :  { %3739 = vmatprep.mubr.msk.bf16.mxu1 %vm4413_vm0, %v4412_v0  ;;  %3738 = vmatpush3.bf16.msra.mxu1 %v1419_v43 }
 0xca8   :  { %3751 = vmatprep.subr.bf16.mxu1 %v4412_v0 }
 0xcac   :  { %v4012_v23 = vpop.eup %4011 }
 0xcad   :  { %v1309_v41 = vsel %vm392_vm3, %v4012_v23, 0.0 }
 0xcae   :  { %1310 = vadd.xlane.f32.xlu0 %v1309_v41  ;;  %v3969_v41 = vld [vmem:[%s5306_s14 + $0x18] sm:$0xff]  }
 0xcc4   :  { %1366 = vrot.lane.b32.xlu0 %v4770_v26, %s4423_s25 }
 0xd3b   :  { %v1311_v44 = vpop.xlane.xlu0 %1310 }
 0xd3c   :  { %4013 = vrcp.f32 %v1311_v44 }
 0xd3f   :  { %v1367_v45 = vpop.permute.xlu0 %1366 }
 0xd40   :  { %v1372_v46 = vsel %vm516_vm4, %v1367_v45, 0 }
 0xd41   :  { %3732 = vmatpush3.bf16.msra.mxu0 %v1372_v46 }
 0xd42   :  { %3743 = vmatprep.subr.bf16.mxu0 %v4412_v0 }
 0xd46   :  { %v4014_v47 = vpop.eup %4013 }
 0xd47   :  { %v1315_v48 = vmul.f32 %v4014_v47, %v4012_v23  ;;  %v3968_v23 = vld [vmem:[%s5306_s14 + $0x10] sm:$0xff]  }
 0xd49   :  { %v1317_v26 = vpack.c.bf16 %v1315_v48, %v1315_v48 }
 0xd4b   :  { %3734 = vmatmul.mubr.msk.bf16.vlgmr.msra.gmra.mrb[36].mxu0 %vm392_vm3, %v1317_v26 }
 0xd4c   :  { %3747 = vmatprep.mubr.msk.bf16.mxu0 %vm4413_vm0, %v4412_v0 }
 0xd79   :  { %v1360_v49 = vpop.f32.mrb[40].mxu1 }
 0xd7a   :  { %v3729_v50 = vpop.f32.mrb[41].mxu1 }
 0xd7b   :  { %v1363_v51 = vpop.f32.mrb[42].mxu1 }
 0xd7c   :  { %v3730_v52 = vpop.f32.mrb[43].mxu1  ;;  %v3414_v51 = vld [vmem:[#allocation20] ss:$0 sm:$0xff] }
 0xe1e   :  { %v1408_v53 = vpop.f32.mrb[36].mxu0 }
 0xe1f   :  { %v1414_v54 = vpack.c.bf16 %v1408_v53, %v1360_v49  ;;  %v3735_v55 = vpop.f32.mrb[37].mxu0 }
 0xe20   :  { %v1411_v56 = vpop.f32.mrb[38].mxu0 }
 0xe21   :  { %v3736_v57 = vpop.f32.mrb[39].mxu0  ;;  %3740 = vmatmul.mubr.msk.bf16.vlgmr.msra.gmra.mrb[44].mxu1 %vm392_vm3, %v1414_v54 }
 0xe22   :  { %3759 = vmatprep.mubr.msk.bf16.mxu1 %vm4413_vm0, %v4412_v0 }
 0xef4   :  { %v1455_v58 = vpop.f32.mrb[44].mxu1 }
 0xef5   :  { %v1462_v60 = vadd.f32 %v1455_v58, %v1192_v20  ;;  %v3741_v61 = vpop.f32.mrb[45].mxu1  ;;  %v3966_v20 = vld [vmem:[%s5306_s14] sm:$0xff]  }
 0xef6   :  { %v1458_v62 = vpop.f32.mrb[46].mxu1  ;;  %3752 = vmatpush3.bf16.msra.mxu1 %v3966_v20 }
 0xef7   :  { %v1471_v63 = vadd.f32 %v3407_v59, %v1462_v60  ;;  %v1463_v1 = vadd.f32 %v1458_v62, %v1193_v24  ;;  %v3742_v2 = vpop.f32.mrb[47].mxu1  ;;  %3753 = vmatprep.subr.bf16.mxu1 %v4412_v0 }
 0xef9   :  { %v1472_v3 = vadd.f32 %v3407_v59, %v1463_v1  ;;  %v1473_v4 = vadd.f32 %v1471_v63, %v4757_v15 }
 0xefa   :  { %3754 = vmatpush3.bf16.msra.mxu1 %v3967_v21 }
 0xefb   :  { %v1477_v5 = vsel %vm335_vm2, %v1473_v4, 0.0  ;;  %v1474_v6 = vadd.f32 %v1472_v3, %v4759_v16  ;;  %v3964_v16 = vld [vmem:[%s5304_s12] sm:$0xff]   ;;  %3755 = vmatprep.subr.bf16.mxu1 %v4412_v0 }
 0xefc   :  { %1478 = vadd.xlane.f32.xlu1 %v1477_v5  ;;  %3744 = vmatpush3.bf16.msra.mxu0 %v3964_v16  ;;  %v3420_v16 = vld [vmem:[#allocation16] ss:$0 sm:$0xff] }
 0xefd   :  { %v1480_v7 = vsel %vm335_vm2, %v1474_v6, 0.0  ;;  %3745 = vmatprep.subr.bf16.mxu0 %v4412_v0 }
 0xefe   :  { %1481 = vadd.xlane.f32.xlu0 %v1480_v7  ;;  %3756 = vmatpush3.bf16.msra.mxu1 %v3968_v23 }
 0xeff   :  { %3757 = vmatprep.subr.bf16.mxu1 %v4412_v0 }
 0xf00   :  { %3746 = vmatpush3.bf16.msra.mxu0 %v3965_v19 }
 0xf01   :  { %3763 = vmatprep.subr.bf16.mxu0 %v4412_v0 }
 0xf02   :  { %3758 = vmatpush3.bf16.msra.mxu1 %v3969_v41 }
 0xf03   :  { %3777 = vmatprep.subr.bf16.mxu1 %v4412_v0 }
 0xf89   :  { %v1479_v8 = vpop.xlane.xlu1 %1478 }
 0xf8a   :  { %v1484_v9 = vmul.f32 0.03125, %v1479_v8 }
 0xf8b   :  { %v1482_v10 = vpop.xlane.xlu0 %1481 }
 0xf8c   :  { %v1486_v11 = vsub.f32 %v1473_v4, %v1484_v9  ;;  %v1485_v12 = vmul.f32 0.03125, %v1482_v10  ;;  %v3970_v9 = vld [vmem:[%s5340_s21 + $0x10] sm:$0xff]   ;;  %v3971_v10 = vld [vmem:[%s5340_s21 + $0x18] sm:$0xff]  }
 0xf8e   :  { %v1487_v13 = vsub.f32 %v1474_v6, %v1485_v12  ;;  %v1488_v14 = vmul.f32 %v1486_v11, %v1486_v11 }
 0xf90   :  { %v1490_v17 = vsel %vm335_vm2, %v1488_v14, 0.0  ;;  %v1489_v18 = vmul.f32 %v1487_v13, %v1487_v13 }
 0xf91   :  { %1491 = vadd.xlane.f32.xlu1 %v1490_v17 }
 0xf92   :  { %v1493_v15 = vsel %vm335_vm2, %v1489_v18, 0.0 }
 0xf93   :  { %1494 = vadd.xlane.f32.xlu0 %v1493_v15 }
0x101e   :  { %v1492_v22 = vpop.xlane.xlu1 %1491 }
0x101f   :  { %v1496_v24 = vmul.f32 0.03125, %v1492_v22 }
0x1020   :  { %v1495_v27 = vpop.xlane.xlu0 %1494 }
0x1021   :  { %v1498_v28 = vadd.f32 1e-05, %v1496_v24  ;;  %v1497_v30 = vmul.f32 0.03125, %v1495_v27  ;;  %v3421_v24 = vld [vmem:[#allocation17] ss:$0 sm:$0xff] }
0x1023   :  { %4015 = vrsqrt.f32 %v1498_v28  ;;  %v1499_v31 = vadd.f32 1e-05, %v1497_v30 }
0x1025   :  { %4017 = vrsqrt.f32 %v1499_v31 }
0x102d   :  { %v4016_v32 = vpop.eup %4015 }
0x102e   :  { %v1502_v34 = vmul.f32 %v4016_v32, %v1486_v11  ;;  %v3426_v32 = vld [vmem:[#allocation10 + $0x1] ss:$0 sm:$0xff] }
0x102f   :  { %v4018_v35 = vpop.eup %4017 }
0x1030   :  { %v1510_v25 = vmul.f32 %v3408_v33, %v1502_v34  ;;  %v1503_v36 = vmul.f32 %v4018_v35, %v1487_v13 }
0x1032   :  { %v1511_v38 = vmul.f32 %v3408_v33, %v1503_v36  ;;  %v1518_v29 = vadd.f32 %v3409_v37, %v1510_v25 }
0x1034   :  { %v1519_v39 = vadd.f32 %v3409_v37, %v1511_v38 }
0x1036   :  { %v1524_v40 = vpack.c.bf16 %v1519_v39, %v1518_v29 }
0x1038   :  { %3748 = vmatmul.mubr.msk.bf16.vlgmr.msra.gmra.mrb[40].mxu0 %vm335_vm2, %v1524_v40 }
0x1039   :  { %3767 = vmatprep.mubr.msk.bf16.mxu0 %vm4413_vm0, %v4412_v0  ;;  %3764 = vmatpush3.bf16.msra.mxu0 %v3970_v9 }
0x103a   :  { %3765 = vmatprep.subr.bf16.mxu0 %v4412_v0 }
0x103d   :  { %3766 = vmatpush3.bf16.msra.mxu0 %v3971_v10 }
0x103e   :  { %3771 = vmatprep.subr.bf16.mxu0 %v4412_v0 }
0x110b   :  { %v1581_v43 = vpop.f32.mrb[40].mxu0 }
0x110c   :  { %v1582_v44 = vadd.f32 %v3410_v42, %v1581_v43  ;;  %v3749_v45 = vpop.f32.mrb[41].mxu0 }
0x110d   :  { %v1584_v46 = vpop.f32.mrb[42].mxu0 }
0x110e   :  { %v1585_v47 = vadd.f32 %v3410_v42, %v1584_v46  ;;  %v3750_v48 = vpop.f32.mrb[43].mxu0  ;;  %v1588_v26 = vmax.f32 %v1582_v44, 0.0 }
0x1110   :  { %v1589_v49 = vmax.f32 %v1585_v47, 0.0 }
0x1112   :  { %v1598_v50 = vpack.c.bf16 %v1589_v49, %v1588_v26 }
0x1114   :  { %3760 = vmatmul.mubr.msk.bf16.vlgmr.msra.gmra.mrb[48].mxu1 %vm1630_vm5, %v1598_v50 }
0x1115   :  { %3779 = vmatprep.mubr.msk.bf16.mxu1 %vm4413_vm0, %v4412_v0 }
0x11e7   :  { %v1668_v52 = vpop.f32.mrb[48].mxu1 }
0x11e8   :  { %v1669_v53 = vadd.f32 %v3414_v51, %v1668_v52  ;;  %v3761_v54 = vpop.f32.mrb[49].mxu1 }
0x11e9   :  { %v1671_v55 = vpop.f32.mrb[50].mxu1 }
0x11ea   :  { %v1672_v56 = vadd.f32 %v3414_v51, %v1671_v55  ;;  %v3762_v57 = vpop.f32.mrb[51].mxu1  ;;  %v1675_v58 = vadd.f32 %v1669_v53, %v1518_v29 }
0x11ec   :  { %v1679_v59 = vsel %vm335_vm2, %v1675_v58, 0.0  ;;  %v1676_v60 = vadd.f32 %v1672_v56, %v1519_v39 }
0x11ed   :  { %1680 = vadd.xlane.f32.xlu1 %v1679_v59 }
0x11ee   :  { %v1682_v61 = vsel %vm335_vm2, %v1676_v60, 0.0 }
0x11ef   :  { %1683 = vadd.xlane.f32.xlu0 %v1682_v61 }
0x127a   :  { %v1681_v62 = vpop.xlane.xlu1 %1680 }
0x127b   :  { %v1685_v63 = vmul.f32 0.03125, %v1681_v62 }
0x127c   :  { %v1684_v1 = vpop.xlane.xlu0 %1683 }
0x127d   :  { %v1687_v2 = vsub.f32 %v1675_v58, %v1685_v63  ;;  %v1686_v3 = vmul.f32 0.03125, %v1684_v1 }
0x127f   :  { %v1688_v4 = vsub.f32 %v1676_v60, %v1686_v3  ;;  %v1689_v5 = vmul.f32 %v1687_v2, %v1687_v2 }
0x1281   :  { %v1691_v6 = vsel %vm335_vm2, %v1689_v5, 0.0  ;;  %v1690_v7 = vmul.f32 %v1688_v4, %v1688_v4 }
0x1282   :  { %1692 = vadd.xlane.f32.xlu1 %v1691_v6 }
0x1283   :  { %v1694_v8 = vsel %vm335_vm2, %v1690_v7, 0.0 }
0x1284   :  { %1695 = vadd.xlane.f32.xlu0 %v1694_v8 }
0x130f   :  { %v1693_v11 = vpop.xlane.xlu1 %1692 }
0x1310   :  { %v1697_v12 = vmul.f32 0.03125, %v1693_v11 }
0x1311   :  { %v1696_v13 = vpop.xlane.xlu0 %1695 }
0x1312   :  { %v1699_v14 = vadd.f32 1e-05, %v1697_v12  ;;  %v1698_v17 = vmul.f32 0.03125, %v1696_v13 }
0x1314   :  { %4019 = vrsqrt.f32 %v1699_v14  ;;  %v1700_v18 = vadd.f32 1e-05, %v1698_v17 }
0x1316   :  { %4021 = vrsqrt.f32 %v1700_v18 }
0x131e   :  { %v4020_v15 = vpop.eup %4019 }
0x131f   :  { %v1703_v19 = vmul.f32 %v4020_v15, %v1687_v2 }
0x1320   :  { %v4022_v20 = vpop.eup %4021 }
0x1321   :  { %v1711_v21 = vmul.f32 %v3420_v16, %v1703_v19  ;;  %v1704_v22 = vmul.f32 %v4022_v20, %v1688_v4 }
0x1323   :  { %v1712_v27 = vmul.f32 %v3420_v16, %v1704_v22  ;;  %v5007_v28 = vadd.f32 %v3421_v24, %v1711_v21 }
0x1325   :  { %v5009_v30 = vadd.f32 %v3421_v24, %v1712_v27 }
0x1327   :  { %v1726_v31 = vpack.c.bf16 %v5009_v30, %v5007_v28 }
0x1329   :  { %3768 = vmatmul.mubr.msk.bf16.vlgmr.msra.gmra.mrb[44].mxu0 %vm335_vm2, %v1726_v31 }
0x132a   :  { %3773 = vmatprep.mubr.msk.bf16.mxu0 %vm4413_vm0, %v4412_v0 }
0x13fc   :  { %v1784_v33 = vpop.f32.mrb[44].mxu0 }
0x13fd   :  { %v1785_v34 = vadd.f32 %v3426_v32, %v1784_v33  ;;  %v3769_v35 = vpop.f32.mrb[45].mxu0 }
0x13fe   :  { %v1787_v25 = vpop.f32.mrb[46].mxu0 }
0x13ff   :  { %v5016_v36 = vpack.c.bf16 %v1785_v34, %v1785_v34  ;;  %v1788_v37 = vadd.f32 %v3426_v32, %v1787_v25  ;;  %v3770_v38 = vpop.f32.mrb[47].mxu0 }
0x1401   :  { %v5018_v29 = vpack.c.bf16 %v1788_v37, %v1788_v37  ;;  %1802 = vrot.lane.b32.xlu1 %v5016_v36, %s4414_s9 }
0x1403   :  { %1850 = vrot.lane.b32.xlu0 %v5018_v29, %s4414_s9 }
0x1473   :  { %v1803_v39 = vpop.permute.xlu1 %1802 }
0x1474   :  { %v1808_v40 = vsel %vm392_vm3, %v1803_v39, 0 }
0x1475   :  { %3772 = vmatpush3.bf16.xpose.msra.mxu0 %v1808_v40  ;;  %v1851_v23 = vpop.permute.xlu0 %1850 }
0x1476   :  { %v1856_v41 = vsel %vm392_vm3, %v1851_v23, 0  ;;  %3783 = vmatprep.subr.bf16.mxu0 %v4412_v0 }
0x1477   :  { %3778 = vmatpush3.bf16.xpose.msra.mxu1 %v1856_v41 }
0x1478   :  { %3789 = vmatprep.subr.bf16.mxu1 %v4412_v0 }
0x147c   :  { %3774 = vmatmul.mubr.msk.bf16.vlgmr.msra.gmra.mrb[48].mxu0 %vm392_vm3, %v5016_v36 }
0x147d   :  { %3785 = vmatprep.mubr.msk.bf16.mxu0 %vm4413_vm0, %v4412_v0 }
0x147e   :  { %3780 = vmatmul.mubr.msk.bf16.vlgmr.msra.gmra.mrb[52].mxu1 %vm392_vm3, %v5018_v29 }
0x147f   :  { %3791 = vmatprep.mubr.msk.bf16.mxu1 %vm4413_vm0, %v4412_v0 }
0x154f   :  { %v1844_v42 = vpop.f32.mrb[48].mxu0 }
0x1550   :  { %v3775_v43 = vpop.f32.mrb[49].mxu0  ;;  %v1898_v44 = vsel %vm392_vm3, %v1844_v42, -inf }
0x1551   :  { %1899 = vmax.xlane.f32.xlu1 %v1898_v44  ;;  %v1847_v45 = vpop.f32.mrb[50].mxu0  ;;  %v1892_v46 = vpop.f32.mrb[52].mxu1 }
0x1552   :  { %v3776_v47 = vpop.f32.mrb[51].mxu0  ;;  %v3781_v48 = vpop.f32.mrb[53].mxu1  ;;  %v1901_v26 = vsel %vm392_vm3, %v1892_v46, -inf }
0x1553   :  { %1902 = vmax.xlane.f32.xlu0 %v1901_v26  ;;  %v1895_v49 = vpop.f32.mrb[54].mxu1 }
0x1554   :  { %v3782_v50 = vpop.f32.mrb[55].mxu1 }
0x1562   :  { %1922 = vrot.lane.b32.xlu1 %v5016_v36, %s5339_s13 }
0x15de   :  { %v1900_v51 = vpop.xlane.xlu1 %1899 }
0x15df   :  { %v1904_v52 = vsub.f32 %v1844_v42, %v1900_v51 }
0x15e0   :  { %v1903_v53 = vpop.xlane.xlu0 %1902 }
0x15e1   :  { %v1906_v54 = vmul.f32 1.442695, %v1904_v52  ;;  %v1905_v55 = vsub.f32 %v1892_v46, %v1903_v53 }
0x15e2   :  { %v1923_v56 = vpop.permute.xlu1 %1922 }
0x15e3   :  { %4023 = vpow2.f32 %v1906_v54  ;;  %v1908_v57 = vmul.f32 1.442695, %v1905_v55  ;;  %v1928_v58 = vsel %vm516_vm4, %v1923_v56, 0  ;;  %v3431_v56 = vld [vmem:[%s5341_s29 + $0x14] sm:$0xf] }
0x15e4   :  { %3784 = vmatpush3.bf16.msra.mxu0 %v1928_v58 }
0x15e5   :  { %4025 = vpow2.f32 %v1908_v57  ;;  %3795 = vmatprep.subr.bf16.mxu0 %v4412_v0 }
0x15ed   :  { %v4024_v59 = vpop.eup %4023 }
0x15ee   :  { %v1910_v60 = vsel %vm392_vm3, %v4024_v59, 0.0 }
0x15ef   :  { %v4026_v61 = vpop.eup %4025  ;;  %1911 = vadd.xlane.f32.xlu1 %v1910_v60 }
0x15f0   :  { %v1913_v62 = vsel %vm392_vm3, %v4026_v61, 0.0 }
0x15f1   :  { %1914 = vadd.xlane.f32.xlu0 %v1913_v62 }
0x1600   :  { %2021 = vrot.lane.b32.xlu1 %v5016_v36, %s4415_s11 }
0x1604   :  { %2071 = vrot.lane.b32.xlu1 %v5018_v29, %s4415_s11 }
0x1607   :  { %1970 = vrot.lane.b32.xlu0 %v5018_v29, %s5339_s13 }
0x1608   :  { %2069 = vrot.lane.b32.xlu1 %v5018_v29, %s4416_s27 }
0x160b   :  { %2019 = vrot.lane.b32.xlu0 %v5016_v36, %s4416_s27  ;;  %s5342_s27 = sld [smem:[#allocation39_spill]] }
0x167c   :  { %v1912_v63 = vpop.xlane.xlu1 %1911 }
0x167d   :  { %4027 = vrcp.f32 %v1912_v63 }
0x167e   :  { %v1915_v1 = vpop.xlane.xlu0 %1914 }
0x167f   :  { %4029 = vrcp.f32 %v1915_v1 }
0x1680   :  { %v2022_v4 = vpop.permute.xlu1 %2021 }
0x1681   :  { %v2027_v11 = vsel %vm392_vm3, %v2022_v4, 0 }
0x1682   :  { %v1971_v2 = vpop.permute.xlu0 %1970 }
0x1683   :  { %v1976_v3 = vsel %vm516_vm4, %v1971_v2, 0 }
0x1684   :  { %3790 = vmatpush3.bf16.msra.mxu1 %v1976_v3  ;;  %v2072_v10 = vpop.permute.xlu1 %2071 }
0x1685   :  { %3801 = vmatprep.subr.bf16.mxu1 %v4412_v0  ;;  %v2077_v13 = vsel %vm392_vm3, %v2072_v10, 0 }
0x1686   :  { %v2020_v14 = vpop.permute.xlu0 %2019 }
0x1687   :  { %v4028_v5 = vpop.eup %4027 }
0x1688   :  { %v1918_v6 = vmul.f32 %v4028_v5, %v4024_v59  ;;  %v2070_v17 = vpop.permute.xlu1 %2069  ;;  %v2244_v59 = vsel %vm516_vm4, %v3431_v56, 0 }
0x1689   :  { %v4030_v7 = vpop.eup %4029 }
0x168a   :  { %v1919_v8 = vmul.f32 %v4030_v7, %v4026_v61  ;;  %v1920_v9 = vpack.c.bf16 %v1918_v6, %v1918_v6  ;;  %v3430_v61 = vld [vmem:[%s5341_s29 + $0x10] sm:$0xf] }
0x168b   :  { %v2291_v1 = vsel %vm516_vm4, %v3430_v61, 0 }
0x168c   :  { %3786 = vmatmul.mubr.msk.bf16.vlgmr.msra.gmra.mrb[52].mxu0 %vm392_vm3, %v1920_v9  ;;  %v1921_v12 = vpack.c.bf16 %v1919_v8, %v1919_v8 }
0x168d   :  { %3796 = vmatpush3.bf16.xpose.msra.mxu0 %v2027_v11  ;;  %3797 = vmatprep.mubr.msk.bf16.mxu0 %vm4413_vm0, %v4412_v0 }
0x168e   :  { %3792 = vmatmul.mubr.msk.bf16.vlgmr.msra.gmra.mrb[56].mxu1 %vm392_vm3, %v1921_v12  ;;  %3807 = vmatprep.subr.bf16.mxu0 %v4412_v0 }
0x168f   :  { %3802 = vmatpush3.bf16.xpose.msra.mxu1 %v2077_v13  ;;  %3803 = vmatprep.mubr.msk.bf16.mxu1 %vm4413_vm0, %v4412_v0 }
0x1690   :  { %3813 = vmatprep.subr.bf16.mxu1 %v4412_v0 }
0x1694   :  { %3798 = vmatmul.mubr.msk.bf16.vlgmr.msra.gmra.mrb[56].mxu0 %vm392_vm3, %v2020_v14 }
0x1695   :  { %3809 = vmatprep.mubr.msk.bf16.mxu0 %vm4413_vm0, %v4412_v0 }
0x1696   :  { %3804 = vmatmul.mubr.msk.bf16.vlgmr.msra.gmra.mrb[60].mxu1 %vm392_vm3, %v2070_v17 }
0x1697   :  { %3815 = vmatprep.mubr.msk.bf16.mxu1 %vm4413_vm0, %v4412_v0 }
0x175f   :  { %v5072_v18 = vpop.f32.mrb[52].mxu0 }
0x1760   :  { %v3787_v15 = vpop.f32.mrb[53].mxu0 }
0x1761   :  { %v1967_v16 = vpop.f32.mrb[54].mxu0  ;;  %v5074_v19 = vpop.f32.mrb[56].mxu1 }
0x1762   :  { %v2018_v20 = vpack.c.bf16 %v5074_v19, %v5072_v18  ;;  %v3788_v21 = vpop.f32.mrb[55].mxu0  ;;  %v3793_v22 = vpop.f32.mrb[57].mxu1 }
0x1763   :  { %v2015_v24 = vpop.f32.mrb[58].mxu1 }
0x1764   :  { %v3794_v27 = vpop.f32.mrb[59].mxu1 }
0x1767   :  { %v2063_v31 = vpop.f32.mrb[56].mxu0 }
0x1768   :  { %v3799_v32 = vpop.f32.mrb[57].mxu0  ;;  %v2119_v33 = vsel %vm392_vm3, %v2063_v31, -inf }
0x1769   :  { %2120 = vmax.xlane.f32.xlu0 %v2119_v33  ;;  %v2066_v34 = vpop.f32.mrb[58].mxu0  ;;  %v2113_v35 = vpop.f32.mrb[60].mxu1 }
0x176a   :  { %v3800_v25 = vpop.f32.mrb[59].mxu0  ;;  %v3805_v37 = vpop.f32.mrb[61].mxu1  ;;  %v2122_v38 = vsel %vm392_vm3, %v2113_v35, -inf }
0x176b   :  { %2123 = vmax.xlane.f32.xlu1 %v2122_v38  ;;  %v2116_v39 = vpop.f32.mrb[62].mxu1 }
0x176c   :  { %v3806_v40 = vpop.f32.mrb[63].mxu1 }
0x177c   :  { %2143 = vrot.lane.b32.xlu1 %v5016_v36, %s4417_s2 }
0x1780   :  { %2336 = vrot.lane.b32.xlu1 %v5016_v36, %s4419_s4 }
0x1784   :  { %2386 = vrot.lane.b32.xlu1 %v5018_v29, %s4419_s4 }
0x1788   :  { %2384 = vrot.lane.b32.xlu1 %v5018_v29, %s4418_s22 }
0x17f6   :  { %v2121_v23 = vpop.xlane.xlu0 %2120 }
0x17f7   :  { %v2125_v41 = vsub.f32 %v2063_v31, %v2121_v23 }
0x17f8   :  { %v2124_v42 = vpop.xlane.xlu1 %2123 }
0x17f9   :  { %v2127_v43 = vmul.f32 1.442695, %v2125_v41  ;;  %v2126_v44 = vsub.f32 %v2113_v35, %v2124_v42 }
0x17fb   :  { %4031 = vpow2.f32 %v2127_v43  ;;  %v2129_v45 = vmul.f32 1.442695, %v2126_v44 }
0x17fc   :  { %v2144_v46 = vpop.permute.xlu1 %2143 }
0x17fd   :  { %4033 = vpow2.f32 %v2129_v45  ;;  %v2149_v47 = vsel %vm516_vm4, %v2144_v46, 0 }
0x17fe   :  { %3808 = vmatpush3.bf16.msra.mxu0 %v2149_v47 }
0x17ff   :  { %3819 = vmatprep.subr.bf16.mxu0 %v4412_v0 }
0x1800   :  { %v2337_v2 = vpop.permute.xlu1 %2336 }
0x1801   :  { %v2342_v14 = vsel %vm392_vm3, %v2337_v2, 0 }
0x1804   :  { %v2387_v3 = vpop.permute.xlu1 %2386 }
0x1805   :  { %v4032_v48 = vpop.eup %4031  ;;  %v2392_v4 = vsel %vm392_vm3, %v2387_v3, 0  ;;  %v3432_v3 = vld [vmem:[%s5341_s29 + $0x18] sm:$0xf] }
0x1806   :  { %v2131_v26 = vsel %vm392_vm3, %v4032_v48, 0.0 }
0x1807   :  { %v4034_v49 = vpop.eup %4033  ;;  %2132 = vadd.xlane.f32.xlu0 %v2131_v26 }
0x1808   :  { %v2134_v50 = vsel %vm392_vm3, %v4034_v49, 0.0  ;;  %v2385_v5 = vpop.permute.xlu1 %2384 }
0x180b   :  { %2135 = vadd.xlane.f32.xlu0 %v2134_v50 }
0x1821   :  { %2191 = vrot.lane.b32.xlu0 %v5018_v29, %s4417_s2  ;;  %s4424_s2 = smov [#allocation23]  }
0x1825   :  { %2334 = vrot.lane.b32.xlu0 %v5016_v36, %s4418_s22 }
0x1894   :  { %v2133_v51 = vpop.xlane.xlu0 %2132 }
0x1895   :  { %4035 = vrcp.f32 %v2133_v51 }
0x1898   :  { %v2136_v52 = vpop.xlane.xlu0 %2135 }
0x1899   :  { %4037 = vrcp.f32 %v2136_v52 }
0x189c   :  { %v2192_v53 = vpop.permute.xlu0 %2191 }
0x189d   :  { %v2197_v54 = vsel %vm516_vm4, %v2192_v53, 0 }
0x189e   :  { %3814 = vmatpush3.bf16.msra.mxu1 %v2197_v54 }
0x189f   :  { %v4036_v55 = vpop.eup %4035  ;;  %3825 = vmatprep.subr.bf16.mxu1 %v4412_v0 }
0x18a0   :  { %v2139_v57 = vmul.f32 %v4036_v55, %v4032_v48  ;;  %v2335_v16 = vpop.permute.xlu0 %2334 }
0x18a2   :  { %v2141_v58 = vpack.c.bf16 %v2139_v57, %v2139_v57 }
0x18a3   :  { %v4038_v60 = vpop.eup %4037 }
0x18a4   :  { %v2140_v62 = vmul.f32 %v4038_v60, %v4034_v49  ;;  %3810 = vmatmul.mubr.msk.bf16.vlgmr.msra.gmra.mrb[60].mxu0 %vm392_vm3, %v2141_v58 }
0x18a5   :  { %3820 = vmatpush3.bf16.msra.mxu0 %v2244_v59  ;;  %3821 = vmatprep.mubr.msk.bf16.mxu0 %vm4413_vm0, %v4412_v0 }
0x18a6   :  { %v2142_v63 = vpack.c.bf16 %v2140_v62, %v2140_v62  ;;  %3831 = vmatprep.subr.bf16.mxu0 %v4412_v0 }
0x18a8   :  { %3816 = vmatmul.mubr.msk.bf16.vlgmr.msra.gmra.mrb[64].mxu1 %vm392_vm3, %v2142_v63 }
0x18a9   :  { %3826 = vmatpush3.bf16.msra.mxu1 %v2291_v1  ;;  %3827 = vmatprep.mubr.msk.bf16.mxu1 %vm4413_vm0, %v4412_v0 }
0x18aa   :  { %3837 = vmatprep.subr.bf16.mxu1 %v4412_v0 }
0x18b0   :  { %3828 = vmatmul.mubr.msk.bf16.vlgmr.msra.gmra.mrb[68].mxu1 %vm392_vm3, %v2018_v20 }
0x18b1   :  { %3839 = vmatprep.mubr.msk.bf16.mxu1 %vm4413_vm0, %v4412_v0 }
0x18b2   :  { %3838 = vmatpush3.bf16.xpose.msra.mxu1 %v2392_v4  ;;  %v2559_v4 = vsel %vm516_vm4, %v3432_v3, 0 }
0x18b3   :  { %3849 = vmatprep.subr.bf16.mxu1 %v4412_v0 }
0x18b9   :  { %3840 = vmatmul.mubr.msk.bf16.vlgmr.msra.gmra.mrb[72].mxu1 %vm392_vm3, %v2385_v5 }
0x18ba   :  { %3851 = vmatprep.mubr.msk.bf16.mxu1 %vm4413_vm0, %v4412_v0 }
0x1977   :  { %v2185_v6 = vpop.f32.mrb[60].mxu0 }
0x1978   :  { %v3811_v7 = vpop.f32.mrb[61].mxu0 }
0x1979   :  { %v2188_v8 = vpop.f32.mrb[62].mxu0 }
0x197a   :  { %v3812_v9 = vpop.f32.mrb[63].mxu0 }
0x197b   :  { %v2233_v10 = vpop.f32.mrb[64].mxu1 }
0x197c   :  { %v2239_v11 = vpack.c.bf16 %v2233_v10, %v2185_v6  ;;  %v3817_v12 = vpop.f32.mrb[65].mxu1 }
0x197d   :  { %v2236_v13 = vpop.f32.mrb[66].mxu1 }
0x197e   :  { %v3818_v17 = vpop.f32.mrb[67].mxu1  ;;  %3822 = vmatmul.mubr.msk.bf16.vlgmr.msra.gmra.mrb[64].mxu0 %vm392_vm3, %v2239_v11 }
0x197f   :  { %3832 = vmatpush3.bf16.xpose.msra.mxu0 %v2342_v14  ;;  %3833 = vmatprep.mubr.msk.bf16.mxu0 %vm4413_vm0, %v4412_v0 }
0x1980   :  { %3843 = vmatprep.subr.bf16.mxu0 %v4412_v0 }
0x1983   :  { %v2327_v18 = vpop.f32.mrb[68].mxu1 }
0x1984   :  { %v3829_v15 = vpop.f32.mrb[69].mxu1 }
0x1985   :  { %v2330_v19 = vpop.f32.mrb[70].mxu1 }
0x1986   :  { %v3830_v20 = vpop.f32.mrb[71].mxu1  ;;  %3834 = vmatmul.mubr.msk.bf16.vlgmr.msra.gmra.mrb[68].mxu0 %vm392_vm3, %v2335_v16 }
0x1987   :  { %3845 = vmatprep.mubr.msk.bf16.mxu0 %vm4413_vm0, %v4412_v0 }
0x198c   :  { %v2428_v21 = vpop.f32.mrb[72].mxu1 }
0x198d   :  { %v3841_v22 = vpop.f32.mrb[73].mxu1  ;;  %v2437_v24 = vsel %vm392_vm3, %v2428_v21, -inf }
0x198e   :  { %2438 = vmax.xlane.f32.xlu1 %v2437_v24  ;;  %v2431_v27 = vpop.f32.mrb[74].mxu1 }
0x198f   :  { %v3842_v31 = vpop.f32.mrb[75].mxu1 }
0x199f   :  { %2458 = vrot.lane.b32.xlu1 %v5016_v36, %s4420_s15 }
0x19a3   :  { %2606 = vrot.lane.b32.xlu1 %v5016_v36, %s4421_s3 }
0x19a7   :  { %2656 = vrot.lane.b32.xlu1 %v5018_v29, %s4421_s3 }
0x19ab   :  { %2654 = vrot.lane.b32.xlu1 %v5018_v29, %s4422_s8 }
0x1a1b   :  { %v2439_v32 = vpop.xlane.xlu1 %2438 }
0x1a1c   :  { %v2441_v35 = vsub.f32 %v2428_v21, %v2439_v32 }
0x1a1e   :  { %v2444_v25 = vmul.f32 1.442695, %v2441_v35 }
0x1a1f   :  { %v2459_v33 = vpop.permute.xlu1 %2458 }
0x1a20   :  { %v2464_v34 = vsel %vm516_vm4, %v2459_v33, 0  ;;  %4039 = vpow2.f32 %v2444_v25 }
0x1a21   :  { %3844 = vmatpush3.bf16.msra.mxu0 %v2464_v34 }
0x1a22   :  { %3855 = vmatprep.subr.bf16.mxu0 %v4412_v0 }
0x1a23   :  { %v2607_v61 = vpop.permute.xlu1 %2606 }
0x1a24   :  { %v2612_v63 = vsel %vm392_vm3, %v2607_v61, 0 }
0x1a27   :  { %v2657_v9 = vpop.permute.xlu1 %2656 }
0x1a28   :  { %v2662_v14 = vsel %vm392_vm3, %v2657_v9, 0 }
0x1a2a   :  { %v4040_v45 = vpop.eup %4039 }
0x1a2b   :  { %v2449_v48 = vsel %vm392_vm3, %v4040_v45, 0.0  ;;  %v2655_v21 = vpop.permute.xlu1 %2654 }
0x1a51   :  { %v2280_v37 = vpop.f32.mrb[64].mxu0 }
0x1a52   :  { %v5144_v38 = vadd.f32 %v2327_v18, %v2280_v37  ;;  %v3823_v39 = vpop.f32.mrb[65].mxu0 }
0x1a53   :  { %v2283_v40 = vpop.f32.mrb[66].mxu0 }
0x1a54   :  { %v5146_v23 = vadd.f32 %v2330_v19, %v2283_v40  ;;  %v3824_v41 = vpop.f32.mrb[67].mxu0 }
0x1a59   :  { %v2378_v42 = vpop.f32.mrb[68].mxu0 }
0x1a5a   :  { %v3835_v43 = vpop.f32.mrb[69].mxu0  ;;  %v2434_v44 = vsel %vm392_vm3, %v2378_v42, -inf }
0x1a5b   :  { %2435 = vmax.xlane.f32.xlu0 %v2434_v44  ;;  %v2381_v46 = vpop.f32.mrb[70].mxu0 }
0x1a5c   :  { %v3836_v47 = vpop.f32.mrb[71].mxu0 }
0x1a5f   :  { %2450 = vadd.xlane.f32.xlu0 %v2449_v48 }
0x1ae8   :  { %v2436_v26 = vpop.xlane.xlu0 %2435 }
0x1ae9   :  { %v2440_v49 = vsub.f32 %v2378_v42, %v2436_v26 }
0x1aeb   :  { %v2442_v50 = vmul.f32 1.442695, %v2440_v49 }
0x1aec   :  { %v2451_v53 = vpop.xlane.xlu0 %2450 }
0x1aed   :  { %4041 = vpow2.f32 %v2442_v50 }
0x1aee   :  { %4043 = vrcp.f32 %v2451_v53 }
0x1af7   :  { %v4042_v51 = vpop.eup %4041 }
0x1af8   :  { %v2446_v52 = vsel %vm392_vm3, %v4042_v51, 0.0  ;;  %v4044_v54 = vpop.eup %4043 }
0x1af9   :  { %2447 = vadd.xlane.f32.xlu0 %v2446_v52  ;;  %v2455_v56 = vmul.f32 %v4044_v54, %v4040_v45  ;;  %v3433_v52 = vld [vmem:[%s5341_s29 + $0x1c] sm:$0xf] }
0x1afa   :  { %v2829_v53 = vsel %vm516_vm4, %v3433_v52, 0  ;;  %v3463_v52 = vld [vmem:[#allocation19 + $0x1] ss:$0 sm:$0xff] }
0x1afb   :  { %v2457_v59 = vpack.c.bf16 %v2455_v56, %v2455_v56 }
0x1b0f   :  { %2506 = vrot.lane.b32.xlu0 %v5018_v29, %s4420_s15 }
0x1b13   :  { %2604 = vrot.lane.b32.xlu0 %v5016_v36, %s4422_s8 }
0x1b86   :  { %v2448_v55 = vpop.xlane.xlu0 %2447 }
0x1b87   :  { %4045 = vrcp.f32 %v2448_v55 }
0x1b8a   :  { %v2507_v57 = vpop.permute.xlu0 %2506 }
0x1b8b   :  { %v2512_v58 = vsel %vm516_vm4, %v2507_v57, 0 }
0x1b8c   :  { %3850 = vmatpush3.bf16.msra.mxu1 %v2512_v58 }
0x1b8d   :  { %3861 = vmatprep.subr.bf16.mxu1 %v4412_v0 }
0x1b8e   :  { %v2605_v2 = vpop.permute.xlu0 %2604 }
0x1b8f   :  { %3852 = vmatmul.mubr.msk.bf16.vlgmr.msra.gmra.mrb[76].mxu1 %vm392_vm3, %v2457_v59 }
0x1b90   :  { %3863 = vmatprep.mubr.msk.bf16.mxu1 %vm4413_vm0, %v4412_v0 }
0x1b91   :  { %v4046_v60 = vpop.eup %4045 }
0x1b92   :  { %v2454_v62 = vmul.f32 %v4046_v60, %v4042_v51 }
0x1b94   :  { %v2456_v1 = vpack.c.bf16 %v2454_v62, %v2454_v62 }
0x1b95   :  { %3862 = vmatpush3.bf16.xpose.msra.mxu1 %v2612_v63 }
0x1b96   :  { %3846 = vmatmul.mubr.msk.bf16.vlgmr.msra.gmra.mrb[72].mxu0 %vm392_vm3, %v2456_v1  ;;  %3873 = vmatprep.subr.bf16.mxu1 %v4412_v0 }
0x1b97   :  { %3857 = vmatprep.mubr.msk.bf16.mxu0 %vm4413_vm0, %v4412_v0  ;;  %3856 = vmatpush3.bf16.msra.mxu0 %v2559_v4 }
0x1b98   :  { %3867 = vmatprep.subr.bf16.mxu0 %v4412_v0 }
0x1b9c   :  { %3864 = vmatmul.mubr.msk.bf16.vlgmr.msra.gmra.mrb[80].mxu1 %vm392_vm3, %v2605_v2 }
0x1b9d   :  { %3875 = vmatprep.mubr.msk.bf16.mxu1 %vm4413_vm0, %v4412_v0 }
0x1c62   :  { %v2548_v5 = vpop.f32.mrb[76].mxu1 }
0x1c63   :  { %v3853_v6 = vpop.f32.mrb[77].mxu1 }
0x1c64   :  { %v2551_v7 = vpop.f32.mrb[78].mxu1  ;;  %v3456_v6 = vld [vmem:[#allocation11 + $0x1] ss:$0 sm:$0xff] }
0x1c65   :  { %v3854_v8 = vpop.f32.mrb[79].mxu1 }
0x1c69   :  { %v2500_v10 = vpop.f32.mrb[72].mxu0 }
0x1c6a   :  { %v2554_v11 = vpack.c.bf16 %v2548_v5, %v2500_v10  ;;  %v3847_v12 = vpop.f32.mrb[73].mxu0 }
0x1c6b   :  { %v2503_v13 = vpop.f32.mrb[74].mxu0 }
0x1c6c   :  { %v3848_v17 = vpop.f32.mrb[75].mxu0  ;;  %3858 = vmatmul.mubr.msk.bf16.vlgmr.msra.gmra.mrb[76].mxu0 %vm392_vm3, %v2554_v11 }
0x1c6d   :  { %3868 = vmatpush3.bf16.xpose.msra.mxu0 %v2662_v14  ;;  %3869 = vmatprep.mubr.msk.bf16.mxu0 %vm4413_vm0, %v4412_v0 }
0x1c6e   :  { %3879 = vmatprep.subr.bf16.mxu0 %v4412_v0 }
0x1c6f   :  { %v2648_v18 = vpop.f32.mrb[80].mxu1 }
0x1c70   :  { %v3865_v15 = vpop.f32.mrb[81].mxu1  ;;  %v2704_v16 = vsel %vm392_vm3, %v2648_v18, -inf }
0x1c71   :  { %2705 = vmax.xlane.f32.xlu0 %v2704_v16  ;;  %v2651_v19 = vpop.f32.mrb[82].mxu1 }
0x1c72   :  { %v3866_v20 = vpop.f32.mrb[83].mxu1 }
0x1c74   :  { %3870 = vmatmul.mubr.msk.bf16.vlgmr.msra.gmra.mrb[80].mxu0 %vm392_vm3, %v2655_v21 }
0x1c75   :  { %3881 = vmatprep.mubr.msk.bf16.mxu0 %vm4413_vm0, %v4412_v0 }
0x1cfe   :  { %v2706_v22 = vpop.xlane.xlu0 %2705 }
0x1cff   :  { %v2710_v24 = vsub.f32 %v2648_v18, %v2706_v22 }
0x1d01   :  { %v2712_v27 = vmul.f32 1.442695, %v2710_v24 }
0x1d03   :  { %4047 = vpow2.f32 %v2712_v27 }
0x1d0d   :  { %v4048_v31 = vpop.eup %4047 }
0x1d0e   :  { %v2716_v32 = vsel %vm392_vm3, %v4048_v31, 0.0 }
0x1d0f   :  { %2717 = vadd.xlane.f32.xlu0 %v2716_v32 }
0x1d3f   :  { %v2595_v33 = vpop.f32.mrb[76].mxu0 }
0x1d40   :  { %v2602_v34 = vadd.f32 %v2595_v33, %v5144_v38  ;;  %v3859_v35 = vpop.f32.mrb[77].mxu0  ;;  %v3973_v33 = vld [vmem:[%s5304_s12 + $0x18] sm:$0xff]  }
0x1d41   :  { %v2598_v25 = vpop.f32.mrb[78].mxu0  ;;  %v3975_v35 = vld [vmem:[%s5306_s14 + $0x28] sm:$0xff]  }
0x1d42   :  { %v2603_v37 = vadd.f32 %v2598_v25, %v5146_v23  ;;  %v3860_v39 = vpop.f32.mrb[79].mxu0 }
0x1d47   :  { %v2698_v40 = vpop.f32.mrb[80].mxu0 }
0x1d48   :  { %v3871_v41 = vpop.f32.mrb[81].mxu0  ;;  %v2707_v42 = vsel %vm392_vm3, %v2698_v40, -inf }
0x1d49   :  { %2708 = vmax.xlane.f32.xlu1 %v2707_v42  ;;  %v2701_v43 = vpop.f32.mrb[82].mxu0 }
0x1d4a   :  { %v3872_v44 = vpop.f32.mrb[83].mxu0 }
0x1d4b   :  { %v3457_v44 = vld [vmem:[#allocation13 + $0x1] ss:$0 sm:$0xff] }
0x1d5a   :  { %2728 = vrot.lane.b32.xlu1 %v5016_v36, %s4423_s25 }
0x1d9c   :  { %v2718_v45 = vpop.xlane.xlu0 %2717 }
0x1d9d   :  { %4049 = vrcp.f32 %v2718_v45 }
0x1da7   :  { %v4050_v46 = vpop.eup %4049 }
0x1da8   :  { %v2724_v48 = vmul.f32 %v4050_v46, %v4048_v31 }
0x1daa   :  { %v2726_v50 = vpack.c.bf16 %v2724_v48, %v2724_v48  ;;  %v3458_v48 = vld [vmem:[#allocation14 + $0x1] ss:$0 sm:$0xff] }
0x1dd6   :  { %v2709_v47 = vpop.xlane.xlu1 %2708 }
0x1dd7   :  { %v2711_v38 = vsub.f32 %v2698_v40, %v2709_v47 }
0x1dd9   :  { %v2714_v26 = vmul.f32 1.442695, %v2711_v38 }
0x1dda   :  { %v2729_v49 = vpop.permute.xlu1 %2728 }
0x1ddb   :  { %4051 = vpow2.f32 %v2714_v26  ;;  %v2734_v23 = vsel %vm516_vm4, %v2729_v49, 0 }
0x1ddc   :  { %3874 = vmatpush3.bf16.msra.mxu1 %v2734_v23 }
0x1ddd   :  { %3885 = vmatprep.subr.bf16.mxu1 %v4412_v0 }
0x1ddf   :  { %3876 = vmatmul.mubr.msk.bf16.vlgmr.msra.gmra.mrb[84].mxu1 %vm392_vm3, %v2726_v50 }
0x1de0   :  { %3887 = vmatprep.mubr.msk.bf16.mxu1 %vm4413_vm0, %v4412_v0  ;;  %3886 = vmatpush3.bf16.msra.mxu1 %v2829_v53 }
0x1de1   :  { %3899 = vmatprep.subr.bf16.mxu1 %v4412_v0 }
0x1de5   :  { %v4052_v36 = vpop.eup %4051 }
0x1de6   :  { %v2719_v51 = vsel %vm392_vm3, %v4052_v36, 0.0 }
0x1de7   :  { %2720 = vadd.xlane.f32.xlu0 %v2719_v51  ;;  %v3977_v51 = vld [vmem:[%s5306_s14 + $0x38] sm:$0xff]  }
0x1dfd   :  { %2776 = vrot.lane.b32.xlu0 %v5018_v29, %s4423_s25 }
0x1e74   :  { %v2721_v54 = vpop.xlane.xlu0 %2720 }
0x1e75   :  { %4053 = vrcp.f32 %v2721_v54 }
0x1e78   :  { %v2777_v55 = vpop.permute.xlu0 %2776 }
0x1e79   :  { %v2782_v56 = vsel %vm516_vm4, %v2777_v55, 0 }
0x1e7a   :  { %3880 = vmatpush3.bf16.msra.mxu0 %v2782_v56 }
0x1e7b   :  { %3891 = vmatprep.subr.bf16.mxu0 %v4412_v0 }
0x1e7f   :  { %v4054_v57 = vpop.eup %4053 }
0x1e80   :  { %v2725_v58 = vmul.f32 %v4054_v57, %v4052_v36  ;;  %v3976_v36 = vld [vmem:[%s5306_s14 + $0x30] sm:$0xff]  }
0x1e82   :  { %v2727_v29 = vpack.c.bf16 %v2725_v58, %v2725_v58 }
0x1e84   :  { %3882 = vmatmul.mubr.msk.bf16.vlgmr.msra.gmra.mrb[84].mxu0 %vm392_vm3, %v2727_v29 }
0x1e85   :  { %3895 = vmatprep.mubr.msk.bf16.mxu0 %vm4413_vm0, %v4412_v0 }
0x1eb2   :  { %v2770_v59 = vpop.f32.mrb[84].mxu1 }
0x1eb3   :  { %v3877_v60 = vpop.f32.mrb[85].mxu1 }
0x1eb4   :  { %v2773_v61 = vpop.f32.mrb[86].mxu1 }
0x1eb5   :  { %v3878_v62 = vpop.f32.mrb[87].mxu1  ;;  %v3475_v61 = vld [vmem:[#allocation20 + $0x1] ss:$0 sm:$0xff] }
0x1f57   :  { %v2818_v63 = vpop.f32.mrb[84].mxu0 }
0x1f58   :  { %v2824_v1 = vpack.c.bf16 %v2818_v63, %v2770_v59  ;;  %v3883_v2 = vpop.f32.mrb[85].mxu0 }
0x1f59   :  { %v2821_v3 = vpop.f32.mrb[86].mxu0 }
0x1f5a   :  { %v3884_v4 = vpop.f32.mrb[87].mxu0  ;;  %3888 = vmatmul.mubr.msk.bf16.vlgmr.msra.gmra.mrb[88].mxu1 %vm392_vm3, %v2824_v1 }
0x1f5b   :  { %3907 = vmatprep.mubr.msk.bf16.mxu1 %vm4413_vm0, %v4412_v0 }
0x202d   :  { %v2865_v5 = vpop.f32.mrb[88].mxu1 }
0x202e   :  { %v2872_v7 = vadd.f32 %v2865_v5, %v2602_v34  ;;  %v3889_v8 = vpop.f32.mrb[89].mxu1  ;;  %v3974_v34 = vld [vmem:[%s5306_s14 + $0x20] sm:$0xff]  }
0x202f   :  { %v2868_v9 = vpop.f32.mrb[90].mxu1  ;;  %3900 = vmatpush3.bf16.msra.mxu1 %v3974_v34 }
0x2030   :  { %v2882_v10 = vadd.f32 %v3456_v6, %v2872_v7  ;;  %v2873_v11 = vadd.f32 %v2868_v9, %v2603_v37  ;;  %v3890_v12 = vpop.f32.mrb[91].mxu1  ;;  %3901 = vmatprep.subr.bf16.mxu1 %v4412_v0 }
0x2032   :  { %v2883_v13 = vadd.f32 %v3456_v6, %v2873_v11  ;;  %v2884_v14 = vadd.f32 %v2882_v10, %v5007_v28 }
0x2033   :  { %3902 = vmatpush3.bf16.msra.mxu1 %v3975_v35 }
0x2034   :  { %v2890_v17 = vsel %vm335_vm2, %v2884_v14, 0.0  ;;  %v2885_v18 = vadd.f32 %v2883_v13, %v5009_v30  ;;  %v3972_v30 = vld [vmem:[%s5304_s12 + $0x10] sm:$0xff]   ;;  %3903 = vmatprep.subr.bf16.mxu1 %v4412_v0 }
0x2035   :  { %2891 = vadd.xlane.f32.xlu1 %v2890_v17  ;;  %3892 = vmatpush3.bf16.msra.mxu0 %v3972_v30 }
0x2036   :  { %v2893_v15 = vsel %vm335_vm2, %v2885_v18, 0.0  ;;  %3893 = vmatprep.subr.bf16.mxu0 %v4412_v0 }
0x2037   :  { %2894 = vadd.xlane.f32.xlu0 %v2893_v15  ;;  %3904 = vmatpush3.bf16.msra.mxu1 %v3976_v36 }
0x2038   :  { %3905 = vmatprep.subr.bf16.mxu1 %v4412_v0 }
0x2039   :  { %3894 = vmatpush3.bf16.msra.mxu0 %v3973_v33  ;;  %v3482_v33 = vld [vmem:[#allocation17 + $0x1] ss:$0 sm:$0xff] }
0x203a   :  { %3911 = vmatprep.subr.bf16.mxu0 %v4412_v0 }
0x203b   :  { %3906 = vmatpush3.bf16.msra.mxu1 %v3977_v51 }
0x20c2   :  { %v2892_v16 = vpop.xlane.xlu1 %2891 }
0x20c3   :  { %v2896_v19 = vmul.f32 0.03125, %v2892_v16 }
0x20c4   :  { %v2895_v20 = vpop.xlane.xlu0 %2894 }
0x20c5   :  { %v2898_v21 = vsub.f32 %v2884_v14, %v2896_v19  ;;  %v2897_v22 = vmul.f32 0.03125, %v2895_v20 }
0x20c7   :  { %v2899_v24 = vsub.f32 %v2885_v18, %v2897_v22  ;;  %v2900_v27 = vmul.f32 %v2898_v21, %v2898_v21 }
0x20c9   :  { %v2902_v31 = vsel %vm335_vm2, %v2900_v27, 0.0  ;;  %v2901_v32 = vmul.f32 %v2899_v24, %v2899_v24 }
0x20ca   :  { %2903 = vadd.xlane.f32.xlu1 %v2902_v31 }
0x20cb   :  { %v2905_v28 = vsel %vm335_vm2, %v2901_v32, 0.0  ;;  %v3481_v32 = vld [vmem:[#allocation16 + $0x1] ss:$0 sm:$0xff] }
0x20cc   :  { %2906 = vadd.xlane.f32.xlu0 %v2905_v28 }
0x2157   :  { %v2904_v25 = vpop.xlane.xlu1 %2903 }
0x2158   :  { %v2908_v37 = vmul.f32 0.03125, %v2904_v25 }
0x2159   :  { %v2907_v39 = vpop.xlane.xlu0 %2906 }
0x215a   :  { %v2910_v40 = vadd.f32 1e-05, %v2908_v37  ;;  %v2909_v41 = vmul.f32 0.03125, %v2907_v39 }
0x215c   :  { %4055 = vrsqrt.f32 %v2910_v40  ;;  %v2911_v42 = vadd.f32 1e-05, %v2909_v41 }
0x215e   :  { %4057 = vrsqrt.f32 %v2911_v42 }
0x2166   :  { %v4056_v43 = vpop.eup %4055 }
0x2167   :  { %v2914_v45 = vmul.f32 %v4056_v43, %v2898_v21 }
0x2168   :  { %v4058_v46 = vpop.eup %4057 }
0x2169   :  { %v2922_v47 = vmul.f32 %v3457_v44, %v2914_v45  ;;  %v2915_v38 = vmul.f32 %v4058_v46, %v2899_v24 }
0x216b   :  { %v2923_v26 = vmul.f32 %v3457_v44, %v2915_v38  ;;  %v2930_v49 = vadd.f32 %v3458_v48, %v2922_v47 }
0x216d   :  { %v2931_v23 = vadd.f32 %v3458_v48, %v2923_v26 }
0x216f   :  { %v2937_v50 = vpack.c.bf16 %v2931_v23, %v2930_v49 }
0x2171   :  { %3896 = vmatmul.mubr.msk.bf16.vlgmr.msra.gmra.mrb[88].mxu0 %vm335_vm2, %v2937_v50  ;;  %v3979_v50 = vld [vmem:[#allocation22 + $0x8] sm:$0xff]  }
0x2172   :  { %3915 = vmatprep.mubr.msk.bf16.mxu0 %vm4413_vm0, %v4412_v0 }
0x2244   :  { %v2995_v53 = vpop.f32.mrb[88].mxu0 }
0x2245   :  { %v2996_v54 = vadd.f32 %v3463_v52, %v2995_v53  ;;  %v3897_v55 = vpop.f32.mrb[89].mxu0 }
0x2246   :  { %v2998_v56 = vpop.f32.mrb[90].mxu0 }
0x2247   :  { %v2999_v57 = vadd.f32 %v3463_v52, %v2998_v56  ;;  %v3898_v58 = vpop.f32.mrb[91].mxu0  ;;  %v3002_v29 = vmax.f32 %v2996_v54, 0.0 }
0x2249   :  { %v3003_v59 = vmax.f32 %v2999_v57, 0.0  ;;  %v3483_v57 = vld [vmem:[%s5308_s16] ss:$0 sm:$0xff] }
0x224b   :  { %v3013_v60 = vpack.c.bf16 %v3003_v59, %v3002_v29  ;;  %v3484_v59 = vld [vmem:[%s5309_s17] ss:$0 sm:$0xff] }
0x224d   :  { %3908 = vmatmul.mubr.msk.bf16.vlgmr.msra.gmra.mrb[92].mxu1 %vm1630_vm5, %v3013_v60 }
0x2320   :  { %v3083_v62 = vpop.f32.mrb[92].mxu1 }
0x2321   :  { %v3084_v63 = vadd.f32 %v3475_v61, %v3083_v62  ;;  %v3909_v1 = vpop.f32.mrb[93].mxu1 }
0x2322   :  { %v3086_v2 = vpop.f32.mrb[94].mxu1 }
0x2323   :  { %v3087_v3 = vadd.f32 %v3475_v61, %v3086_v2  ;;  %v3910_v4 = vpop.f32.mrb[95].mxu1  ;;  %v3090_v5 = vadd.f32 %v3084_v63, %v2930_v49 }
0x2325   :  { %v3096_v6 = vsel %vm335_vm2, %v3090_v5, 0.0  ;;  %v3091_v7 = vadd.f32 %v3087_v3, %v2931_v23  ;;  %v3978_v23 = vld [vmem:[#allocation22] sm:$0xff]  }
0x2326   :  { %3097 = vadd.xlane.f32.xlu1 %v3096_v6  ;;  %3912 = vmatpush3.bf16.msra.mxu0 %v3978_v23 }
0x2327   :  { %v3099_v8 = vsel %vm335_vm2, %v3091_v7, 0.0  ;;  %3913 = vmatprep.subr.bf16.mxu0 %v4412_v0 }
0x2328   :  { %3100 = vadd.xlane.f32.xlu0 %v3099_v8 }
0x232a   :  { %3914 = vmatpush3.bf16.msra.mxu0 %v3979_v50 }
0x232b   :  { %3919 = vmatprep.subr.bf16.mxu0 %v4412_v0 }
0x23b3   :  { %v3098_v9 = vpop.xlane.xlu1 %3097 }
0x23b4   :  { %v3102_v10 = vmul.f32 0.03125, %v3098_v9 }
0x23b5   :  { %v3101_v11 = vpop.xlane.xlu0 %3100 }
0x23b6   :  { %v3104_v12 = vsub.f32 %v3090_v5, %v3102_v10  ;;  %v3103_v13 = vmul.f32 0.03125, %v3101_v11 }
0x23b8   :  { %v3105_v14 = vsub.f32 %v3091_v7, %v3103_v13  ;;  %v3106_v17 = vmul.f32 %v3104_v12, %v3104_v12 }
0x23ba   :  { %v3108_v18 = vsel %vm335_vm2, %v3106_v17, 0.0  ;;  %v3107_v15 = vmul.f32 %v3105_v14, %v3105_v14 }
0x23bb   :  { %3109 = vadd.xlane.f32.xlu1 %v3108_v18 }
0x23bc   :  { %v3111_v16 = vsel %vm335_vm2, %v3107_v15, 0.0 }
0x23bd   :  { %3112 = vadd.xlane.f32.xlu0 %v3111_v16 }
0x2448   :  { %v3110_v19 = vpop.xlane.xlu1 %3109 }
0x2449   :  { %v3114_v20 = vmul.f32 0.03125, %v3110_v19 }
0x244a   :  { %v3113_v21 = vpop.xlane.xlu0 %3112 }
0x244b   :  { %v3116_v22 = vadd.f32 1e-05, %v3114_v20  ;;  %v3115_v24 = vmul.f32 0.03125, %v3113_v21 }
0x244d   :  { %4059 = vrsqrt.f32 %v3116_v22  ;;  %v3117_v27 = vadd.f32 1e-05, %v3115_v24 }
0x244f   :  { %4061 = vrsqrt.f32 %v3117_v27  ;;  %v3980_v27 = vld [vmem:[%s5312_s20] sm:$0xff]  }
0x2457   :  { %v4060_v31 = vpop.eup %4059 }
0x2458   :  { %v3120_v28 = vmul.f32 %v4060_v31, %v3104_v12  ;;  %v3981_v31 = vld [vmem:[%s5312_s20 + $0x8] sm:$0xff]  }
0x2459   :  { %v4062_v30 = vpop.eup %4061 }
0x245a   :  { %v3128_v34 = vmul.f32 %v3481_v32, %v3120_v28  ;;  %v3121_v35 = vmul.f32 %v4062_v30, %v3105_v14  ;;  %v3485_v28 = vld [vmem:[%s5311_s19] ss:$0 sm:$0xff]  ;;  %s3363_s19 = sshll.u32 %s4424_s2, 4  ;;  %s3364_s19 = int_to_ptr.vmem [resolvable:$true] %s3363_s19 }
0x245b   :  { %s4355_s22 = scalar_lea.vmem %s3364_s19, 32  ;;  %p4360_p7 = scmp.lt.s32.totalorder %s3364_s19, %s3364_s19 }
0x245c   :  { %v3136_v25 = vadd.f32 %v3482_v33, %v3128_v34  ;;  %v3129_v37 = vmul.f32 %v3481_v32, %v3121_v35  ;;  %v3982_v32 = vld [vmem:[%s5312_s20 + $0x10] sm:$0xff]   ;;  %p4356_p6 = scmp.ne.s32.totalorder %s3364_s19, %s4355_s22  ;;  %p4361_p8 = scmp.lt.s32.totalorder %s4355_s22, %s4355_s22 }
0x245e   :  { %v3140_v39 = vsel %vm335_vm2, %v3136_v25, 0.0  ;;  %v3137_v40 = vadd.f32 %v3482_v33, %v3129_v37  ;;  %p4362_p9 = por %p4361_p8, %p4360_p7 }
0x245f   :  { %3141 = vadd.xlane.f32.xlu1 %v3140_v39 }
0x2460   :  { %v3143_v41 = vsel %vm335_vm2, %v3137_v40, 0.0  ;;  %p4363_p10 = pnand %p4362_p9, %p4356_p6 }
0x2461   :  { %3144 = vadd.xlane.f32.xlu0 %v3143_v41 }
0x24ec   :  { %v3142_v42 = vpop.xlane.xlu1 %3141 }
0x24ed   :  { %v3146_v43 = vmul.f32 0.03125, %v3142_v42 }
0x24ee   :  { %v3145_v44 = vpop.xlane.xlu0 %3144 }
0x24ef   :  { %v3148_v45 = vsub.f32 %v3136_v25, %v3146_v43  ;;  %v3147_v46 = vmul.f32 0.03125, %v3145_v44  ;;  %v3489_v43 = vld [vmem:[%s5342_s27] ss:$0 sm:$0xff] }
0x24f1   :  { %v3149_v47 = vsub.f32 %v3137_v40, %v3147_v46  ;;  %v3150_v38 = vmul.f32 %v3148_v45, %v3148_v45 }
0x24f3   :  { %v3152_v48 = vsel %vm335_vm2, %v3150_v38, 0.0  ;;  %v3151_v26 = vmul.f32 %v3149_v47, %v3149_v47 }
0x24f4   :  { %3153 = vadd.xlane.f32.xlu1 %v3152_v48 }
0x24f5   :  { %v3155_v49 = vsel %vm335_vm2, %v3151_v26, 0.0 }
0x24f6   :  { %3156 = vadd.xlane.f32.xlu0 %v3155_v49 }
0x2581   :  { %v3154_v36 = vpop.xlane.xlu1 %3153 }
0x2582   :  { %v3158_v51 = vmul.f32 0.03125, %v3154_v36 }
0x2583   :  { %v3157_v52 = vpop.xlane.xlu0 %3156 }
0x2584   :  { %v3160_v53 = vadd.f32 1e-05, %v3158_v51  ;;  %v3159_v54 = vmul.f32 0.03125, %v3157_v52 }
0x2586   :  { %4063 = vrsqrt.f32 %v3160_v53  ;;  %v3161_v55 = vadd.f32 1e-05, %v3159_v54 }
0x2588   :  { %4065 = vrsqrt.f32 %v3161_v55 }
0x2590   :  { %v4064_v56 = vpop.eup %4063 }
0x2591   :  { %v3164_v58 = vmul.f32 %v4064_v56, %v3148_v45 }
0x2592   :  { %v4066_v29 = vpop.eup %4065 }
0x2593   :  { %v3172_v60 = vmul.f32 %v3483_v57, %v3164_v58  ;;  %v3165_v61 = vmul.f32 %v4066_v29, %v3149_v47 }
0x2595   :  { %v3180_v62 = vadd.f32 %v3484_v59, %v3172_v60  ;;  %v3173_v63 = vmul.f32 %v3483_v57, %v3165_v61 }
0x2597   :  { %v3182_v1 = vsel %vm335_vm2, %v3180_v62, 0.0  ;;  %v3181_v2 = vadd.f32 %v3484_v59, %v3173_v63 }
0x2598   :  { %v3183_v3 = vrot.slane %v3182_v1, 4 }
0x2599   :  { %v3189_v4 = vsel %vm335_vm2, %v3181_v2, 0.0 }
0x259a   :  { %v3184_v5 = vadd.f32 %v3183_v3, %v3182_v1  ;;  %v3190_v6 = vrot.slane %v3189_v4, 4 }
0x259c   :  { %v3185_v7 = vrot.slane %v3184_v5, 2  ;;  %v3191_v8 = vadd.f32 %v3190_v6, %v3189_v4 }
0x259e   :  { %v3192_v9 = vrot.slane %v3191_v8, 2  ;;  %v3186_v10 = vadd.f32 %v3185_v7, %v3184_v5 }
0x25a0   :  { %v3187_v11 = vrot.slane %v3186_v10, 1  ;;  %v3193_v12 = vadd.f32 %v3192_v9, %v3191_v8 }
0x25a2   :  { %v3188_v13 = vadd.f32 %v3187_v11, %v3186_v10  ;;  %v3194_v14 = vrot.slane %v3193_v12, 1 }
0x25a4   :  { %v3195_v17 = vadd.f32 %v3194_v14, %v3193_v12  ;;  %v3197_v18 = vmul.f32 0.125, %v3188_v13 }
0x25a6   :  { %v3198_v15 = vmul.f32 0.125, %v3195_v17  ;;  %v3203_v16 = vpack.c.bf16 %v3197_v18, %v3197_v18 }
0x25a8   :  { %v3204_v19 = vpack.c.bf16 %v3198_v15, %v3198_v15  ;;  %v3214_v20 = vunpack.c.l.b16 %v3203_v16 }
0x25aa   :  { %v3215_v21 = vunpack.c.l.b16 %v3204_v19 }
0x25ac   :  { %v3217_v22 = vsel %vm3216_vm6, %v3215_v21, %v3214_v20 }
0x25ad   :  { %v3218_v24 = vpack.c.b16 %v3217_v22, %v3217_v22 }
0x25af   :  { %3916 = vmatmul.mubr.msk.bf16.vlgmr.msra.gmra.mrb[92].mxu0 %vm335_vm2, %v3218_v24 }
0x25b0   :  { %3925 = vmatprep.mubr.msk.bf16.mxu0 %vm4413_vm0, %v4412_v0  ;;  %3920 = vmatpush3.bf16.msra.mxu0 %v3980_v27 }
0x25b1   :  { %3921 = vmatprep.subr.bf16.mxu0 %v4412_v0 }
0x25b4   :  { %3922 = vmatpush3.bf16.msra.mxu0 %v3981_v31 }
0x25b5   :  { %3923 = vmatprep.subr.bf16.mxu0 %v4412_v0 }
0x25b8   :  { %3924 = vmatpush3.bf16.msra.mxu0 %v3982_v32 }
0x2682   :  { %v3268_v30 = vpop.f32.mrb[92].mxu0 }
0x2683   :  { %v3269_v33 = vadd.f32 %v3485_v28, %v3268_v30  ;;  %v3917_v34 = vpop.f32.mrb[93].mxu0 }
0x2684   :  { %v3271_v35 = vpop.f32.mrb[94].mxu0 }
0x2685   :  { %v3275_v25 = vmul.f32 0.70710677, %v3269_v33  ;;  %v3918_v37 = vpop.f32.mrb[95].mxu0  ;;  %v3274_v40 = vmul.f32 0.5, %v3269_v33 }
0x2687   :  { %4067 = verf.f32 %v3275_v25 }
0x2691   :  { %v4068_v39 = vpop.eup %4067 }
0x2692   :  { %v3277_v41 = vadd.f32 1.0, %v4068_v39 }
0x2694   :  { %v3278_v0 = vmul.f32 %v3277_v41, %v3274_v40 }
0x2696   :  { %v3285_v42 = vpack.c.bf16 %v3278_v0, %v3278_v0 }
0x2698   :  { %3926 = vmatmul.mubr.msk.bf16.vlgmr.msra.gmra.mrb[96].mxu0 %vm3311_vm7, %v3285_v42 }
0x276b   :  { %v3349_v44 = vpop.f32.mrb[96].mxu0 }
0x276c   :  { %v3350_v45 = vadd.f32 %v3489_v43, %v3349_v44  ;;  %v3927_v46 = vpop.f32.mrb[97].mxu0 }
0x276d   :  { %v3352_v47 = vpop.f32.mrb[98].mxu0 }
0x276e   :  { %v3928_v38 = vpop.f32.mrb[99].mxu0  ;;  %3356 = vst.msk [vmem:[#allocation23] sm:$0x3] %vm3355_vm8, %v3350_v45 }
0x276f   :  { %4366 = shalt.err (!%p4363_p10)
}
0x2770   :  { %s5343_s15 = sld [smem:[#allocation40_spill]] }
0x2776   :  { %s4367_s3 = scalar_lea.hbm %s5343_s15, 32 }
0x2777   :  { %p4368_p11 = scmp.ne.s32.totalorder %s5343_s15, %s4367_s3  ;;  %p4371_p12 = scmp.lt.u32.totalorder %s4367_s3, %s5343_s15 }
0x2779   :  { %p4373_p13 = pnand %p4371_p12, %p4368_p11 }
0x277b   :  { %4376 = shalt.err (!%p4373_p13)
}
0x277c   :  { %3366 = dma.vmem_to_hbm [thread:$0]  %s3364_s19, 32, %s5343_s15, [#allocation4]  }
0x277d   :  { %4391 = dma.done.wait [#allocation4], 32  }
0x277e   :  { %4392 = vsyncadd [#allocation4], 4294967264 }
0x277f   :  { %3370 = vsyncpa [#allocation3], 1 }
0x2780   :  { %3371 = vsyncpa [#allocation6], 1 }
0x2781   :  { %3372 = vsyncpa [#allocation9], 1 }
0x2782   :  { %3373 = vsyncpa [#allocation12], 1 }
0x2783   :  { %3374 = vsyncpa [#allocation15], 1 }
0x2784   :  { %3375 = vsyncpa [#allocation18], 1 }
0x2785   :  { %3376 = vsyncpa [#allocation21], 1 }
0x2786   :  { %3377 = vsyncpa [#allocation4], 1 }

</bundles_post_ra>
